<compile_context>
chip_gen: v7x
topology: tpu7x:2x2x1
jax: 0.10.0
libtpu: 0.0.40
codegen_flags: <defaults>
</compile_context>

<pallas_src>
import functools
import math

import jax
import jax.numpy as jnp
from jax.experimental import pallas as pl
from jax.experimental.pallas import tpu as pltpu


# ----------------------------------------------------------------------------
# helpers
# ----------------------------------------------------------------------------
def _round_up(x, m):
    return ((x + m - 1) // m) * m


def _pick_tile(n, max_tile=32):
    """News items per grid step: multiple of 8 (sublane-dense [TN, E] output),
    capped at max_tile (v7x VMEM headroom), sized so the grid has >= 2 steps
    whenever n > 8 (keeps both v7x TensorCores busy)."""
    if n <= 8:
        return 8                       # single step; too small to split sublane-aligned
    return min(max_tile, 8 * max(1, n // 16))


def _pick_batch_tile(b, max_tile=16):
    """Batch rows per grid step for the user/score kernel."""
    if b <= 8:
        return b                       # block == full batch extent (allowed by layout rules)
    return min(max_tile, 8 * max(1, b // 16))


def _const_spec(arr):
    """BlockSpec for a small constant (weight / mask) identical for every grid step."""
    nd = arr.ndim
    return pl.BlockSpec(arr.shape, lambda *_: (0,) * nd)


def _mask_biases(padded_len, valid_len):
    """Additive softmax biases (0 for valid, -1e30 for padded positions)."""
    bias = jnp.where(jnp.arange(padded_len) < valid_len, 0.0, -1e30).astype(jnp.float32)
    return bias.reshape(1, 1, padded_len), bias.reshape(1, padded_len, 1)


# ----------------------------------------------------------------------------
# Kernels
# ----------------------------------------------------------------------------
def _news_encoder_kernel(x_ref, kb_ref, pb_ref, wqkv_ref, bqkv_ref, wo_ref, bo_ref,
                         wp_ref, bp_ref, wa_ref, ba_ref, qv_ref,
                         o_ref, *, num_heads):
    """Fused news encoder for a tile of TN items:
       MHA(E,H) -> Linear(E,E) -> additive-attention pooling over Sp.
       Weights arrive pre-transposed (x @ W); big-matmul weights are bf16."""
    f32, bf16 = jnp.float32, jnp.bfloat16
    x = x_ref[...]                                                # [TN, Sp, E] bf16
    TN, Sp, E = x.shape
    x2 = x.astype(f32).reshape(TN * Sp, E)                        # f32 collapse (safe layout)

    # ---- QKV projection: ONE bf16 MXU matmul, f32 accumulate ----------------
    qkv = jnp.dot(x2.astype(bf16), wqkv_ref[...],
                  preferred_element_type=f32) + bqkv_ref[...]     # [TN*Sp, 3E]
    dh = E // num_heads
    scale = 1.0 / math.sqrt(dh)
    q3 = qkv[:, :E].reshape(TN, Sp, E)
    k3 = qkv[:, E:2 * E].reshape(TN, Sp, E)
    v3 = qkv[:, 2 * E:].reshape(TN, Sp, E)
    key_bias = kb_ref[...]                                        # [1, 1, Sp] (0 / -1e30)

    heads = []
    for h in range(num_heads):                                    # static, small head count
        lo, hi = h * dh, (h + 1) * dh
        qh, kh, vh = q3[:, :, lo:hi], k3[:, :, lo:hi], v3[:, :, lo:hi]
        s = jnp.einsum('nqd,nkd->nqk', qh, kh, preferred_element_type=f32) * scale
        s = s + key_bias                                          # mask padded keys
        s = s - jnp.max(s, axis=-1, keepdims=True)
        p = jnp.exp(s)
        p = p * pl.reciprocal(jnp.sum(p, axis=-1, keepdims=True), approx=True)
        heads.append(jnp.einsum('nqk,nkd->nqd', p, vh, preferred_element_type=f32))
    ctx = jnp.concatenate(heads, axis=-1).reshape(TN * Sp, E)     # concat heads
    attn = jnp.dot(ctx.astype(bf16), wo_ref[...],
                   preferred_element_type=f32) + bo_ref[...]      # single out-proj

    # TODO(synk): F.dropout (p=0.2 / 0.1) in the reference is stochastic even at
    # eval (training=True default); treated as identity here.

    # ---- Linear(E, E) projection --------------------------------------------
    proj = jnp.dot(attn.astype(bf16), wp_ref[...],
                   preferred_element_type=f32) + bp_ref[...]      # [TN*Sp, E]

    # ---- additive-attention pooling over Sp ----------------------------------
    t = jnp.tanh(jnp.dot(proj, wa_ref[...], preferred_element_type=f32)
                 + ba_ref[...])                                   # [TN*Sp, Q]
    Qd = t.shape[-1]
    t3 = t.reshape(TN, Sp, Qd)
    sc = jnp.sum(t3 * qv_ref[...].reshape(1, 1, Qd), axis=-1, keepdims=True)   # [TN, Sp, 1]
    sc = sc + pb_ref[...]                                         # mask padded positions
    sc = sc - jnp.max(sc, axis=1, keepdims=True)
    w = jnp.exp(sc)
    w = w * pl.reciprocal(jnp.sum(w, axis=1, keepdims=True), approx=True)
    pooled = jnp.sum(proj.reshape(TN, Sp, E) * w, axis=1)         # [TN, E]  (dense output)
    o_ref[...] = pooled.astype(o_ref.dtype)


def _user_score_kernel(clk_ref, cand_ref, kb_ref, pb_ref, wqkv_ref, bqkv_ref,
                       wo_ref, bo_ref, wp_ref, bp_ref, wa_ref, ba_ref, qv_ref,
                       uvec_ref, pred_ref, sig_ref, *, num_heads):
    """Fused user-level encoder + scoring for a tile of TB batch rows:
       MHA over clicked-news vectors -> Linear -> additive pooling
       -> dot with candidate vectors -> sigmoid."""
    f32, bf16 = jnp.float32, jnp.bfloat16
    x = clk_ref[...].astype(f32)                                  # [TB, NCp, E]
    TB, NCp, E = x.shape
    x2 = x.reshape(TB * NCp, E)

    qkv = jnp.dot(x2.astype(bf16), wqkv_ref[...],
                  preferred_element_type=f32) + bqkv_ref[...]     # [TB*NCp, 3E]
    dh = E // num_heads
    scale = 1.0 / math.sqrt(dh)
    q3 = qkv[:, :E].reshape(TB, NCp, E)
    k3 = qkv[:, E:2 * E].reshape(TB, NCp, E)
    v3 = qkv[:, 2 * E:].reshape(TB, NCp, E)
    key_bias = kb_ref[...]                                        # [1, 1, NCp]

    heads = []
    for h in range(num_heads):
        lo, hi = h * dh, (h + 1) * dh
        s = jnp.einsum('bqd,bkd->bqk', q3[:, :, lo:hi], k3[:, :, lo:hi],
                       preferred_element_type=f32) * scale
        s = s + key_bias
        s = s - jnp.max(s, axis=-1, keepdims=True)
        p = jnp.exp(s)
        p = p * pl.reciprocal(jnp.sum(p, axis=-1, keepdims=True), approx=True)
        heads.append(jnp.einsum('bqk,bkd->bqd', p, v3[:, :, lo:hi],
                                preferred_element_type=f32))
    ctx = jnp.concatenate(heads, axis=-1).reshape(TB * NCp, E)
    attn = jnp.dot(ctx.astype(bf16), wo_ref[...],
                   preferred_element_type=f32) + bo_ref[...]

    # TODO(synk): dropout treated as identity (see news kernel).
    proj = jnp.dot(attn.astype(bf16), wp_ref[...],
                   preferred_element_type=f32) + bp_ref[...]      # [TB*NCp, E]
    t = jnp.tanh(jnp.dot(proj, wa_ref[...], preferred_element_type=f32) + ba_ref[...])
    Qd = t.shape[-1]
    sc = jnp.sum(t.reshape(TB, NCp, Qd) * qv_ref[...].reshape(1, 1, Qd),
                 axis=-1, keepdims=True)                          # [TB, NCp, 1]
    sc = sc + pb_ref[...]
    sc = sc - jnp.max(sc, axis=1, keepdims=True)
    w = jnp.exp(sc)
    w = w * pl.reciprocal(jnp.sum(w, axis=1, keepdims=True), approx=True)
    user = jnp.sum(proj.reshape(TB, NCp, E) * w, axis=1)          # [TB, E]
    uvec_ref[...] = user.astype(uvec_ref.dtype)

    cand = cand_ref[...].astype(f32)                              # [TB, C, E]
    pred = jnp.sum(cand * user[:, None, :], axis=-1)              # [TB, C]
    pred_ref[...] = pred.astype(pred_ref.dtype)
    sig_ref[...] = (1.0 / (1.0 + jnp.exp(-pred))).astype(sig_ref.dtype)


# ----------------------------------------------------------------------------
# Pallas wrappers
# ----------------------------------------------------------------------------
def fused_news_encode(tokens, emb_table, weights, *, num_heads, max_tile=32):
    """tokens: [N, S] int32 ids -> [N, E] f32 encoded news vectors (one call).
       Pads the int32 ids (not the [N,S,E] embeddings) and masks padded positions."""
    N, S = tokens.shape
    E = emb_table.shape[-1]
    Sp = _round_up(S, 8)
    TN = _pick_tile(N, max_tile)
    n_pad = _round_up(N, TN)
    tokens = jnp.pad(tokens, ((0, n_pad - N), (0, Sp - S)))       # pad cheap int32 ids
    # TODO(synk): embedding gather stays in plain JAX (jnp.take); a DMA-gather
    # kernel is not worthwhile at these sizes.
    emb = jnp.take(emb_table, tokens, axis=0)                     # [n_pad, Sp, E] bf16
    key_bias, pool_bias = _mask_biases(Sp, S)

    kernel = functools.partial(_news_encoder_kernel, num_heads=num_heads)
    out = pl.pallas_call(
        kernel,
        out_shape=jax.ShapeDtypeStruct((n_pad, E), jnp.float32),
        grid=(n_pad // TN,),
        in_specs=[pl.BlockSpec((TN, Sp, E), lambda i: (i, 0, 0)),
                  _const_spec(key_bias), _const_spec(pool_bias)]
                 + [_const_spec(a) for a in weights],
        out_specs=pl.BlockSpec((TN, E), lambda i: (i, 0)),
        compiler_params=pltpu.CompilerParams(
            dimension_semantics=("parallel",),
            vmem_limit_bytes=32 * 1024 * 1024),
    )(emb, key_bias, pool_bias, *weights)
    return out[:N]                                                # [N, E]


def fused_user_score(click_vecs, cand_vecs, weights, *, num_heads, max_tile=16):
    """click_vecs: [B, NC, E], cand_vecs: [B, C, E] ->
       (user_vec [B,E], prediction [B,C], sigmoid(prediction) [B,C])."""
    B, NC, E = click_vecs.shape
    C = cand_vecs.shape[1]
    NCp = _round_up(NC, 8)
    TB = _pick_batch_tile(B, max_tile)
    B_pad = _round_up(B, TB)
    clk = jnp.pad(click_vecs, ((0, B_pad - B), (0, NCp - NC), (0, 0)))
    cnd = jnp.pad(cand_vecs, ((0, B_pad - B), (0, 0), (0, 0)))
    key_bias, pool_bias = _mask_biases(NCp, NC)

    kernel = functools.partial(_user_score_kernel, num_heads=num_heads)
    uvec, pred, sig = pl.pallas_call(
        kernel,
        out_shape=(jax.ShapeDtypeStruct((B_pad, E), jnp.float32),
                   jax.ShapeDtypeStruct((B_pad, C), jnp.float32),
                   jax.ShapeDtypeStruct((B_pad, C), jnp.float32)),
        grid=(B_pad // TB,),
        in_specs=[pl.BlockSpec((TB, NCp, E), lambda b: (b, 0, 0)),
                  pl.BlockSpec((TB, C, E), lambda b: (b, 0, 0)),
                  _const_spec(key_bias), _const_spec(pool_bias)]
                 + [_const_spec(a) for a in weights],
        out_specs=(pl.BlockSpec((TB, E), lambda b: (b, 0)),
                   pl.BlockSpec((TB, C), lambda b: (b, 0)),
                   pl.BlockSpec((TB, C), lambda b: (b, 0))),
        compiler_params=pltpu.CompilerParams(
            dimension_semantics=("parallel",),
            vmem_limit_bytes=32 * 1024 * 1024),
    )(clk, cnd, key_bias, pool_bias, *weights)
    return uvec[:B], pred[:B], sig[:B]


# ----------------------------------------------------------------------------
# NRMS forward (glue in plain JAX, hot paths in Pallas)
# ----------------------------------------------------------------------------
def init_params(hp, seed=0):
    E, Q, V = hp["hidden_size"], hp["q_size"], hp["vocab_size"]
    keys = jax.random.split(jax.random.PRNGKey(seed), 19)
    n = lambda k, s: 0.1 * jax.random.normal(k, s, dtype=jnp.float32)
    return {
        "embedding": n(keys[0], (V, E)),
        # news-level encoder (PyTorch parameter layouts)
        "enc_mha_wqkv": n(keys[1], (3 * E, E)), "enc_mha_bqkv": n(keys[2], (1, 3 * E)),
        "enc_mha_wo": n(keys[3], (E, E)),       "enc_mha_bo": n(keys[4], (1, E)),
        "enc_proj_w": n(keys[5], (E, E)),       "enc_proj_b": n(keys[6], (1, E)),
        "enc_att_w": n(keys[7], (Q, E)),        "enc_att_b": n(keys[8], (1, Q)),
        "enc_att_q": n(keys[9], (1, Q)),
        # user-level
        "usr_mha_wqkv": n(keys[10], (3 * E, E)), "usr_mha_bqkv": n(keys[11], (1, 3 * E)),
        "usr_mha_wo": n(keys[12], (E, E)),       "usr_mha_bo": n(keys[13], (1, E)),
        "usr_proj_w": n(keys[14], (E, E)),       "usr_proj_b": n(keys[15], (1, E)),
        "usr_att_w": n(keys[16], (Q, E)),        "usr_att_b": n(keys[17], (1, Q)),
        "usr_att_q": n(keys[18], (1, Q)),
    }


def _kernel_weights(params, prefix):
    """Pre-transpose PyTorch-layout weights into x @ W layout ONCE, outside the
    kernels; the three big matmul weights are cast to bf16 (f32 accumulate in
    kernel), additive-attention params and biases stay f32."""
    bf16 = jnp.bfloat16
    return (params[f"{prefix}_mha_wqkv"].T.astype(bf16), params[f"{prefix}_mha_bqkv"],
            params[f"{prefix}_mha_wo"].T.astype(bf16),   params[f"{prefix}_mha_bo"],
            params[f"{prefix}_proj_w"].T.astype(bf16),   params[f"{prefix}_proj_b"],
            params[f"{prefix}_att_w"].T,                 params[f"{prefix}_att_b"],
            params[f"{prefix}_att_q"])


def nrms_forward(params, hp, clicks, candidates, labels=None, deep_cross=False):
    B, NC, S = clicks.shape
    C = candidates.shape[1]
    H = hp["head_num"]

    enc_w = _kernel_weights(params, "enc")
    usr_w = _kernel_weights(params, "usr")
    emb_table = params["embedding"].astype(jnp.bfloat16)   # bf16 halves the dominant HBM read

    # Encode clicked + candidate news titles in a single fused pallas_call.
    tokens = jnp.concatenate([clicks.reshape(B * NC, S),
                              candidates.reshape(B * C, S)], axis=0)     # [B*(NC+C), S]
    news_vecs = fused_news_encode(tokens, emb_table, enc_w, num_heads=H)  # [N, E] f32
    click_vecs = news_vecs[:B * NC].reshape(B, NC, -1)
    cand_vecs = news_vecs[B * NC:].reshape(B, C, -1)

    # User-level MHA + projection + additive pooling + scoring + sigmoid, fused + batched.
    user_vec, pred, sig = fused_user_score(click_vecs, cand_vecs, usr_w, num_heads=H)

    if deep_cross:
        return user_vec, cand_vecs
    if labels is None:
        return sig
    # nn.CrossEntropyLoss glue (plain JAX).
    lbl = jnp.argmax(labels, axis=1)
    logp = jax.nn.log_softmax(pred, axis=-1)
    loss = -jnp.mean(jnp.take_along_axis(logp, lbl[:, None], axis=1))
    return loss, pred


# ----------------------------------------------------------------------------
if __name__ == "__main__":
    hp = {"hidden_size": 32, "head_num": 4, "q_size": 16, "vocab_size": 50}
    B, NUM_CLICKS, NUM_CAND, SEQ = 2, 4, 3, 8

    key = jax.random.PRNGKey(0)
    k1, k2, k3 = jax.random.split(key, 3)
    clicks = jax.random.randint(k1, (B, NUM_CLICKS, SEQ), 0, hp["vocab_size"], dtype=jnp.int32)
    candidates = jax.random.randint(k2, (B, NUM_CAND, SEQ), 0, hp["vocab_size"], dtype=jnp.int32)
    labels = jax.nn.one_hot(jax.random.randint(k3, (B,), 0, NUM_CAND), NUM_CAND)

    params = init_params(hp, seed=0)

    # eval path (labels=None): sigmoid scores
    scores_out = nrms_forward(params, hp, clicks, candidates)
    jax.block_until_ready(scores_out)

    # train path: loss + raw prediction
    loss, pred = nrms_forward(params, hp, clicks, candidates, labels=labels)
    jax.block_until_ready((loss, pred))

    # deep & cross path: (user vector, candidate vectors)
    uvec, cvecs = nrms_forward(params, hp, clicks, candidates, deep_cross=True)
    jax.block_until_ready((uvec, cvecs))

    assert scores_out.shape == (B, NUM_CAND)
    assert pred.shape == (B, NUM_CAND)
    assert uvec.shape == (B, hp["hidden_size"])
    assert cvecs.shape == (B, NUM_CAND, hp["hidden_size"])
    assert bool(jnp.all(jnp.isfinite(scores_out)))
    assert bool(jnp.isfinite(loss))
    print("KERNEL_OK")
</pallas_src>

<mosaic_0001>
module attributes {stable_mosaic.version = 11 : i64} {
  func.func @_news_encoder_kernel(%arg0: i32, %arg1: memref<8x8x32xbf16, #tpu.memory_space<vmem>>, %arg2: memref<1x1x8xf32, #tpu.memory_space<vmem>>, %arg3: memref<1x8x1xf32, #tpu.memory_space<vmem>>, %arg4: memref<32x96xbf16, #tpu.memory_space<vmem>>, %arg5: memref<1x96xf32, #tpu.memory_space<vmem>>, %arg6: memref<32x32xbf16, #tpu.memory_space<vmem>>, %arg7: memref<1x32xf32, #tpu.memory_space<vmem>>, %arg8: memref<32x32xbf16, #tpu.memory_space<vmem>>, %arg9: memref<1x32xf32, #tpu.memory_space<vmem>>, %arg10: memref<32x16xf32, #tpu.memory_space<vmem>>, %arg11: memref<1x16xf32, #tpu.memory_space<vmem>>, %arg12: memref<1x16xf32, #tpu.memory_space<vmem>>, %arg13: memref<8x32xf32, #tpu.memory_space<vmem>>) attributes {dimension_semantics = [#tpu.dimension_semantics<parallel>], iteration_bounds = array<i64: 2>, scalar_prefetch = 0 : i64, scratch_operands = 0 : i64, tpu.core_type = #tpu.core_type<tc>, window_params = [{transform_indices = @transform_0, window_bounds = array<i64: 8, 8, 32>}, {pipeline_mode = #tpu.pipeline_mode<synchronous>, transform_indices = @transform_1, window_bounds = array<i64: 1, 1, 8>}, {pipeline_mode = #tpu.pipeline_mode<synchronous>, transform_indices = @transform_2, window_bounds = array<i64: 1, 8, 1>}, {pipeline_mode = #tpu.pipeline_mode<synchronous>, transform_indices = @transform_3, window_bounds = array<i64: 32, 96>}, {pipeline_mode = #tpu.pipeline_mode<synchronous>, transform_indices = @transform_4, window_bounds = array<i64: 1, 96>}, {pipeline_mode = #tpu.pipeline_mode<synchronous>, transform_indices = @transform_5, window_bounds = array<i64: 32, 32>}, {pipeline_mode = #tpu.pipeline_mode<synchronous>, transform_indices = @transform_6, window_bounds = array<i64: 1, 32>}, {pipeline_mode = #tpu.pipeline_mode<synchronous>, transform_indices = @transform_7, window_bounds = array<i64: 32, 32>}, {pipeline_mode = #tpu.pipeline_mode<synchronous>, transform_indices = @transform_8, window_bounds = array<i64: 1, 32>}, {pipeline_mode = #tpu.pipeline_mode<synchronous>, transform_indices = @transform_9, window_bounds = array<i64: 32, 16>}, {pipeline_mode = #tpu.pipeline_mode<synchronous>, transform_indices = @transform_10, window_bounds = array<i64: 1, 16>}, {pipeline_mode = #tpu.pipeline_mode<synchronous>, transform_indices = @transform_11, window_bounds = array<i64: 1, 16>}, {transform_indices = @transform_12, window_bounds = array<i64: 8, 32>}]} {
    %c0 = arith.constant 0 : index
    %c0_0 = arith.constant 0 : index
    %c0_1 = arith.constant 0 : index
    %0 = vector.load %arg1[%c0, %c0_0, %c0_1] : memref<8x8x32xbf16, #tpu.memory_space<vmem>>, vector<8x8x32xbf16>
    %1 = arith.extf %0 : vector<8x8x32xbf16> to vector<8x8x32xf32>
    %2 = vector.shape_cast %1 : vector<8x8x32xf32> to vector<64x32xf32>
    %3 = arith.truncf %2 : vector<64x32xf32> to vector<64x32xbf16>
    %c0_2 = arith.constant 0 : index
    %c0_3 = arith.constant 0 : index
    %4 = vector.load %arg4[%c0_2, %c0_3] : memref<32x96xbf16, #tpu.memory_space<vmem>>, vector<32x96xbf16>
    %cst = arith.constant dense<0.000000e+00> : vector<64x96xf32>
    %5 = tpu.matmul %3, %4, %cst {dimension_numbers = #tpu.dot_dimension_numbers<[1], [0], [0], [1], [0, 0, 1, 1], [], []>} : vector<64x32xbf16>, vector<32x96xbf16>, vector<64x96xf32> -> vector<64x96xf32>
    %c0_4 = arith.constant 0 : index
    %c0_5 = arith.constant 0 : index
    %6 = vector.load %arg5[%c0_4, %c0_5] : memref<1x96xf32, #tpu.memory_space<vmem>>, vector<1x96xf32>
    %7 = vector.broadcast %6 : vector<1x96xf32> to vector<64x96xf32>
    %8 = arith.addf %5, %7 : vector<64x96xf32>
    %9 = vector.extract_strided_slice %8 {offsets = [0, 0], sizes = [64, 32], strides = [1, 1]} : vector<64x96xf32> to vector<64x32xf32>
    %10 = vector.shape_cast %9 : vector<64x32xf32> to vector<8x8x32xf32>
    %11 = vector.extract_strided_slice %8 {offsets = [0, 32], sizes = [64, 32], strides = [1, 1]} : vector<64x96xf32> to vector<64x32xf32>
    %12 = vector.shape_cast %11 : vector<64x32xf32> to vector<8x8x32xf32>
    %13 = vector.extract_strided_slice %8 {offsets = [0, 64], sizes = [64, 32], strides = [1, 1]} : vector<64x96xf32> to vector<64x32xf32>
    %14 = vector.shape_cast %13 : vector<64x32xf32> to vector<8x8x32xf32>
    %c0_6 = arith.constant 0 : index
    %c0_7 = arith.constant 0 : index
    %c0_8 = arith.constant 0 : index
    %15 = vector.load %arg2[%c0_6, %c0_7, %c0_8] : memref<1x1x8xf32, #tpu.memory_space<vmem>>, vector<1x1x8xf32>
    %16 = vector.extract_strided_slice %10 {offsets = [0, 0, 0], sizes = [8, 8, 8], strides = [1, 1, 1]} : vector<8x8x32xf32> to vector<8x8x8xf32>
    %17 = vector.extract_strided_slice %12 {offsets = [0, 0, 0], sizes = [8, 8, 8], strides = [1, 1, 1]} : vector<8x8x32xf32> to vector<8x8x8xf32>
    %18 = vector.extract_strided_slice %14 {offsets = [0, 0, 0], sizes = [8, 8, 8], strides = [1, 1, 1]} : vector<8x8x32xf32> to vector<8x8x8xf32>
    "tpu.trace_start"() <{level = 10 : i32, message = "nqd,nkd->nqk"}> : () -> ()
    %cst_9 = arith.constant dense<0.000000e+00> : vector<8x8x8xf32>
    %19 = tpu.matmul %16, %17, %cst_9 {dimension_numbers = #tpu.dot_dimension_numbers<[2], [2], [1], [1], [0, 0, 0, 1, 1, 1], [0], [0]>} : vector<8x8x8xf32>, vector<8x8x8xf32>, vector<8x8x8xf32> -> vector<8x8x8xf32>
    "tpu.trace_stop"() : () -> ()
    %cst_10 = arith.constant 0.353553385 : f32
    %20 = vector.broadcast %cst_10 : f32 to vector<8x8x8xf32>
    %21 = arith.mulf %19, %20 : vector<8x8x8xf32>
    %22 = vector.broadcast %15 : vector<1x1x8xf32> to vector<8x8x8xf32>
    %23 = arith.addf %21, %22 : vector<8x8x8xf32>
    %cst_11 = arith.constant dense<0xFF800000> : vector<8x8xf32>
    %24 = vector.multi_reduction <maximumf>, %23, %cst_11 [2] : vector<8x8x8xf32> to vector<8x8xf32>
    %25 = vector.shape_cast %24 : vector<8x8xf32> to vector<8x8x1xf32>
    %26 = vector.broadcast %25 : vector<8x8x1xf32> to vector<8x8x8xf32>
    %27 = arith.subf %23, %26 : vector<8x8x8xf32>
    %28 = math.exp %27 : vector<8x8x8xf32>
    %cst_12 = arith.constant dense<0.000000e+00> : vector<8x8xf32>
    %29 = vector.multi_reduction <add>, %28, %cst_12 [2] : vector<8x8x8xf32> to vector<8x8xf32>
    %30 = vector.shape_cast %29 : vector<8x8xf32> to vector<8x8x1xf32>
    %31 = tpu.reciprocal %30 {approx = true} : vector<8x8x1xf32> -> vector<8x8x1xf32>
    %32 = vector.broadcast %31 : vector<8x8x1xf32> to vector<8x8x8xf32>
    %33 = arith.mulf %28, %32 : vector<8x8x8xf32>
    "tpu.trace_start"() <{level = 10 : i32, message = "nqk,nkd->nqd"}> : () -> ()
    %cst_13 = arith.constant dense<0.000000e+00> : vector<8x8x8xf32>
    %34 = tpu.matmul %33, %18, %cst_13 {dimension_numbers = #tpu.dot_dimension_numbers<[2], [1], [1], [2], [0, 0, 0, 1, 1, 2], [0], [0]>} : vector<8x8x8xf32>, vector<8x8x8xf32>, vector<8x8x8xf32> -> vector<8x8x8xf32>
    "tpu.trace_stop"() : () -> ()
    %35 = vector.extract_strided_slice %10 {offsets = [0, 0, 8], sizes = [8, 8, 8], strides = [1, 1, 1]} : vector<8x8x32xf32> to vector<8x8x8xf32>
    %36 = vector.extract_strided_slice %12 {offsets = [0, 0, 8], sizes = [8, 8, 8], strides = [1, 1, 1]} : vector<8x8x32xf32> to vector<8x8x8xf32>
    %37 = vector.extract_strided_slice %14 {offsets = [0, 0, 8], sizes = [8, 8, 8], strides = [1, 1, 1]} : vector<8x8x32xf32> to vector<8x8x8xf32>
    "tpu.trace_start"() <{level = 10 : i32, message = "nqd,nkd->nqk"}> : () -> ()
    %cst_14 = arith.constant dense<0.000000e+00> : vector<8x8x8xf32>
    %38 = tpu.matmul %35, %36, %cst_14 {dimension_numbers = #tpu.dot_dimension_numbers<[2], [2], [1], [1], [0, 0, 0, 1, 1, 1], [0], [0]>} : vector<8x8x8xf32>, vector<8x8x8xf32>, vector<8x8x8xf32> -> vector<8x8x8xf32>
    "tpu.trace_stop"() : () -> ()
    %cst_15 = arith.constant 0.353553385 : f32
    %39 = vector.broadcast %cst_15 : f32 to vector<8x8x8xf32>
    %40 = arith.mulf %38, %39 : vector<8x8x8xf32>
    %41 = vector.broadcast %15 : vector<1x1x8xf32> to vector<8x8x8xf32>
    %42 = arith.addf %40, %41 : vector<8x8x8xf32>
    %cst_16 = arith.constant dense<0xFF800000> : vector<8x8xf32>
    %43 = vector.multi_reduction <maximumf>, %42, %cst_16 [2] : vector<8x8x8xf32> to vector<8x8xf32>
    %44 = vector.shape_cast %43 : vector<8x8xf32> to vector<8x8x1xf32>
    %45 = vector.broadcast %44 : vector<8x8x1xf32> to vector<8x8x8xf32>
    %46 = arith.subf %42, %45 : vector<8x8x8xf32>
    %47 = math.exp %46 : vector<8x8x8xf32>
    %cst_17 = arith.constant dense<0.000000e+00> : vector<8x8xf32>
    %48 = vector.multi_reduction <add>, %47, %cst_17 [2] : vector<8x8x8xf32> to vector<8x8xf32>
    %49 = vector.shape_cast %48 : vector<8x8xf32> to vector<8x8x1xf32>
    %50 = tpu.reciprocal %49 {approx = true} : vector<8x8x1xf32> -> vector<8x8x1xf32>
    %51 = vector.broadcast %50 : vector<8x8x1xf32> to vector<8x8x8xf32>
    %52 = arith.mulf %47, %51 : vector<8x8x8xf32>
    "tpu.trace_start"() <{level = 10 : i32, message = "nqk,nkd->nqd"}> : () -> ()
    %cst_18 = arith.constant dense<0.000000e+00> : vector<8x8x8xf32>
    %53 = tpu.matmul %52, %37, %cst_18 {dimension_numbers = #tpu.dot_dimension_numbers<[2], [1], [1], [2], [0, 0, 0, 1, 1, 2], [0], [0]>} : vector<8x8x8xf32>, vector<8x8x8xf32>, vector<8x8x8xf32> -> vector<8x8x8xf32>
    "tpu.trace_stop"() : () -> ()
    %54 = vector.extract_strided_slice %10 {offsets = [0, 0, 16], sizes = [8, 8, 8], strides = [1, 1, 1]} : vector<8x8x32xf32> to vector<8x8x8xf32>
    %55 = vector.extract_strided_slice %12 {offsets = [0, 0, 16], sizes = [8, 8, 8], strides = [1, 1, 1]} : vector<8x8x32xf32> to vector<8x8x8xf32>
    %56 = vector.extract_strided_slice %14 {offsets = [0, 0, 16], sizes = [8, 8, 8], strides = [1, 1, 1]} : vector<8x8x32xf32> to vector<8x8x8xf32>
    "tpu.trace_start"() <{level = 10 : i32, message = "nqd,nkd->nqk"}> : () -> ()
    %cst_19 = arith.constant dense<0.000000e+00> : vector<8x8x8xf32>
    %57 = tpu.matmul %54, %55, %cst_19 {dimension_numbers = #tpu.dot_dimension_numbers<[2], [2], [1], [1], [0, 0, 0, 1, 1, 1], [0], [0]>} : vector<8x8x8xf32>, vector<8x8x8xf32>, vector<8x8x8xf32> -> vector<8x8x8xf32>
    "tpu.trace_stop"() : () -> ()
    %cst_20 = arith.constant 0.353553385 : f32
    %58 = vector.broadcast %cst_20 : f32 to vector<8x8x8xf32>
    %59 = arith.mulf %57, %58 : vector<8x8x8xf32>
    %60 = vector.broadcast %15 : vector<1x1x8xf32> to vector<8x8x8xf32>
    %61 = arith.addf %59, %60 : vector<8x8x8xf32>
    %cst_21 = arith.constant dense<0xFF800000> : vector<8x8xf32>
    %62 = vector.multi_reduction <maximumf>, %61, %cst_21 [2] : vector<8x8x8xf32> to vector<8x8xf32>
    %63 = vector.shape_cast %62 : vector<8x8xf32> to vector<8x8x1xf32>
    %64 = vector.broadcast %63 : vector<8x8x1xf32> to vector<8x8x8xf32>
    %65 = arith.subf %61, %64 : vector<8x8x8xf32>
    %66 = math.exp %65 : vector<8x8x8xf32>
    %cst_22 = arith.constant dense<0.000000e+00> : vector<8x8xf32>
    %67 = vector.multi_reduction <add>, %66, %cst_22 [2] : vector<8x8x8xf32> to vector<8x8xf32>
    %68 = vector.shape_cast %67 : vector<8x8xf32> to vector<8x8x1xf32>
    %69 = tpu.reciprocal %68 {approx = true} : vector<8x8x1xf32> -> vector<8x8x1xf32>
    %70 = vector.broadcast %69 : vector<8x8x1xf32> to vector<8x8x8xf32>
    %71 = arith.mulf %66, %70 : vector<8x8x8xf32>
    "tpu.trace_start"() <{level = 10 : i32, message = "nqk,nkd->nqd"}> : () -> ()
    %cst_23 = arith.constant dense<0.000000e+00> : vector<8x8x8xf32>
    %72 = tpu.matmul %71, %56, %cst_23 {dimension_numbers = #tpu.dot_dimension_numbers<[2], [1], [1], [2], [0, 0, 0, 1, 1, 2], [0], [0]>} : vector<8x8x8xf32>, vector<8x8x8xf32>, vector<8x8x8xf32> -> vector<8x8x8xf32>
    "tpu.trace_stop"() : () -> ()
    %73 = vector.extract_strided_slice %10 {offsets = [0, 0, 24], sizes = [8, 8, 8], strides = [1, 1, 1]} : vector<8x8x32xf32> to vector<8x8x8xf32>
    %74 = vector.extract_strided_slice %12 {offsets = [0, 0, 24], sizes = [8, 8, 8], strides = [1, 1, 1]} : vector<8x8x32xf32> to vector<8x8x8xf32>
    %75 = vector.extract_strided_slice %14 {offsets = [0, 0, 24], sizes = [8, 8, 8], strides = [1, 1, 1]} : vector<8x8x32xf32> to vector<8x8x8xf32>
    "tpu.trace_start"() <{level = 10 : i32, message = "nqd,nkd->nqk"}> : () -> ()
    %cst_24 = arith.constant dense<0.000000e+00> : vector<8x8x8xf32>
    %76 = tpu.matmul %73, %74, %cst_24 {dimension_numbers = #tpu.dot_dimension_numbers<[2], [2], [1], [1], [0, 0, 0, 1, 1, 1], [0], [0]>} : vector<8x8x8xf32>, vector<8x8x8xf32>, vector<8x8x8xf32> -> vector<8x8x8xf32>
    "tpu.trace_stop"() : () -> ()
    %cst_25 = arith.constant 0.353553385 : f32
    %77 = vector.broadcast %cst_25 : f32 to vector<8x8x8xf32>
    %78 = arith.mulf %76, %77 : vector<8x8x8xf32>
    %79 = vector.broadcast %15 : vector<1x1x8xf32> to vector<8x8x8xf32>
    %80 = arith.addf %78, %79 : vector<8x8x8xf32>
    %cst_26 = arith.constant dense<0xFF800000> : vector<8x8xf32>
    %81 = vector.multi_reduction <maximumf>, %80, %cst_26 [2] : vector<8x8x8xf32> to vector<8x8xf32>
    %82 = vector.shape_cast %81 : vector<8x8xf32> to vector<8x8x1xf32>
    %83 = vector.broadcast %82 : vector<8x8x1xf32> to vector<8x8x8xf32>
    %84 = arith.subf %80, %83 : vector<8x8x8xf32>
    %85 = math.exp %84 : vector<8x8x8xf32>
    %cst_27 = arith.constant dense<0.000000e+00> : vector<8x8xf32>
    %86 = vector.multi_reduction <add>, %85, %cst_27 [2] : vector<8x8x8xf32> to vector<8x8xf32>
    %87 = vector.shape_cast %86 : vector<8x8xf32> to vector<8x8x1xf32>
    %88 = tpu.reciprocal %87 {approx = true} : vector<8x8x1xf32> -> vector<8x8x1xf32>
    %89 = vector.broadcast %88 : vector<8x8x1xf32> to vector<8x8x8xf32>
    %90 = arith.mulf %85, %89 : vector<8x8x8xf32>
    "tpu.trace_start"() <{level = 10 : i32, message = "nqk,nkd->nqd"}> : () -> ()
    %cst_28 = arith.constant dense<0.000000e+00> : vector<8x8x8xf32>
    %91 = tpu.matmul %90, %75, %cst_28 {dimension_numbers = #tpu.dot_dimension_numbers<[2], [1], [1], [2], [0, 0, 0, 1, 1, 2], [0], [0]>} : vector<8x8x8xf32>, vector<8x8x8xf32>, vector<8x8x8xf32> -> vector<8x8x8xf32>
    "tpu.trace_stop"() : () -> ()
    %92 = tpu.concatenate %34, %53, %72, %91 in 2 : vector<8x8x8xf32>, vector<8x8x8xf32>, vector<8x8x8xf32>, vector<8x8x8xf32> -> vector<8x8x32xf32>
    %93 = vector.shape_cast %92 : vector<8x8x32xf32> to vector<64x32xf32>
    %94 = arith.truncf %93 : vector<64x32xf32> to vector<64x32xbf16>
    %c0_29 = arith.constant 0 : index
    %c0_30 = arith.constant 0 : index
    %95 = vector.load %arg6[%c0_29, %c0_30] : memref<32x32xbf16, #tpu.memory_space<vmem>>, vector<32x32xbf16>
    %cst_31 = arith.constant dense<0.000000e+00> : vector<64x32xf32>
    %96 = tpu.matmul %94, %95, %cst_31 {dimension_numbers = #tpu.dot_dimension_numbers<[1], [0], [0], [1], [0, 0, 1, 1], [], []>} : vector<64x32xbf16>, vector<32x32xbf16>, vector<64x32xf32> -> vector<64x32xf32>
    %c0_32 = arith.constant 0 : index
    %c0_33 = arith.constant 0 : index
    %97 = vector.load %arg7[%c0_32, %c0_33] : memref<1x32xf32, #tpu.memory_space<vmem>>, vector<1x32xf32>
    %98 = vector.broadcast %97 : vector<1x32xf32> to vector<64x32xf32>
    %99 = arith.addf %96, %98 : vector<64x32xf32>
    %100 = arith.truncf %99 : vector<64x32xf32> to vector<64x32xbf16>
    %c0_34 = arith.constant 0 : index
    %c0_35 = arith.constant 0 : index
    %101 = vector.load %arg8[%c0_34, %c0_35] : memref<32x32xbf16, #tpu.memory_space<vmem>>, vector<32x32xbf16>
    %cst_36 = arith.constant dense<0.000000e+00> : vector<64x32xf32>
    %102 = tpu.matmul %100, %101, %cst_36 {dimension_numbers = #tpu.dot_dimension_numbers<[1], [0], [0], [1], [0, 0, 1, 1], [], []>} : vector<64x32xbf16>, vector<32x32xbf16>, vector<64x32xf32> -> vector<64x32xf32>
    %c0_37 = arith.constant 0 : index
    %c0_38 = arith.constant 0 : index
    %103 = vector.load %arg9[%c0_37, %c0_38] : memref<1x32xf32, #tpu.memory_space<vmem>>, vector<1x32xf32>
    %104 = vector.broadcast %103 : vector<1x32xf32> to vector<64x32xf32>
    %105 = arith.addf %102, %104 : vector<64x32xf32>
    %c0_39 = arith.constant 0 : index
    %c0_40 = arith.constant 0 : index
    %106 = vector.load %arg10[%c0_39, %c0_40] : memref<32x16xf32, #tpu.memory_space<vmem>>, vector<32x16xf32>
    %cst_41 = arith.constant dense<0.000000e+00> : vector<64x16xf32>
    %107 = tpu.matmul %105, %106, %cst_41 {dimension_numbers = #tpu.dot_dimension_numbers<[1], [0], [0], [1], [0, 0, 1, 1], [], []>} : vector<64x32xf32>, vector<32x16xf32>, vector<64x16xf32> -> vector<64x16xf32>
    %c0_42 = arith.constant 0 : index
    %c0_43 = arith.constant 0 : index
    %108 = vector.load %arg11[%c0_42, %c0_43] : memref<1x16xf32, #tpu.memory_space<vmem>>, vector<1x16xf32>
    %109 = vector.broadcast %108 : vector<1x16xf32> to vector<64x16xf32>
    %110 = arith.addf %107, %109 : vector<64x16xf32>
    %111 = math.tanh %110 : vector<64x16xf32>
    %112 = vector.shape_cast %111 : vector<64x16xf32> to vector<8x8x16xf32>
    %c0_44 = arith.constant 0 : index
    %c0_45 = arith.constant 0 : index
    %113 = vector.load %arg12[%c0_44, %c0_45] : memref<1x16xf32, #tpu.memory_space<vmem>>, vector<1x16xf32>
    %114 = vector.shape_cast %113 : vector<1x16xf32> to vector<1x1x16xf32>
    %115 = vector.broadcast %114 : vector<1x1x16xf32> to vector<8x8x16xf32>
    %116 = arith.mulf %112, %115 : vector<8x8x16xf32>
    %cst_46 = arith.constant dense<0.000000e+00> : vector<8x8xf32>
    %117 = vector.multi_reduction <add>, %116, %cst_46 [2] : vector<8x8x16xf32> to vector<8x8xf32>
    %118 = vector.shape_cast %117 : vector<8x8xf32> to vector<8x8x1xf32>
    %c0_47 = arith.constant 0 : index
    %c0_48 = arith.constant 0 : index
    %c0_49 = arith.constant 0 : index
    %119 = vector.load %arg3[%c0_47, %c0_48, %c0_49] : memref<1x8x1xf32, #tpu.memory_space<vmem>>, vector<1x8x1xf32>
    %120 = vector.broadcast %119 : vector<1x8x1xf32> to vector<8x8x1xf32>
    %121 = arith.addf %118, %120 : vector<8x8x1xf32>
    %cst_50 = arith.constant dense<0xFF800000> : vector<8x1xf32>
    %122 = vector.multi_reduction <maximumf>, %121, %cst_50 [1] : vector<8x8x1xf32> to vector<8x1xf32>
    %123 = vector.shape_cast %122 : vector<8x1xf32> to vector<8x1x1xf32>
    %124 = vector.broadcast %123 : vector<8x1x1xf32> to vector<8x8x1xf32>
    %125 = arith.subf %121, %124 : vector<8x8x1xf32>
    %126 = math.exp %125 : vector<8x8x1xf32>
    %cst_51 = arith.constant dense<0.000000e+00> : vector<8x1xf32>
    %127 = vector.multi_reduction <add>, %126, %cst_51 [1] : vector<8x8x1xf32> to vector<8x1xf32>
    %128 = vector.shape_cast %127 : vector<8x1xf32> to vector<8x1x1xf32>
    %129 = tpu.reciprocal %128 {approx = true} : vector<8x1x1xf32> -> vector<8x1x1xf32>
    %130 = vector.broadcast %129 : vector<8x1x1xf32> to vector<8x8x1xf32>
    %131 = arith.mulf %126, %130 : vector<8x8x1xf32>
    %132 = vector.shape_cast %105 : vector<64x32xf32> to vector<8x8x32xf32>
    %133 = vector.broadcast %131 : vector<8x8x1xf32> to vector<8x8x32xf32>
    %134 = arith.mulf %132, %133 : vector<8x8x32xf32>
    %cst_52 = arith.constant dense<0.000000e+00> : vector<8x32xf32>
    %135 = vector.multi_reduction <add>, %134, %cst_52 [1] : vector<8x8x32xf32> to vector<8x32xf32>
    %c0_53 = arith.constant 0 : index
    %c0_54 = arith.constant 0 : index
    %136 = vector.load %arg13[%c0_53, %c0_54] : memref<8x32xf32, #tpu.memory_space<vmem>>, vector<8x32xf32>
    tpu.vector_store %arg13[%c0_53, %c0_54], %135 {strides = array<i32>} : memref<8x32xf32, #tpu.memory_space<vmem>>, vector<8x32xf32>,
    return
  }
  func.func @transform_0(%arg0: i32) -> (i32, i32, i32) {
    %c0_i32 = arith.constant 0 : i32
    %c0_i32_0 = arith.constant 0 : i32
    %c0_i32_1 = arith.constant 0 : i32
    return %arg0, %c0_i32, %c0_i32_0 : i32, i32, i32
  }
  func.func @transform_1(%arg0: i32) -> (i32, i32, i32) {
    %c0_i32 = arith.constant 0 : i32
    %c0_i32_0 = arith.constant 0 : i32
    %c0_i32_1 = arith.constant 0 : i32
    %c0_i32_2 = arith.constant 0 : i32
    return %c0_i32, %c0_i32_0, %c0_i32_1 : i32, i32, i32
  }
  func.func @transform_2(%arg0: i32) -> (i32, i32, i32) {
    %c0_i32 = arith.constant 0 : i32
    %c0_i32_0 = arith.constant 0 : i32
    %c0_i32_1 = arith.constant 0 : i32
    %c0_i32_2 = arith.constant 0 : i32
    return %c0_i32, %c0_i32_0, %c0_i32_1 : i32, i32, i32
  }
  func.func @transform_3(%arg0: i32) -> (i32, i32) {
    %c0_i32 = arith.constant 0 : i32
    %c0_i32_0 = arith.constant 0 : i32
    %c0_i32_1 = arith.constant 0 : i32
    return %c0_i32, %c0_i32_0 : i32, i32
  }
  func.func @transform_4(%arg0: i32) -> (i32, i32) {
    %c0_i32 = arith.constant 0 : i32
    %c0_i32_0 = arith.constant 0 : i32
    %c0_i32_1 = arith.constant 0 : i32
    return %c0_i32, %c0_i32_0 : i32, i32
  }
  func.func @transform_5(%arg0: i32) -> (i32, i32) {
    %c0_i32 = arith.constant 0 : i32
    %c0_i32_0 = arith.constant 0 : i32
    %c0_i32_1 = arith.constant 0 : i32
    return %c0_i32, %c0_i32_0 : i32, i32
  }
  func.func @transform_6(%arg0: i32) -> (i32, i32) {
    %c0_i32 = arith.constant 0 : i32
    %c0_i32_0 = arith.constant 0 : i32
    %c0_i32_1 = arith.constant 0 : i32
    return %c0_i32, %c0_i32_0 : i32, i32
  }
  func.func @transform_7(%arg0: i32) -> (i32, i32) {
    %c0_i32 = arith.constant 0 : i32
    %c0_i32_0 = arith.constant 0 : i32
    %c0_i32_1 = arith.constant 0 : i32
    return %c0_i32, %c0_i32_0 : i32, i32
  }
  func.func @transform_8(%arg0: i32) -> (i32, i32) {
    %c0_i32 = arith.constant 0 : i32
    %c0_i32_0 = arith.constant 0 : i32
    %c0_i32_1 = arith.constant 0 : i32
    return %c0_i32, %c0_i32_0 : i32, i32
  }
  func.func @transform_9(%arg0: i32) -> (i32, i32) {
    %c0_i32 = arith.constant 0 : i32
    %c0_i32_0 = arith.constant 0 : i32
    %c0_i32_1 = arith.constant 0 : i32
    return %c0_i32, %c0_i32_0 : i32, i32
  }
  func.func @transform_10(%arg0: i32) -> (i32, i32) {
    %c0_i32 = arith.constant 0 : i32
    %c0_i32_0 = arith.constant 0 : i32
    %c0_i32_1 = arith.constant 0 : i32
    return %c0_i32, %c0_i32_0 : i32, i32
  }
  func.func @transform_11(%arg0: i32) -> (i32, i32) {
    %c0_i32 = arith.constant 0 : i32
    %c0_i32_0 = arith.constant 0 : i32
    %c0_i32_1 = arith.constant 0 : i32
    return %c0_i32, %c0_i32_0 : i32, i32
  }
  func.func @transform_12(%arg0: i32) -> (i32, i32) {
    %c0_i32 = arith.constant 0 : i32
    %c0_i32_0 = arith.constant 0 : i32
    return %arg0, %c0_i32 : i32, i32
  }
}

</mosaic_0001>

<bundles_post_ra>
// kernel: tpu_custom_call.1
= control target key start
LH: loop header
LB: loop body
LE: loop exit
PB: predicated region body
PF: predicated region fallthrough
CT: control target
= control target key end

     0   :  { %17 = vsyncpa [#allocation3], 0  ;;  %s9178_s0 = inlined_call_operand.hbm [shape: bf16[16,8,32], index: 0, kind: input, shape index: {}]   ;;  %s9179_s1 = inlined_call_operand.vmem [shape: f32[1,1,8], index: 1, kind: input, shape index: {}]   ;;  %s9180_s2 = inlined_call_operand.vmem [shape: f32[1,8,1], index: 2, kind: input, shape index: {}]   ;;  %s9181_s3 = inlined_call_operand.vmem [shape: bf16[32,96], index: 3, kind: input, shape index: {}]   ;;  %s9182_s4 = inlined_call_operand.vmem [shape: f32[1,96], index: 4, kind: input, shape index: {}]   ;;  %s9183_s5 = inlined_call_operand.vmem [shape: bf16[32,32], index: 5, kind: input, shape index: {}]   ;;  %s9184_s6 = inlined_call_operand.vmem [shape: f32[1,32], index: 6, kind: input, shape index: {}]   ;;  %s9185_s7 = inlined_call_operand.vmem [shape: bf16[32,32], index: 7, kind: input, shape index: {}]   ;;  %s9186_s8 = inlined_call_operand.vmem [shape: f32[1,32], index: 8, kind: input, shape index: {}]   ;;  %s9187_s9 = inlined_call_operand.vmem [shape: f32[32,16], index: 9, kind: input, shape index: {}]   ;;  %s9188_s10 = inlined_call_operand.vmem [shape: f32[1,16], index: 10, kind: input, shape index: {}]   ;;  %s9189_s11 = inlined_call_operand.vmem [shape: f32[1,16], index: 11, kind: input, shape index: {}]   ;;  %s9190_s12 = inlined_call_operand.hbm [shape: f32[16,32], index: 12, kind: output, shape index: {}]  }
   0x1   :  { %19 = vsyncpa [#allocation3 + $0x1], 0 }
   0x2   :  { %20 = vsyncpa [#allocation4], 0 }
   0x3   :  { %22 = vsyncpa [#allocation4 + $0x1], 0  ;;  %s7976_s21 = smov 0   ;;  %s7978_s22 = smov 0  }
   0x4   :  { %s7980_s23 = smov 0   ;;  %s7982_s24 = smov 0  }
   0x5 LB: > { %9195 = sst [smem:[#allocation8_spill]] %s7884_s23  ;;  %s7997_s25 = sadd.s32 4294967295, %s7888_s24   ;;  %s7888_s24 = sphi %s7982_s24, %s9207_s24   ;;  %s7884_s23 = sphi %s7980_s23, %s9209_s23   ;;  %s7880_s22 = sphi %s7978_s22, %s9211_s22   ;;  %s7876_s21 = sphi %s7976_s21, %s9210_s21  }
   0x6   : > { %s6790_s26 = sadd.s32 4294967294, %s7888_s24   ;;  %s8001_s27 = sadd.s32 1, %s7888_s24  }
   0x7   : > { %9196 = sst [smem:[#allocation9_spill]] %s8001_s27  ;;  %s35_s28 = sadd.s32 1, %s7884_s23 }
   0x8   : > { %s32_s29 = ssub.s32 %s7888_s24, %s8001_s27  ;;  %p42_p0 = scmp.ne.s32.totalorder %s7884_s23, %s7880_s22 }
   0x9   : > { %p33_p1 = scmp.eq.s32.totalorder %s32_s29, 0  ;;  %p43_p2 = scmp.eq.s32.totalorder %s7888_s24, 0 }
   0xa   : > { %p48_p3 = scmp.ne.s32.totalorder %s7880_s22, %s7876_s21  ;;  %p49_p4 = scmp.eq.s32.totalorder %s7997_s25, 0 }
   0xb   : > { %s8013_s30 = scalar_select %p33_p1, %s7884_s23, %s35_s28  }
   0xc   : > { %p8015_p5 = por %p43_p2, %p42_p0  ;;  %p8019_p6 = por %p49_p4, %p48_p3 }
   0xd   : > { %9197 = sst [smem:[#allocation10_spill]] %s8013_s30  ;;  %p303_p7 = scmp.eq.s32.totalorder %s7997_s25, 1 }
   0xe   : > { %p309_p8 = scmp.eq.s32.totalorder %s6790_s26, 1  ;;  %p7490_p10 = scmp.lt.s32.totalorder %s7888_s24, 2 }
   0xf   : > { %p8026_p11 = por %p303_p7, %p42_p0  ;;  %s362_s17 = sand.u32 1, %s7884_s23  }
  0x10   : > { %p8030_p12 = por %p309_p8, %p48_p3  ;;  %s6935_s18 = sshll.u32 %s7888_s24, 9 }
  0x11   : > { %s9200_s15 = scalar_select %p8026_p11, 1, 0 }
  0x12   : > { %s9201_s16 = scalar_select %p8030_p12, 1, 0 }
  0x13   : > { %s6793_s19 = sshll.u32 %s362_s17, 5  ;;  %s8039_s29 = scalar_lea.hbm %s9178_s0, %s6935_s18 }
  0x14   : > { %s366_s26 = scalar_lea.vmem [#allocation2], %s6793_s19  ;;  %p8043_p13 = pnand %p7490_p10, %p8015_p5 }
  0x15   : > { %s373_s30 = sshll.u32 %s366_s26, 4  ;;  %s8049_s23 = scalar_lea.sflag [#allocation3], %s362_s17  ;;  %s8047_s30 = int_to_ptr.vmem [resolvable:$true] %s373_s30 }
  0x16   : > { %s7792_s20 = scalar_lea.hbm %s8039_s29, 512  ;;  %p7794_p1 = pneg %p8043_p13 }
  0x17   : > { %p7793_p0 = scmp.ne.s32.totalorder %s8039_s29, %s7792_s20  ;;  %s7797_s19 = scalar_lea.hbm %s9178_s0, 1024 }
  0x18   : > { %p7798_p4 = scmp.lt.u32.totalorder %s8039_s29, %s9178_s0  ;;  %p7799_p5 = scmp.lt.u32.totalorder %s7797_s19, %s7792_s20 }
  0x19   : > { %p7795_p2 = pnand %p7794_p1, %p7793_p0  ;;  %p7801_p8 = scmp.lt.u32.totalorder %s7792_s20, %s8039_s29 }
  0x1a   : > { %p7800_p7 = por %p7799_p5, %p7798_p4 }
  0x1b   : > { %p7796_p3 = pneg %p7795_p2 }
  0x1c   : > { %p7802_p10 = por %p7801_p8, %p7800_p7 }
  0x1e   : > { %p7803_p9 = pnand %p7802_p10, %p7796_p3 }
  0x20   : > { %7806 = shalt.err (!%p7803_p9)
}
  0x21   : > { %s7807_s17 = scalar_lea.vmem %s8047_s30, 512  ;;  %s7890_s18 = smov [#allocation2]  }
  0x22   : > { %p7808_p0 = scmp.ne.s32.totalorder %s8047_s30, %s7807_s17  ;;  %s7812_s13 = sshll.u32 %s7890_s18, 4  ;;  %s7813_s13 = int_to_ptr.vmem [resolvable:$false] %s7812_s13 }
  0x23   : > { %s7814_s28 = scalar_lea.vmem %s7813_s13, 1024  ;;  %p7815_p11 = scmp.lt.s32.totalorder %s8047_s30, %s7813_s13 }
  0x24   : > { %p7810_p2 = pnand %p7808_p0, %p7794_p1  ;;  %p7816_p4 = scmp.lt.s32.totalorder %s7814_s28, %s7807_s17 }
  0x26   : > { %p7811_p12 = pneg %p7810_p2  ;;  %p7817_p5 = por %p7816_p4, %p7815_p11 }
  0x28   : > { %p7818_p7 = pnand %p7817_p5, %p7811_p12 }
  0x2a   : > { %7821 = shalt.err (!%p7818_p7)
}
  0x2b   : > { %s7891_s20 = smov 64   ;;  %s7892_s19 = smov 4  }
  0x2c   : > { %7485 = dma.hbm_to_vmem [thread:$0]  (!%p8043_p13), %s8039_s29, 512, %s8047_s30, %s8049_s23, %s7891_s20, %s7891_s20, %s7892_s19  }
  0x2d   : > { %p6796_p9 = scmp.ge.s32.totalorder %s7888_s24, 1  ;;  %p381_p1 = scmp.lt.s32.totalorder %s7888_s24, 3 }
  0x2f   : > { %p382_p3 = pnand %p6796_p9, %p381_p1 }
  0x30   : > { %s8080_s26 = sand.u32 (!%p382_p3), 1, %s7880_s22  }
  0x31   : > { %385 = sbr.rel (%p382_p3) target bundleno = 4091 (0xffb), region = 68  ;;  %s6797_s17 = sshll.u32 (!%p382_p3), %s8080_s26, 5 }
  0x32   : > { %s388_s18 = scalar_lea.sflag (!%p382_p3), [#allocation3], %s8080_s26  ;;  %s391_s13 = scalar_lea.vmem (!%p382_p3), [#allocation2], %s6797_s17 }
  0x38   : > { %7867 = dma.done.wait (%p8019_p6), %s388_s18, 512  }
  0x39   : > { %7869 = vsyncadd (%p8019_p6), %s388_s18, 4294966784  ;;  %v7605_v0 = vld [vmem:[%s9181_s3] sm:$0xff]   ;;  %v7606_v1 = vld [vmem:[%s9181_s3 + $0x8] sm:$0xff]   ;;  %vm477_vm0 = vcmask 261120   ;;  %v7893_v6 = vmov 0.0   ;;  %vm7894_vm1 = vmmov 0  }
  0x3a   : > { %7094 = vmatprep.subr.bf16.mxu0 %v7605_v0  ;;  %v7607_v2 = vld [vmem:[%s391_s13] sm:$0xff]   ;;  %v7608_v3 = vld [vmem:[%s391_s13 + $0x8] sm:$0xff]   ;;  %v7609_v4 = vld [vmem:[%s391_s13 + $0x10] sm:$0xff]   ;;  %7111 = vmatprep.subr.mxu1 %v7893_v6  ;;  %s7895_s20 = smov 96   ;;  %vm559_vm2 = vcmask 64512   ;;  %s7896_s18 = smov 64  }
  0x3b   : > { %7095 = vmatpush3.bf16.msra.mxu0 %v7605_v0  ;;  %7098 = vmatprep.mubr.msk.bf16.mxu0 %vm477_vm0, %v7607_v2  ;;  %v7610_v5 = vld [vmem:[%s391_s13 + $0x18] sm:$0xff]   ;;  %v6803_v7 = vld [vmem:[%s9182_s4] ss:$0 sm:$0xff]  ;;  %s7897_s13 = smov 88   ;;  %s7898_s27 = smov 120   ;;  %vm6003_vm3 = vcmask 130048  }
  0x3c   : > { %7096 = vmatprep.subr.bf16.mxu0 %v7606_v1  ;;  %7113 = vmatprep.mubr.msk.f32.mxu1 %vm7894_vm1, %v7893_v6  ;;  %v8182_v33 = vld [vmem:[%s9179_s1] ss:$0 sm:$0xff]  ;;  %s7899_s23 = smov 56   ;;  %s7900_s30 = smov 80   ;;  %vm6012_vm4 = vcmask 195584   ;;  %vm6425_vm5 = vcmask 7168  }
  0x3d   : > { %s7901_s29 = smov 112   ;;  %s7902_s14 = smov 48   ;;  %vm6690_vm6 = vcmask 1041409   ;;  %vm6692_vm7 = vcmask 1042434   ;;  %vm6694_vm8 = vcmask 1043459   ;;  %vm6696_vm9 = vcmask 1044484  }
  0x3e   : > { %s7903_s28 = smov 72   ;;  %vm6698_vm10 = vcmask 1045509   ;;  %vm6700_vm11 = vcmask 1046534   ;;  %s6932_s19 = sshll.u32 %s7997_s25, 7  ;;  %vm6702_vm12 = vcmask 1047559  }
  0x3f   : > { %7097 = vmatpush3.bf16.msra.mxu0 %v7606_v1  ;;  %s6707_s25 = scalar_lea.sflag [#allocation4], %s8080_s26  ;;  %p9204_p11 = scmp.ne.s32.totalorder %s9200_s15, 0 }
  0x40   : > { %7106 = vmatprep.subr.mxu0 %v7893_v6 }
  0x42   : > { %7099 = vmatmul.mubr.msk.bf16.vlgmr.msra.gmra.mrb[0].mxu0 %vm477_vm0, %v7608_v3 }
  0x43   : > { %7102 = vmatprep.mubr.msk.bf16.mxu0 %vm477_vm0, %v7609_v4 }
  0x4a   : > { %7103 = vmatmul.mubr.msk.bf16.gmra.mrb[4].mxu0 %vm477_vm0, %v7610_v5 }
  0x4b   : > { %7108 = vmatprep.mubr.msk.f32.mxu0 %vm7894_vm1, %v7893_v6 }
 0x115   : > { %v7100_v8 = vpop.f32.mrb[0].mxu0 }
 0x116   : > { %v8107_v9 = vadd.f32 %v7100_v8, %v6803_v7  ;;  %v524_v10 = vpop.f32.mrb[1].mxu0 }
 0x117   : > { %v7101_v11 = vpop.f32.mrb[2].mxu0  ;;  %v8116_v15 = vadd.f32 %v6803_v7, %v524_v10 }
 0x118   : > { %712 = vrot.lane.b32.xlu1 %v8107_v9, %s7895_s20  ;;  %v527_v12 = vpop.f32.mrb[3].mxu0  ;;  %v8112_v14 = vadd.f32 %v7101_v11, %v6803_v7 }
 0x119   : > { %v8110_v13 = vadd.f32 %v6803_v7, %v527_v12 }
 0x11b   : > { %635 = vrot.lane.b32.xlu0 %v8110_v13, %s7895_s20 }
 0x11c   : > { %789 = vrot.lane.b32.xlu1 %v8112_v14, %s7895_s20 }
 0x11d   : > { %v7104_v16 = vpop.f32.mrb[4].mxu0 }
 0x11e   : > { %v540_v17 = vpop.f32.mrb[5].mxu0  ;;  %v8123_v22 = vadd.f32 %v7104_v16, %v6803_v7 }
 0x11f   : > { %v8118_v18 = vadd.f32 %v6803_v7, %v540_v17  ;;  %v7105_v19 = vpop.f32.mrb[6].mxu0  ;;  %557 = vrot.lane.b32.xlu0 %v8116_v15, %s7895_s20 }
 0x120   : > { %v543_v20 = vpop.f32.mrb[7].mxu0  ;;  %v8125_v23 = vadd.f32 %v7105_v19, %v6803_v7 }
 0x121   : > { %v8121_v21 = vadd.f32 %v6803_v7, %v543_v20 }
 0x123   : > { %943 = vrot.lane.b32.xlu1 %v8121_v21, %s7895_s20  ;;  %866 = vrot.lane.b32.xlu0 %v8118_v18, %s7895_s20 }
 0x127   : > { %1097 = vrot.lane.b32.xlu1 %v8125_v23, %s7895_s20  ;;  %1020 = vrot.lane.b32.xlu0 %v8123_v22, %s7895_s20  ;;  %s7904_s20 = smov 104  }
 0x18a   : > { %v713_v24 = vpop.permute.xlu1 %712 }
 0x18d   : > { %v636_v25 = vpop.permute.xlu0 %635 }
 0x18e   : > { %7112 = vmatpush3.xpose.msk.msra.mxu1 %vm559_vm2, %v636_v25  ;;  %v790_v26 = vpop.permute.xlu1 %789 }
 0x18f   : > { %7116 = vmatprep.subr.mxu1 %v7893_v6 }
 0x191   : > { %7114 = vmatmul.mubr.msk.f32.vlgmr.msra.gmra.mrb[0].mxu1 %vm559_vm2, %v8110_v13  ;;  %v558_v27 = vpop.permute.xlu0 %557 }
 0x192   : > { %7107 = vmatpush3.xpose.msk.msra.mxu0 %vm559_vm2, %v558_v27  ;;  %7117 = vmatpush3.xpose.msk.msra.mxu1 %vm559_vm2, %v713_v24 }
 0x193   : > { %7118 = vmatprep.mubr.msk.f32.mxu1 %vm7894_vm1, %v7893_v6  ;;  %7121 = vmatprep.subr.mxu1 %v7893_v6 }
 0x194   : > { %7131 = vmatprep.subr.mxu0 %v7893_v6 }
 0x195   : > { %v944_v28 = vpop.permute.xlu1 %943  ;;  %7109 = vmatmul.mubr.msk.f32.vlgmr.msra.gmra.mrb[8].mxu0 %vm559_vm2, %v8116_v15  ;;  %7119 = vmatmul.mubr.msk.f32.vlgmr.msra.gmra.mrb[2].mxu1 %vm559_vm2, %v8107_v9  ;;  %v867_v29 = vpop.permute.xlu0 %866 }
 0x196   : > { %7122 = vmatpush3.xpose.msk.msra.mxu1 %vm559_vm2, %v790_v26  ;;  %7132 = vmatpush3.xpose.msk.msra.mxu0 %vm559_vm2, %v944_v28 }
 0x197   : > { %7123 = vmatprep.mubr.msk.f32.mxu1 %vm7894_vm1, %v7893_v6  ;;  %7133 = vmatprep.mubr.msk.f32.mxu0 %vm7894_vm1, %v7893_v6 }
 0x198   : > { %7126 = vmatprep.subr.mxu1 %v7893_v6  ;;  %7141 = vmatprep.subr.mxu0 %v7893_v6 }
 0x199   : > { %v1098_v30 = vpop.permute.xlu1 %1097  ;;  %7124 = vmatmul.mubr.msk.f32.vlgmr.msra.gmra.mrb[4].mxu1 %vm559_vm2, %v8112_v14  ;;  %7134 = vmatmul.mubr.msk.f32.vlgmr.msra.gmra.mrb[10].mxu0 %vm559_vm2, %v8121_v21  ;;  %v1021_v31 = vpop.permute.xlu0 %1020 }
 0x19a   : > { %7127 = vmatpush3.xpose.msk.msra.mxu1 %vm559_vm2, %v867_v29  ;;  %7142 = vmatpush3.xpose.msk.msra.mxu0 %vm559_vm2, %v1098_v30 }
 0x19b   : > { %7128 = vmatprep.mubr.msk.f32.mxu1 %vm7894_vm1, %v7893_v6  ;;  %7143 = vmatprep.mubr.msk.f32.mxu0 %vm7894_vm1, %v7893_v6 }
 0x19c   : > { %7136 = vmatprep.subr.mxu1 %v7893_v6  ;;  %7151 = vmatprep.subr.mxu0 %v7893_v6 }
 0x19d   : > { %7129 = vmatmul.mubr.msk.f32.vlgmr.msra.gmra.mrb[6].mxu1 %vm559_vm2, %v8118_v18  ;;  %7144 = vmatmul.mubr.msk.f32.vlgmr.msra.gmra.mrb[12].mxu0 %vm559_vm2, %v8125_v23 }
 0x19e   : > { %7137 = vmatpush3.xpose.msk.msra.mxu1 %vm559_vm2, %v1021_v31  ;;  %7138 = vmatprep.mubr.msk.f32.mxu1 %vm7894_vm1, %v7893_v6 }
 0x19f   : > { %7146 = vmatprep.subr.mxu1 %v7893_v6  ;;  %7153 = vmatprep.mubr.msk.f32.mxu0 %vm7894_vm1, %v7893_v6 }
 0x1a1   : > { %7139 = vmatmul.mubr.msk.f32.vlgmr.msra.gmra.mrb[8].mxu1 %vm559_vm2, %v8123_v22 }
 0x1a2   : > { %7148 = vmatprep.mubr.msk.f32.mxu1 %vm7894_vm1, %v7893_v6 }
 0x264   : > { %v707_v32 = vpop.f32.mrb[0].mxu1 }
 0x265   : > { %v1174_v34 = vmul.f32 0.35355338, %v707_v32  ;;  %v7115_v35 = vpop.f32.mrb[1].mxu1 }
 0x267   : > { %v8185_v36 = vadd.f32 %v8182_v33, %v1174_v34 }
 0x268   : > { %v630_v37 = vpop.f32.mrb[8].mxu0  ;;  %v784_v38 = vpop.f32.mrb[2].mxu1 }
 0x269   : > { %v1173_v39 = vmul.f32 0.35355338, %v630_v37  ;;  %v7110_v40 = vpop.f32.mrb[9].mxu0  ;;  %v7120_v41 = vpop.f32.mrb[3].mxu1  ;;  %v1175_v42 = vmul.f32 0.35355338, %v784_v38 }
 0x26a   : > { %v1198_v43 = vsel %vm559_vm2, %v8185_v36, -inf }
 0x26b   : > { %1199 = vmax.xlane.f32.xlu1 %v1198_v43  ;;  %v1187_v44 = vadd.f32 %v8182_v33, %v1173_v39  ;;  %v1189_v51 = vadd.f32 %v8182_v33, %v1175_v42 }
 0x26c   : > { %v861_v45 = vpop.f32.mrb[4].mxu1  ;;  %v1015_v46 = vpop.f32.mrb[10].mxu0 }
 0x26d   : > { %v7125_v47 = vpop.f32.mrb[5].mxu1  ;;  %v7135_v48 = vpop.f32.mrb[11].mxu0  ;;  %v1176_v49 = vmul.f32 0.35355338, %v861_v45  ;;  %v1195_v50 = vsel %vm559_vm2, %v1187_v44, -inf  ;;  %v1201_v58 = vsel %vm559_vm2, %v1189_v51, -inf }
 0x26e   : > { %1196 = vmax.xlane.f32.xlu0 %v1195_v50  ;;  %v1178_v57 = vmul.f32 0.35355338, %v1015_v46 }
 0x26f   : > { %v1190_v59 = vadd.f32 %v8182_v33, %v1176_v49 }
 0x270   : > { %v938_v52 = vpop.f32.mrb[6].mxu1  ;;  %v1169_v53 = vpop.f32.mrb[12].mxu0  ;;  %v1192_v2 = vadd.f32 %v8182_v33, %v1178_v57 }
 0x271   : > { %v1177_v54 = vmul.f32 0.35355338, %v938_v52  ;;  %v7130_v55 = vpop.f32.mrb[7].mxu1  ;;  %v7145_v56 = vpop.f32.mrb[13].mxu0  ;;  %v1180_v0 = vmul.f32 0.35355338, %v1169_v53 }
 0x272   : > { %1202 = vmax.xlane.f32.xlu0 %v1201_v58  ;;  %v1204_v1 = vsel %vm559_vm2, %v1190_v59, -inf  ;;  %v1210_v3 = vsel %vm559_vm2, %v1192_v2, -inf }
 0x273   : > { %v1191_v60 = vadd.f32 %v8182_v33, %v1177_v54  ;;  %v1194_v4 = vadd.f32 %v8182_v33, %v1180_v0 }
 0x274   : > { %v1092_v61 = vpop.f32.mrb[8].mxu1 }
 0x275   : > { %v7140_v62 = vpop.f32.mrb[9].mxu1  ;;  %v1207_v63 = vsel %vm559_vm2, %v1191_v60, -inf  ;;  %v1216_v5 = vsel %vm559_vm2, %v1194_v4, -inf  ;;  %v1179_v7 = vmul.f32 0.35355338, %v1092_v61 }
 0x276   : > { %1208 = vmax.xlane.f32.xlu1 %v1207_v63  ;;  %1205 = vmax.xlane.f32.xlu0 %v1204_v1 }
 0x277   : > { %v8220_v8 = vadd.f32 %v8182_v33, %v1179_v7 }
 0x279   : > { %v1213_v10 = vsel %vm559_vm2, %v8220_v8, -inf }
 0x27a   : > { %1211 = vmax.xlane.f32.xlu0 %v1210_v3 }
 0x27e   : > { %1217 = vmax.xlane.f32.xlu0 %v1216_v5 }
 0x287   : > { %1283 = vrot.lane.b32.xlu1 %v8116_v15, %s7896_s18 }
 0x28b   : > { %1435 = vrot.lane.b32.xlu1 %v8107_v9, %s7896_s18 }
 0x28f   : > { %1511 = vrot.lane.b32.xlu1 %v8112_v14, %s7896_s18 }
 0x293   : > { %1663 = vrot.lane.b32.xlu1 %v8121_v21, %s7896_s18 }
 0x294   : > { %1359 = vrot.lane.b32.xlu0 %v8110_v13, %s7896_s18 }
 0x297   : > { %1815 = vrot.lane.b32.xlu1 %v8125_v23, %s7896_s18 }
 0x298   : > { %1587 = vrot.lane.b32.xlu0 %v8118_v18, %s7896_s18 }
 0x29b   : > { %1971 = vrot.lane.b32.xlu1 %v8110_v13, %s7897_s13 }
 0x29c   : > { %1739 = vrot.lane.b32.xlu0 %v8123_v22, %s7896_s18  ;;  %s7905_s18 = smov 40  }
 0x29f   : > { %1969 = vrot.lane.b32.xlu1 %v8110_v13, %s7898_s27 }
 0x2a0   : > { %1893 = vrot.lane.b32.xlu0 %v8116_v15, %s7897_s13 }
 0x2a4   : > { %1891 = vrot.lane.b32.xlu0 %v8116_v15, %s7898_s27 }
 0x2a8   : > { %2049 = vrot.lane.b32.xlu0 %v8107_v9, %s7897_s13 }
 0x2c3   : > { %1214 = vmax.xlane.f32.xlu1 %v1213_v10 }
 0x2d4   : > { %2127 = vrot.lane.b32.xlu1 %v8112_v14, %s7897_s13 }
 0x2f8   : > { %v1200_v11 = vpop.xlane.xlu1 %1199 }
 0x2f9   : > { %v1220_v12 = vsub.f32 %v8185_v36, %v1200_v11 }
 0x2fb   : > { %v1229_v16 = vmul.f32 1.442695, %v1220_v12  ;;  %v1197_v17 = vpop.xlane.xlu0 %1196 }
 0x2fc   : > { %v1219_v19 = vsub.f32 %v1187_v44, %v1197_v17 }
 0x2fd   : > { %7615 = vpow2.f32 %v1229_v16 }
 0x2fe   : > { %v1227_v20 = vmul.f32 1.442695, %v1219_v19 }
 0x2ff   : > { %v1203_v24 = vpop.xlane.xlu0 %1202 }
 0x300   : > { %7617 = vpow2.f32 %v1227_v20  ;;  %v1221_v25 = vsub.f32 %v1189_v51, %v1203_v24 }
 0x302   : > { %v1231_v26 = vmul.f32 1.442695, %v1221_v25 }
 0x303   : > { %v1209_v27 = vpop.xlane.xlu1 %1208  ;;  %v1206_v29 = vpop.xlane.xlu0 %1205 }
 0x304   : > { %v1223_v28 = vsub.f32 %v1191_v60, %v1209_v27  ;;  %7619 = vpow2.f32 %v1231_v26  ;;  %v1222_v30 = vsub.f32 %v1190_v59, %v1206_v29 }
 0x306   : > { %v1235_v31 = vmul.f32 1.442695, %v1223_v28  ;;  %v1233_v34 = vmul.f32 1.442695, %v1222_v30 }
 0x307   : > { %v8227_v32 = vpop.eup %7615  ;;  %v1284_v35 = vpop.permute.xlu1 %1283 }
 0x308   : > { %7621 = vpow2.f32 %v1235_v31  ;;  %v1212_v36 = vpop.xlane.xlu0 %1211  ;;  %v1246_v37 = vsel %vm559_vm2, %v8227_v32, 0.0  ;;  %7147 = vmatpush3.msra.mxu1 %v1284_v35 }
 0x309   : > { %7623 = vpow2.f32 %v1233_v34  ;;  %v1224_v38 = vsub.f32 %v1192_v2, %v1212_v36  ;;  %1247 = vadd.xlane.f32.xlu0 %v1246_v37  ;;  %7156 = vmatprep.subr.mxu1 %v7893_v6 }
 0x30a   : > { %v8232_v39 = vpop.eup %7617 }
 0x30b   : > { %v1237_v40 = vmul.f32 1.442695, %v1224_v38  ;;  %v1243_v42 = vsel %vm559_vm2, %v8232_v39, 0.0  ;;  %v1436_v56 = vpop.permute.xlu1 %1435 }
 0x30c   : > { %v1218_v41 = vpop.xlane.xlu0 %1217  ;;  %1244 = vadd.xlane.f32.xlu1 %v1243_v42 }
 0x30d   : > { %7625 = vpow2.f32 %v1237_v40  ;;  %v1226_v43 = vsub.f32 %v1194_v4, %v1218_v41 }
 0x30e   : > { %v8236_v44 = vpop.eup %7619 }
 0x30f   : > { %v1241_v45 = vmul.f32 1.442695, %v1226_v43  ;;  %v1249_v47 = vsel %vm559_vm2, %v8236_v44, 0.0  ;;  %v1512_v57 = vpop.permute.xlu1 %1511 }
 0x310   : > { %v1360_v46 = vpop.permute.xlu0 %1359  ;;  %1250 = vadd.xlane.f32.xlu1 %v1249_v47 }
 0x311   : > { %7627 = vpow2.f32 %v1241_v45  ;;  %7152 = vmatpush3.msra.mxu0 %v1360_v46 }
 0x312   : > { %v8240_v48 = vpop.eup %7621  ;;  %7161 = vmatprep.subr.mxu0 %v7893_v6 }
 0x313   : > { %v8243_v49 = vpop.eup %7623  ;;  %v1255_v50 = vsel %vm559_vm2, %v8240_v48, 0.0  ;;  %v8263_v58 = vpop.permute.xlu1 %1663 }
 0x314   : > { %v1252_v51 = vsel %vm559_vm2, %v8243_v49, 0.0  ;;  %1256 = vadd.xlane.f32.xlu1 %v1255_v50  ;;  %v1588_v3 = vpop.permute.xlu0 %1587 }
 0x315   : > { %1253 = vadd.xlane.f32.xlu0 %v1252_v51 }
 0x317   : > { %v8249_v52 = vpop.eup %7625  ;;  %v8269_v59 = vpop.permute.xlu1 %1815 }
 0x318   : > { %v1258_v53 = vsel %vm559_vm2, %v8249_v52, 0.0  ;;  %v1740_v4 = vpop.permute.xlu0 %1739 }
 0x319   : > { %1259 = vadd.xlane.f32.xlu0 %v1258_v53 }
 0x31b   : > { %v8253_v54 = vpop.eup %7627  ;;  %v8273_v60 = vpop.permute.xlu1 %1971 }
 0x31c   : > { %v1264_v55 = vsel %vm559_vm2, %v8253_v54, 0.0  ;;  %v8290_v5 = vpop.permute.xlu0 %1893 }
 0x31d   : > { %1265 = vadd.xlane.f32.xlu0 %v1264_v55 }
 0x31f   : > { %v8275_v61 = vpop.permute.xlu1 %1969 }
 0x320   : > { %v8292_v7 = vpop.permute.xlu0 %1891 }
 0x325   : > { %2125 = vrot.lane.b32.xlu1 %v8112_v14, %s7898_s27 }
 0x333   : > { %2047 = vrot.lane.b32.xlu0 %v8107_v9, %s7898_s27 }
 0x337   : > { %2205 = vrot.lane.b32.xlu0 %v8118_v18, %s7897_s13 }
 0x33b   : > { %2203 = vrot.lane.b32.xlu0 %v8118_v18, %s7898_s27 }
 0x33f   : > { %2361 = vrot.lane.b32.xlu0 %v8123_v22, %s7897_s13 }
 0x343   : > { %2359 = vrot.lane.b32.xlu0 %v8123_v22, %s7898_s27 }
 0x350   : > { %v1215_v62 = vpop.xlane.xlu1 %1214 }
 0x351   : > { %v1225_v63 = vsub.f32 %v8220_v8, %v1215_v62  ;;  %v8294_v8 = vpop.permute.xlu0 %2049 }
 0x353   : > { %v1239_v0 = vmul.f32 1.442695, %v1225_v63 }
 0x354   : > { %v2128_v10 = vpop.permute.xlu1 %2127 }
 0x355   : > { %7629 = vpow2.f32 %v1239_v0 }
 0x35f   : > { %v8278_v1 = vpop.eup %7629 }
 0x360   : > { %v1261_v2 = vsel %vm559_vm2, %v8278_v1, 0.0 }
 0x361   : > { %1262 = vadd.xlane.f32.xlu1 %v1261_v2 }
 0x372   : > { %2283 = vrot.lane.b32.xlu1 %v8121_v21, %s7897_s13 }
 0x376   : > { %2281 = vrot.lane.b32.xlu1 %v8121_v21, %s7898_s27 }
 0x37a   : > { %2439 = vrot.lane.b32.xlu1 %v8125_v23, %s7897_s13  ;;  %s7906_s13 = smov 8  }
 0x37e   : > { %2437 = vrot.lane.b32.xlu1 %v8125_v23, %s7898_s27  ;;  %s7907_s27 = smov 16  }
 0x396   : > { %v1248_v11 = vpop.xlane.xlu0 %1247 }
 0x397   : > { %7631 = vrcp.f32 %v1248_v11 }
 0x399   : > { %v1245_v12 = vpop.xlane.xlu1 %1244 }
 0x39a   : > { %7633 = vrcp.f32 %v1245_v12 }
 0x39d   : > { %v1251_v16 = vpop.xlane.xlu1 %1250 }
 0x39e   : > { %7635 = vrcp.f32 %v1251_v16 }
 0x3a1   : > { %v7632_v17 = vpop.eup %7631  ;;  %v1257_v19 = vpop.xlane.xlu1 %1256 }
 0x3a2   : > { %v1254_v20 = vpop.xlane.xlu0 %1253  ;;  %v1276_v24 = vmul.f32 %v7632_v17, %v8227_v32  ;;  %7637 = vrcp.f32 %v1257_v19 }
 0x3a3   : > { %7639 = vrcp.f32 %v1254_v20 }
 0x3a4   : > { %7154 = vmatmul.mubr.msk.f32.vlgmr.msra.gmra.mrb[14].mxu0 %vm559_vm2, %v1276_v24  ;;  %v7634_v25 = vpop.eup %7633 }
 0x3a5   : > { %7162 = vmatpush3.msra.mxu0 %v1512_v57  ;;  %7163 = vmatprep.mubr.msk.f32.mxu0 %vm7894_vm1, %v7893_v6  ;;  %v1275_v27 = vmul.f32 %v7634_v25, %v8232_v39  ;;  %v2126_v40 = vpop.permute.xlu1 %2125 }
 0x3a6   : > { %v1260_v26 = vpop.xlane.xlu0 %1259  ;;  %7171 = vmatprep.subr.mxu0 %v7893_v6 }
 0x3a7   : > { %7641 = vrcp.f32 %v1260_v26  ;;  %7149 = vmatmul.mubr.msk.f32.vlgmr.msra.gmra.mrb[10].mxu1 %vm559_vm2, %v1275_v27 }
 0x3a8   : > { %v7636_v28 = vpop.eup %7635  ;;  %7157 = vmatpush3.msra.mxu1 %v1436_v56  ;;  %7158 = vmatprep.mubr.msk.f32.mxu1 %vm7894_vm1, %v7893_v6 }
 0x3a9   : > { %7166 = vmatprep.subr.mxu1 %v7893_v6  ;;  %v1277_v30 = vmul.f32 %v7636_v28, %v8236_v44 }
 0x3aa   : > { %v1266_v29 = vpop.xlane.xlu0 %1265 }
 0x3ab   : > { %7643 = vrcp.f32 %v1266_v29  ;;  %7159 = vmatmul.mubr.msk.f32.vlgmr.msra.gmra.mrb[12].mxu1 %vm559_vm2, %v1277_v30 }
 0x3ac   : > { %v7638_v31 = vpop.eup %7637  ;;  %7167 = vmatpush3.msra.mxu1 %v1588_v3  ;;  %7168 = vmatprep.mubr.msk.f32.mxu1 %vm7894_vm1, %v7893_v6 }
 0x3ad   : > { %v7640_v32 = vpop.eup %7639  ;;  %7176 = vmatprep.subr.mxu1 %v7893_v6  ;;  %v1279_v34 = vmul.f32 %v7638_v31, %v8240_v48 }
 0x3ae   : > { %v1278_v35 = vmul.f32 %v7640_v32, %v8243_v49  ;;  %v2048_v43 = vpop.permute.xlu0 %2047 }
 0x3af   : > { %7169 = vmatmul.mubr.msk.f32.vlgmr.msra.gmra.mrb[14].mxu1 %vm559_vm2, %v1279_v34 }
 0x3b0   : > { %7164 = vmatmul.mubr.msk.f32.vlgmr.msra.gmra.mrb[16].mxu0 %vm559_vm2, %v1278_v35  ;;  %7177 = vmatpush3.msra.mxu1 %v1740_v4 }
 0x3b1   : > { %v7642_v36 = vpop.eup %7641  ;;  %7172 = vmatpush3.msra.mxu0 %v8263_v58  ;;  %7173 = vmatprep.mubr.msk.f32.mxu0 %vm7894_vm1, %v7893_v6 }
 0x3b2   : > { %v1280_v37 = vmul.f32 %v7642_v36, %v8249_v52  ;;  %7181 = vmatprep.subr.mxu0 %v7893_v6  ;;  %7178 = vmatprep.mubr.msk.f32.mxu1 %vm7894_vm1, %v7893_v6  ;;  %v2206_v46 = vpop.permute.xlu0 %2205 }
 0x3b3   : > { %7186 = vmatprep.subr.mxu1 %v7893_v6 }
 0x3b4   : > { %7174 = vmatmul.mubr.msk.f32.vlgmr.msra.gmra.mrb[18].mxu0 %vm559_vm2, %v1280_v37 }
 0x3b5   : > { %v7644_v38 = vpop.eup %7643  ;;  %7182 = vmatpush3.msra.mxu0 %v8269_v59  ;;  %7183 = vmatprep.mubr.msk.f32.mxu0 %vm7894_vm1, %v7893_v6 }
 0x3b6   : > { %v1282_v39 = vmul.f32 %v7644_v38, %v8253_v54  ;;  %7191 = vmatprep.subr.mxu0 %v7893_v6  ;;  %v2204_v50 = vpop.permute.xlu0 %2203 }
 0x3b8   : > { %7184 = vmatmul.mubr.msk.f32.vlgmr.msra.gmra.mrb[20].mxu0 %vm559_vm2, %v1282_v39 }
 0x3b9   : > { %7193 = vmatprep.mubr.msk.f32.mxu0 %vm7894_vm1, %v7893_v6 }
 0x3ba   : > { %v2362_v51 = vpop.permute.xlu0 %2361 }
 0x3bc   : > { %7192 = vmatpush3.xpose.msk.msra.mxu0 %vm559_vm2, %v8273_v60 }
 0x3bd   : > { %7201 = vmatprep.subr.mxu0 %v7893_v6 }
 0x3be   : > { %v2360_v52 = vpop.permute.xlu0 %2359 }
 0x3bf   : > { %7194 = vmatmul.mubr.msk.f32.vlgmr.msra.gmra.mrb[22].mxu0 %vm559_vm2, %v8275_v61 }
 0x3c0   : > { %7202 = vmatpush3.xpose.msk.msra.mxu0 %vm559_vm2, %v2128_v10  ;;  %7203 = vmatprep.mubr.msk.f32.mxu0 %vm7894_vm1, %v7893_v6 }
 0x3c1   : > { %7211 = vmatprep.subr.mxu0 %v7893_v6 }
 0x3c3   : > { %7204 = vmatmul.mubr.msk.f32.vlgmr.msra.gmra.mrb[24].mxu0 %vm559_vm2, %v2126_v40 }
 0x3c4   : > { %7213 = vmatprep.mubr.msk.f32.mxu0 %vm7894_vm1, %v7893_v6 }
 0x3ee   : > { %v1263_v41 = vpop.xlane.xlu1 %1262 }
 0x3ef   : > { %7645 = vrcp.f32 %v1263_v41 }
 0x3f2   : > { %v2284_v42 = vpop.permute.xlu1 %2283 }
 0x3f3   : > { %7212 = vmatpush3.xpose.msk.msra.mxu0 %vm559_vm2, %v2284_v42 }
 0x3f4   : > { %7221 = vmatprep.subr.mxu0 %v7893_v6 }
 0x3f6   : > { %v2282_v44 = vpop.permute.xlu1 %2281 }
 0x3f7   : > { %7214 = vmatmul.mubr.msk.f32.vlgmr.msra.gmra.mrb[26].mxu0 %vm559_vm2, %v2282_v44 }
 0x3f8   : > { %7223 = vmatprep.mubr.msk.f32.mxu0 %vm7894_vm1, %v7893_v6 }
 0x3f9   : > { %v7646_v45 = vpop.eup %7645 }
 0x3fa   : > { %v2440_v47 = vpop.permute.xlu1 %2439  ;;  %v1281_v48 = vmul.f32 %v7646_v45, %v8278_v1 }
 0x3fb   : > { %7222 = vmatpush3.xpose.msk.msra.mxu0 %vm559_vm2, %v2440_v47 }
 0x3fc   : > { %7179 = vmatmul.mubr.msk.f32.vlgmr.msra.gmra.mrb[16].mxu1 %vm559_vm2, %v1281_v48  ;;  %7231 = vmatprep.subr.mxu0 %v7893_v6 }
 0x3fd   : > { %7187 = vmatpush3.xpose.msk.msra.mxu1 %vm559_vm2, %v8290_v5  ;;  %7188 = vmatprep.mubr.msk.f32.mxu1 %vm7894_vm1, %v7893_v6 }
 0x3fe   : > { %v2438_v49 = vpop.permute.xlu1 %2437  ;;  %7196 = vmatprep.subr.mxu1 %v7893_v6 }
 0x3ff   : > { %7224 = vmatmul.mubr.msk.f32.vlgmr.msra.gmra.mrb[28].mxu0 %vm559_vm2, %v2438_v49 }
 0x400   : > { %7189 = vmatmul.mubr.msk.f32.vlgmr.msra.gmra.mrb[18].mxu1 %vm559_vm2, %v8292_v7  ;;  %7233 = vmatprep.mubr.msk.f32.mxu0 %vm7894_vm1, %v7893_v6 }
 0x401   : > { %7197 = vmatpush3.xpose.msk.msra.mxu1 %vm559_vm2, %v8294_v8  ;;  %7198 = vmatprep.mubr.msk.f32.mxu1 %vm7894_vm1, %v7893_v6 }
 0x402   : > { %7206 = vmatprep.subr.mxu1 %v7893_v6 }
 0x404   : > { %7199 = vmatmul.mubr.msk.f32.vlgmr.msra.gmra.mrb[20].mxu1 %vm559_vm2, %v2048_v43 }
 0x405   : > { %7207 = vmatpush3.xpose.msk.msra.mxu1 %vm559_vm2, %v2206_v46  ;;  %7208 = vmatprep.mubr.msk.f32.mxu1 %vm7894_vm1, %v7893_v6 }
 0x406   : > { %7216 = vmatprep.subr.mxu1 %v7893_v6 }
 0x408   : > { %7209 = vmatmul.mubr.msk.f32.vlgmr.msra.gmra.mrb[22].mxu1 %vm559_vm2, %v2204_v50 }
 0x409   : > { %7217 = vmatpush3.xpose.msk.msra.mxu1 %vm559_vm2, %v2362_v51  ;;  %7218 = vmatprep.mubr.msk.f32.mxu1 %vm7894_vm1, %v7893_v6 }
 0x40a   : > { %7226 = vmatprep.subr.mxu1 %v7893_v6 }
 0x40c   : > { %7219 = vmatmul.mubr.msk.f32.vlgmr.msra.gmra.mrb[24].mxu1 %vm559_vm2, %v2360_v52 }
 0x40d   : > { %7228 = vmatprep.mubr.msk.f32.mxu1 %vm7894_vm1, %v7893_v6 }
 0x477   : > { %v8381_v53 = vpop.f32.mrb[14].mxu0 }
 0x478   : > { %v7155_v54 = vpop.f32.mrb[15].mxu0 }
 0x47a   : > { %v8383_v55 = vpop.f32.mrb[10].mxu1 }
 0x47b   : > { %v7150_v56 = vpop.f32.mrb[11].mxu1 }
 0x47e   : > { %v8385_v57 = vpop.f32.mrb[12].mxu1 }
 0x47f   : > { %v7160_v58 = vpop.f32.mrb[13].mxu1 }
 0x482   : > { %v8387_v59 = vpop.f32.mrb[14].mxu1 }
 0x483   : > { %v8389_v60 = vpop.f32.mrb[16].mxu0  ;;  %v7170_v61 = vpop.f32.mrb[15].mxu1 }
 0x484   : > { %v7165_v62 = vpop.f32.mrb[17].mxu0 }
 0x487   : > { %v8391_v63 = vpop.f32.mrb[18].mxu0 }
 0x488   : > { %v7175_v0 = vpop.f32.mrb[19].mxu0 }
 0x48b   : > { %v8393_v1 = vpop.f32.mrb[20].mxu0 }
 0x48c   : > { %v7185_v2 = vpop.f32.mrb[21].mxu0 }
 0x492   : > { %v2043_v3 = vpop.f32.mrb[22].mxu0 }
 0x493   : > { %v2516_v4 = vmul.f32 0.35355338, %v2043_v3  ;;  %v7195_v5 = vpop.f32.mrb[23].mxu0 }
 0x495   : > { %v8396_v7 = vadd.f32 %v8182_v33, %v2516_v4 }
 0x496   : > { %v2199_v8 = vpop.f32.mrb[24].mxu0 }
 0x497   : > { %v7205_v10 = vpop.f32.mrb[25].mxu0  ;;  %v2534_v11 = vsel %vm559_vm2, %v8396_v7, -inf  ;;  %v2518_v29 = vmul.f32 0.35355338, %v2199_v8 }
 0x498   : > { %2535 = vmax.xlane.f32.xlu1 %v2534_v11 }
 0x499   : > { %v2526_v37 = vadd.f32 %v8182_v33, %v2518_v29 }
 0x49b   : > { %v2540_v44 = vsel %vm559_vm2, %v2526_v37, -inf }
 0x4ca   : > { %v2355_v12 = vpop.f32.mrb[26].mxu0 }
 0x4cb   : > { %v7215_v16 = vpop.f32.mrb[27].mxu0  ;;  %v2520_v38 = vmul.f32 0.35355338, %v2355_v12 }
 0x4cd   : > { %v2528_v49 = vadd.f32 %v8182_v33, %v2520_v38 }
 0x4cf   : > { %v8400_v17 = vpop.f32.mrb[16].mxu1  ;;  %v2546_v51 = vsel %vm559_vm2, %v2528_v49, -inf }
 0x4d0   : > { %v7180_v19 = vpop.f32.mrb[17].mxu1 }
 0x4d2   : > { %v2511_v20 = vpop.f32.mrb[28].mxu0 }
 0x4d3   : > { %v1965_v24 = vpop.f32.mrb[18].mxu1  ;;  %v7225_v25 = vpop.f32.mrb[29].mxu0  ;;  %v2522_v45 = vmul.f32 0.35355338, %v2511_v20 }
 0x4d4   : > { %v2515_v26 = vmul.f32 0.35355338, %v1965_v24  ;;  %v7190_v27 = vpop.f32.mrb[19].mxu1 }
 0x4d5   : > { %v2530_v54 = vadd.f32 %v8182_v33, %v2522_v45 }
 0x4d6   : > { %v2523_v28 = vadd.f32 %v8182_v33, %v2515_v26 }
 0x4d7   : > { %v2121_v30 = vpop.f32.mrb[20].mxu1  ;;  %v2552_v56 = vsel %vm559_vm2, %v2530_v54, -inf }
 0x4d8   : > { %v2517_v31 = vmul.f32 0.35355338, %v2121_v30  ;;  %v7200_v32 = vpop.f32.mrb[21].mxu1  ;;  %v2531_v34 = vsel %vm559_vm2, %v2523_v28, -inf }
 0x4d9   : > { %2532 = vmax.xlane.f32.xlu0 %v2531_v34 }
 0x4da   : > { %v2525_v35 = vadd.f32 %v8182_v33, %v2517_v31 }
 0x4db   : > { %v2277_v36 = vpop.f32.mrb[22].mxu1 }
 0x4dc   : > { %v2519_v39 = vmul.f32 0.35355338, %v2277_v36  ;;  %v7210_v40 = vpop.f32.mrb[23].mxu1  ;;  %v2537_v41 = vsel %vm559_vm2, %v2525_v35, -inf }
 0x4dd   : > { %2538 = vmax.xlane.f32.xlu0 %v2537_v41 }
 0x4de   : > { %v2527_v42 = vadd.f32 %v8182_v33, %v2519_v39 }
 0x4df   : > { %v2433_v43 = vpop.f32.mrb[24].mxu1 }
 0x4e0   : > { %v2521_v46 = vmul.f32 0.35355338, %v2433_v43  ;;  %v7220_v47 = vpop.f32.mrb[25].mxu1  ;;  %v2543_v48 = vsel %vm559_vm2, %v2527_v42, -inf }
 0x4e1   : > { %2541 = vmax.xlane.f32.xlu0 %v2540_v44  ;;  %2544 = vmax.xlane.f32.xlu1 %v2543_v48 }
 0x4e2   : > { %v2529_v50 = vadd.f32 %v8182_v33, %v2521_v46 }
 0x4e4   : > { %v2549_v52 = vsel %vm559_vm2, %v2529_v50, -inf }
 0x4e5   : > { %2547 = vmax.xlane.f32.xlu0 %v2546_v51  ;;  %2550 = vmax.xlane.f32.xlu1 %v2549_v52 }
 0x4e9   : > { %2553 = vmax.xlane.f32.xlu0 %v2552_v56 }
 0x4f6   : > { %2619 = vrot.lane.b32.xlu1 %v8116_v15, %s7899_s23 }
 0x4fa   : > { %2771 = vrot.lane.b32.xlu1 %v8107_v9, %s7899_s23 }
 0x4fe   : > { %2847 = vrot.lane.b32.xlu1 %v8112_v14, %s7899_s23 }
 0x4ff   : > { %2695 = vrot.lane.b32.xlu0 %v8110_v13, %s7899_s23 }
 0x502   : > { %2999 = vrot.lane.b32.xlu1 %v8121_v21, %s7899_s23 }
 0x503   : > { %2923 = vrot.lane.b32.xlu0 %v8118_v18, %s7899_s23 }
 0x506   : > { %3151 = vrot.lane.b32.xlu1 %v8125_v23, %s7899_s23 }
 0x507   : > { %3075 = vrot.lane.b32.xlu0 %v8123_v22, %s7899_s23  ;;  %s9133_s23 = scalar_lea.hbm %s9190_s12, %s6932_s19 }
 0x50a   : > { %3307 = vrot.lane.b32.xlu1 %v8110_v13, %s7900_s30 }
 0x50b   : > { %3229 = vrot.lane.b32.xlu0 %v8116_v15, %s7900_s30 }
 0x50e   : > { %3305 = vrot.lane.b32.xlu1 %v8110_v13, %s7901_s29 }
 0x50f   : > { %3227 = vrot.lane.b32.xlu0 %v8116_v15, %s7901_s29 }
 0x512   : > { %3463 = vrot.lane.b32.xlu1 %v8112_v14, %s7900_s30 }
 0x513   : > { %3385 = vrot.lane.b32.xlu0 %v8107_v9, %s7900_s30 }
 0x525   : > { %v2536_v33 = vpop.xlane.xlu1 %2535 }
 0x526   : > { %v2556_v58 = vsub.f32 %v8396_v7, %v2536_v33 }
 0x528   : > { %v2565_v61 = vmul.f32 1.442695, %v2556_v58 }
 0x52a   : > { %7647 = vpow2.f32 %v2565_v61 }
 0x534   : > { %v8437_v62 = vpop.eup %7647 }
 0x535   : > { %v2582_v0 = vsel %vm559_vm2, %v8437_v62, 0.0 }
 0x536   : > { %2583 = vadd.xlane.f32.xlu0 %v2582_v0 }
 0x566   : > { %v2533_v2 = vpop.xlane.xlu0 %2532 }
 0x567   : > { %v2555_v3 = vsub.f32 %v2523_v28, %v2533_v2 }
 0x569   : > { %v2563_v4 = vmul.f32 1.442695, %v2555_v3 }
 0x56a   : > { %v2539_v5 = vpop.xlane.xlu0 %2538 }
 0x56b   : > { %7649 = vpow2.f32 %v2563_v4  ;;  %v2557_v8 = vsub.f32 %v2525_v35, %v2539_v5 }
 0x56d   : > { %v2567_v10 = vmul.f32 1.442695, %v2557_v8 }
 0x56e   : > { %v2545_v11 = vpop.xlane.xlu1 %2544  ;;  %v2542_v12 = vpop.xlane.xlu0 %2541 }
 0x56f   : > { %7651 = vpow2.f32 %v2567_v10  ;;  %v2559_v16 = vsub.f32 %v2527_v42, %v2545_v11  ;;  %v2558_v7 = vsub.f32 %v2526_v37, %v2542_v12 }
 0x571   : > { %v2571_v19 = vmul.f32 1.442695, %v2559_v16  ;;  %v2569_v20 = vmul.f32 1.442695, %v2558_v7 }
 0x572   : > { %v2551_v24 = vpop.xlane.xlu1 %2550  ;;  %v2548_v25 = vpop.xlane.xlu0 %2547 }
 0x573   : > { %7653 = vpow2.f32 %v2571_v19  ;;  %v2561_v26 = vsub.f32 %v2529_v50, %v2551_v24  ;;  %v2560_v27 = vsub.f32 %v2528_v49, %v2548_v25 }
 0x574   : > { %7655 = vpow2.f32 %v2569_v20 }
 0x575   : > { %v8441_v29 = vpop.eup %7649  ;;  %v2575_v28 = vmul.f32 1.442695, %v2561_v26  ;;  %v2573_v30 = vmul.f32 1.442695, %v2560_v27 }
 0x576   : > { %v2620_v31 = vpop.permute.xlu1 %2619  ;;  %v2554_v32 = vpop.xlane.xlu0 %2553  ;;  %v2579_v34 = vsel %vm559_vm2, %v8441_v29, 0.0 }
 0x577   : > { %7657 = vpow2.f32 %v2575_v28  ;;  %v2562_v35 = vsub.f32 %v2530_v54, %v2554_v32  ;;  %7227 = vmatpush3.msra.mxu1 %v2620_v31  ;;  %2580 = vadd.xlane.f32.xlu1 %v2579_v34 }
 0x578   : > { %7659 = vpow2.f32 %v2573_v30  ;;  %7236 = vmatprep.subr.mxu1 %v7893_v6 }
 0x579   : > { %v8446_v36 = vpop.eup %7651  ;;  %v2577_v37 = vmul.f32 1.442695, %v2562_v35 }
 0x57a   : > { %v2696_v38 = vpop.permute.xlu0 %2695  ;;  %v2585_v39 = vsel %vm559_vm2, %v8446_v36, 0.0  ;;  %v2772_v58 = vpop.permute.xlu1 %2771 }
 0x57b   : > { %7661 = vpow2.f32 %v2577_v37  ;;  %2586 = vadd.xlane.f32.xlu1 %v2585_v39  ;;  %7232 = vmatpush3.msra.mxu0 %v2696_v38 }
 0x57c   : > { %7241 = vmatprep.subr.mxu0 %v7893_v6 }
 0x57d   : > { %v8451_v40 = vpop.eup %7653 }
 0x57e   : > { %v8453_v41 = vpop.eup %7655  ;;  %v2591_v42 = vsel %vm559_vm2, %v8451_v40, 0.0  ;;  %v2924_v50 = vpop.permute.xlu0 %2923 }
 0x57f   : > { %2592 = vadd.xlane.f32.xlu1 %v2591_v42  ;;  %v2588_v43 = vsel %vm559_vm2, %v8453_v41, 0.0  ;;  %v2848_v2 = vpop.permute.xlu1 %2847 }
 0x580   : > { %2589 = vadd.xlane.f32.xlu0 %v2588_v43 }
 0x581   : > { %v8459_v44 = vpop.eup %7657 }
 0x582   : > { %v8461_v45 = vpop.eup %7659  ;;  %v2597_v46 = vsel %vm559_vm2, %v8459_v44, 0.0  ;;  %v8491_v51 = vpop.permute.xlu0 %3075 }
 0x583   : > { %2598 = vadd.xlane.f32.xlu1 %v2597_v46  ;;  %v2594_v47 = vsel %vm559_vm2, %v8461_v45, 0.0  ;;  %v3000_v3 = vpop.permute.xlu1 %2999 }
 0x584   : > { %2595 = vadd.xlane.f32.xlu0 %v2594_v47 }
 0x585   : > { %v8467_v48 = vpop.eup %7661 }
 0x586   : > { %v2600_v49 = vsel %vm559_vm2, %v8467_v48, 0.0  ;;  %v8497_v52 = vpop.permute.xlu0 %3229 }
 0x587   : > { %v3152_v4 = vpop.permute.xlu1 %3151 }
 0x588   : > { %2601 = vadd.xlane.f32.xlu0 %v2600_v49 }
 0x58a   : > { %v8502_v54 = vpop.permute.xlu0 %3227 }
 0x58b   : > { %v8520_v5 = vpop.permute.xlu1 %3307 }
 0x58e   : > { %v8509_v56 = vpop.permute.xlu0 %3385 }
 0x58f   : > { %v8522_v8 = vpop.permute.xlu1 %3305 }
 0x593   : > { %v8524_v10 = vpop.permute.xlu1 %3463 }
 0x594   : > { %3461 = vrot.lane.b32.xlu1 %v8112_v14, %s7901_s29 }
 0x598   : > { %3619 = vrot.lane.b32.xlu1 %v8121_v21, %s7900_s30 }
 0x59c   : > { %3617 = vrot.lane.b32.xlu1 %v8121_v21, %s7901_s29 }
 0x59e   : > { %3383 = vrot.lane.b32.xlu0 %v8107_v9, %s7901_s29 }
 0x5a0   : > { %3775 = vrot.lane.b32.xlu1 %v8125_v23, %s7900_s30 }
 0x5a2   : > { %3541 = vrot.lane.b32.xlu0 %v8118_v18, %s7900_s30 }
 0x5a4   : > { %3773 = vrot.lane.b32.xlu1 %v8125_v23, %s7901_s29 }
 0x5a6   : > { %3539 = vrot.lane.b32.xlu0 %v8118_v18, %s7901_s29 }
 0x5a8   : > { %3955 = vrot.lane.b32.xlu1 %v8116_v15, %s7902_s14 }
 0x5aa   : > { %3697 = vrot.lane.b32.xlu0 %v8123_v22, %s7900_s30 }
 0x5ac   : > { %4107 = vrot.lane.b32.xlu1 %v8107_v9, %s7902_s14 }
 0x5ae   : > { %3695 = vrot.lane.b32.xlu0 %v8123_v22, %s7901_s29  ;;  %s7910_s29 = smov [#allocation5]  }
 0x5b0   : > { %4183 = vrot.lane.b32.xlu1 %v8112_v14, %s7902_s14 }
 0x5b2   : > { %4031 = vrot.lane.b32.xlu0 %v8110_v13, %s7902_s14 }
 0x5b4   : > { %4335 = vrot.lane.b32.xlu1 %v8121_v21, %s7902_s14 }
 0x5b6   : > { %4259 = vrot.lane.b32.xlu0 %v8118_v18, %s7902_s14 }
 0x5b8   : > { %4487 = vrot.lane.b32.xlu1 %v8125_v23, %s7902_s14 }
 0x5ba   : > { %4411 = vrot.lane.b32.xlu0 %v8123_v22, %s7902_s14  ;;  %s7826_s14 = sshll.u32 %s7910_s29, 4  ;;  %s7827_s14 = int_to_ptr.vmem [resolvable:$false] %s7826_s14 }
 0x5bc   : > { %4643 = vrot.lane.b32.xlu1 %v8110_v13, %s7903_s28 }
 0x5be   : > { %4565 = vrot.lane.b32.xlu0 %v8116_v15, %s7903_s28 }
 0x5c0   : > { %4641 = vrot.lane.b32.xlu1 %v8110_v13, %s7904_s20 }
 0x5c2   : > { %4563 = vrot.lane.b32.xlu0 %v8116_v15, %s7904_s20 }
 0x5c3   : > { %v2584_v33 = vpop.xlane.xlu0 %2583 }
 0x5c4   : > { %7663 = vrcp.f32 %v2584_v33 }
 0x5ce   : > { %v7664_v61 = vpop.eup %7663 }
 0x5cf   : > { %v2612_v0 = vmul.f32 %v7664_v61, %v8437_v62 }
 0x5d1   : > { %7234 = vmatmul.mubr.msk.f32.vlgmr.msra.gmra.mrb[30].mxu0 %vm559_vm2, %v2612_v0 }
 0x5d2   : > { %7242 = vmatpush3.msra.mxu0 %v2848_v2  ;;  %7243 = vmatprep.mubr.msk.f32.mxu0 %vm7894_vm1, %v7893_v6 }
 0x5d3   : > { %7251 = vmatprep.subr.mxu0 %v7893_v6 }
 0x604   : > { %v2581_v11 = vpop.xlane.xlu1 %2580 }
 0x605   : > { %7665 = vrcp.f32 %v2581_v11 }
 0x608   : > { %v2587_v62 = vpop.xlane.xlu1 %2586 }
 0x609   : > { %7667 = vrcp.f32 %v2587_v62 }
 0x60c   : > { %v2593_v12 = vpop.xlane.xlu1 %2592 }
 0x60d   : > { %7669 = vrcp.f32 %v2593_v12  ;;  %v2590_v16 = vpop.xlane.xlu0 %2589 }
 0x60e   : > { %7671 = vrcp.f32 %v2590_v16 }
 0x60f   : > { %v7666_v7 = vpop.eup %7665 }
 0x610   : > { %v2599_v19 = vpop.xlane.xlu1 %2598  ;;  %v2611_v20 = vmul.f32 %v7666_v7, %v8441_v29 }
 0x611   : > { %7673 = vrcp.f32 %v2599_v19  ;;  %v2596_v24 = vpop.xlane.xlu0 %2595 }
 0x612   : > { %7675 = vrcp.f32 %v2596_v24  ;;  %7229 = vmatmul.mubr.msk.f32.vlgmr.msra.gmra.mrb[26].mxu1 %vm559_vm2, %v2611_v20 }
 0x613   : > { %v7668_v25 = vpop.eup %7667  ;;  %7237 = vmatpush3.msra.mxu1 %v2772_v58  ;;  %7238 = vmatprep.mubr.msk.f32.mxu1 %vm7894_vm1, %v7893_v6 }
 0x614   : > { %v3462_v26 = vpop.permute.xlu1 %3461  ;;  %7246 = vmatprep.subr.mxu1 %v7893_v6  ;;  %v2613_v27 = vmul.f32 %v7668_v25, %v8446_v36 }
 0x615   : > { %v2602_v28 = vpop.xlane.xlu0 %2601 }
 0x616   : > { %7677 = vrcp.f32 %v2602_v28  ;;  %7239 = vmatmul.mubr.msk.f32.vlgmr.msra.gmra.mrb[28].mxu1 %vm559_vm2, %v2613_v27 }
 0x617   : > { %v7670_v29 = vpop.eup %7669  ;;  %7247 = vmatpush3.msra.mxu1 %v2924_v50  ;;  %7248 = vmatprep.mubr.msk.f32.mxu1 %vm7894_vm1, %v7893_v6 }
 0x618   : > { %v7672_v30 = vpop.eup %7671  ;;  %7256 = vmatprep.subr.mxu1 %v7893_v6  ;;  %v2615_v31 = vmul.f32 %v7670_v29, %v8451_v40  ;;  %v3620_v32 = vpop.permute.xlu1 %3619 }
 0x619   : > { %v3384_v34 = vpop.permute.xlu0 %3383  ;;  %v2614_v35 = vmul.f32 %v7672_v30, %v8453_v41 }
 0x61a   : > { %7249 = vmatmul.mubr.msk.f32.vlgmr.msra.gmra.mrb[30].mxu1 %vm559_vm2, %v2615_v31 }
 0x61b   : > { %v7674_v36 = vpop.eup %7673  ;;  %7244 = vmatmul.mubr.msk.f32.vlgmr.msra.gmra.mrb[32].mxu0 %vm559_vm2, %v2614_v35  ;;  %7257 = vmatpush3.msra.mxu1 %v8491_v51 }
 0x61c   : > { %v7676_v37 = vpop.eup %7675  ;;  %7252 = vmatpush3.msra.mxu0 %v3000_v3  ;;  %7253 = vmatprep.mubr.msk.f32.mxu0 %vm7894_vm1, %v7893_v6  ;;  %v2617_v38 = vmul.f32 %v7674_v36, %v8459_v44  ;;  %v3618_v41 = vpop.permute.xlu1 %3617 }
 0x61d   : > { %7258 = vmatprep.mubr.msk.f32.mxu1 %vm7894_vm1, %v7893_v6  ;;  %7261 = vmatprep.subr.mxu0 %v7893_v6  ;;  %v2616_v39 = vmul.f32 %v7676_v37, %v8461_v45  ;;  %v3542_v40 = vpop.permute.xlu0 %3541 }
 0x61e   : > { %7259 = vmatmul.mubr.msk.f32.vlgmr.msra.gmra.mrb[32].mxu1 %vm559_vm2, %v2617_v38  ;;  %7266 = vmatprep.subr.mxu1 %v7893_v6 }
 0x61f   : > { %7254 = vmatmul.mubr.msk.f32.vlgmr.msra.gmra.mrb[34].mxu0 %vm559_vm2, %v2616_v39  ;;  %7268 = vmatprep.mubr.msk.f32.mxu1 %vm7894_vm1, %v7893_v6 }
 0x620   : > { %v7678_v42 = vpop.eup %7677  ;;  %7262 = vmatpush3.msra.mxu0 %v3152_v4  ;;  %7263 = vmatprep.mubr.msk.f32.mxu0 %vm7894_vm1, %v7893_v6  ;;  %v3776_v45 = vpop.permute.xlu1 %3775 }
 0x621   : > { %v2618_v43 = vmul.f32 %v7678_v42, %v8467_v48  ;;  %7271 = vmatprep.subr.mxu0 %v7893_v6  ;;  %v3540_v44 = vpop.permute.xlu0 %3539 }
 0x622   : > { %7267 = vmatpush3.xpose.msk.msra.mxu1 %vm559_vm2, %v8497_v52 }
 0x623   : > { %7264 = vmatmul.mubr.msk.f32.vlgmr.msra.gmra.mrb[36].mxu0 %vm559_vm2, %v2618_v43  ;;  %7276 = vmatprep.subr.mxu1 %v7893_v6 }
 0x624   : > { %7273 = vmatprep.mubr.msk.f32.mxu0 %vm7894_vm1, %v7893_v6  ;;  %v3774_v47 = vpop.permute.xlu1 %3773 }
 0x625   : > { %7269 = vmatmul.mubr.msk.f32.vlgmr.msra.gmra.mrb[34].mxu1 %vm559_vm2, %v8502_v54  ;;  %v3698_v46 = vpop.permute.xlu0 %3697 }
 0x626   : > { %7277 = vmatpush3.xpose.msk.msra.mxu1 %vm559_vm2, %v8509_v56  ;;  %7278 = vmatprep.mubr.msk.f32.mxu1 %vm7894_vm1, %v7893_v6 }
 0x627   : > { %7272 = vmatpush3.xpose.msk.msra.mxu0 %vm559_vm2, %v8520_v5  ;;  %7286 = vmatprep.subr.mxu1 %v7893_v6 }
 0x628   : > { %7281 = vmatprep.subr.mxu0 %v7893_v6  ;;  %v3956_v49 = vpop.permute.xlu1 %3955 }
 0x629   : > { %7279 = vmatmul.mubr.msk.f32.vlgmr.msra.gmra.mrb[36].mxu1 %vm559_vm2, %v3384_v34  ;;  %v3696_v48 = vpop.permute.xlu0 %3695 }
 0x62a   : > { %7274 = vmatmul.mubr.msk.f32.vlgmr.msra.gmra.mrb[38].mxu0 %vm559_vm2, %v8522_v8  ;;  %7287 = vmatpush3.xpose.msk.msra.mxu1 %vm559_vm2, %v3542_v40 }
 0x62b   : > { %7282 = vmatpush3.xpose.msk.msra.mxu0 %vm559_vm2, %v8524_v10  ;;  %7283 = vmatprep.mubr.msk.f32.mxu0 %vm7894_vm1, %v7893_v6 }
 0x62c   : > { %7288 = vmatprep.mubr.msk.f32.mxu1 %vm7894_vm1, %v7893_v6  ;;  %7291 = vmatprep.subr.mxu0 %v7893_v6 }
 0x62d   : > { %7289 = vmatmul.mubr.msk.f32.vlgmr.msra.gmra.mrb[38].mxu1 %vm559_vm2, %v3540_v44  ;;  %7296 = vmatprep.subr.mxu1 %v7893_v6  ;;  %v4032_v50 = vpop.permute.xlu0 %4031 }
 0x62e   : > { %7284 = vmatmul.mubr.msk.f32.vlgmr.msra.gmra.mrb[40].mxu0 %vm559_vm2, %v3462_v26  ;;  %7297 = vmatpush3.xpose.msk.msra.mxu1 %vm559_vm2, %v3698_v46  ;;  %v8635_v26 = vld [vmem:[%s9179_s1] ss:$0 sm:$0xff] }
 0x62f   : > { %7292 = vmatpush3.xpose.msk.msra.mxu0 %vm559_vm2, %v3620_v32  ;;  %7293 = vmatprep.mubr.msk.f32.mxu0 %vm7894_vm1, %v7893_v6 }
 0x630   : > { %7298 = vmatprep.mubr.msk.f32.mxu1 %vm7894_vm1, %v7893_v6  ;;  %7301 = vmatprep.subr.mxu0 %v7893_v6 }
 0x631   : > { %7299 = vmatmul.mubr.msk.f32.vlgmr.msra.gmra.mrb[40].mxu1 %vm559_vm2, %v3696_v48  ;;  %7306 = vmatprep.subr.mxu1 %v7893_v6 }
 0x632   : > { %7294 = vmatmul.mubr.msk.f32.vlgmr.msra.gmra.mrb[42].mxu0 %vm559_vm2, %v3618_v41  ;;  %7307 = vmatpush3.msra.mxu1 %v3956_v49 }
 0x633   : > { %7302 = vmatpush3.xpose.msk.msra.mxu0 %vm559_vm2, %v3776_v45  ;;  %7303 = vmatprep.mubr.msk.f32.mxu0 %vm7894_vm1, %v7893_v6 }
 0x634   : > { %7311 = vmatprep.subr.mxu0 %v7893_v6  ;;  %7308 = vmatprep.mubr.msk.f32.mxu1 %vm7894_vm1, %v7893_v6 }
 0x635   : > { %7316 = vmatprep.subr.mxu1 %v7893_v6 }
 0x636   : > { %7304 = vmatmul.mubr.msk.f32.vlgmr.msra.gmra.mrb[44].mxu0 %vm559_vm2, %v3774_v47 }
 0x637   : > { %7312 = vmatpush3.msra.mxu0 %v4032_v50  ;;  %7313 = vmatprep.mubr.msk.f32.mxu0 %vm7894_vm1, %v7893_v6 }
 0x638   : > { %7321 = vmatprep.subr.mxu0 %v7893_v6 }
 0x6a4   : > { %v8608_v51 = vpop.f32.mrb[30].mxu0 }
 0x6a5   : > { %v7235_v52 = vpop.f32.mrb[31].mxu0 }
 0x6e5   : > { %v8610_v54 = vpop.f32.mrb[26].mxu1 }
 0x6e6   : > { %v7543_v56 = vpack.i.bf16 %v8608_v51, %v8610_v54  ;;  %v7230_v33 = vpop.f32.mrb[27].mxu1 }
 0x6e9   : > { %v8614_v58 = vpop.f32.mrb[28].mxu1 }
 0x6ea   : > { %v7240_v61 = vpop.f32.mrb[29].mxu1 }
 0x6ed   : > { %v8616_v0 = vpop.f32.mrb[30].mxu1 }
 0x6ee   : > { %v8618_v2 = vpop.f32.mrb[32].mxu0  ;;  %v7250_v3 = vpop.f32.mrb[31].mxu1 }
 0x6ef   : > { %v7548_v4 = vpack.i.bf16 %v8618_v2, %v8614_v58  ;;  %v7245_v5 = vpop.f32.mrb[33].mxu0 }
 0x6f1   : > { %v8622_v8 = vpop.f32.mrb[32].mxu1 }
 0x6f2   : > { %v8624_v10 = vpop.f32.mrb[34].mxu0  ;;  %v7260_v11 = vpop.f32.mrb[33].mxu1 }
 0x6f3   : > { %v7255_v12 = vpop.f32.mrb[35].mxu0 }
 0x6f6   : > { %v8628_v16 = vpop.f32.mrb[36].mxu0 }
 0x6f7   : > { %v7568_v7 = vpack.i.bf16 %v8628_v16, %v8622_v8  ;;  %v7265_v19 = vpop.f32.mrb[37].mxu0 }
 0x6f8   : > { %v3301_v20 = vpop.f32.mrb[34].mxu1 }
 0x6f9   : > { %v3851_v24 = vmul.f32 0.35355338, %v3301_v20  ;;  %v7270_v25 = vpop.f32.mrb[35].mxu1 }
 0x6fb   : > { %v3859_v27 = vadd.f32 %v8635_v26, %v3851_v24 }
 0x6fc   : > { %v3457_v28 = vpop.f32.mrb[36].mxu1 }
 0x6fd   : > { %v3379_v29 = vpop.f32.mrb[38].mxu0  ;;  %v3853_v30 = vmul.f32 0.35355338, %v3457_v28  ;;  %v7280_v31 = vpop.f32.mrb[37].mxu1  ;;  %v3867_v32 = vsel %vm559_vm2, %v3859_v27, -inf }
 0x6fe   : > { %v3852_v34 = vmul.f32 0.35355338, %v3379_v29  ;;  %v7275_v35 = vpop.f32.mrb[39].mxu0  ;;  %3868 = vmax.xlane.f32.xlu0 %v3867_v32  ;;  %v8663_v31 = vpop.permute.xlu1 %4107 }
 0x6ff   : > { %v3861_v36 = vadd.f32 %v8635_v26, %v3853_v30 }
 0x700   : > { %v3860_v37 = vadd.f32 %v8635_v26, %v3852_v34  ;;  %v3613_v38 = vpop.f32.mrb[38].mxu1  ;;  %v8667_v34 = vpop.permute.xlu0 %4259 }
 0x701   : > { %v3535_v39 = vpop.f32.mrb[40].mxu0  ;;  %v3855_v40 = vmul.f32 0.35355338, %v3613_v38  ;;  %v7290_v41 = vpop.f32.mrb[39].mxu1  ;;  %v3873_v42 = vsel %vm559_vm2, %v3861_v36, -inf }
 0x702   : > { %v3854_v43 = vmul.f32 0.35355338, %v3535_v39  ;;  %v7285_v44 = vpop.f32.mrb[41].mxu0  ;;  %v3870_v45 = vsel %vm559_vm2, %v3860_v37, -inf  ;;  %3874 = vmax.xlane.f32.xlu0 %v3873_v42  ;;  %v8665_v32 = vpop.permute.xlu1 %4183 }
 0x703   : > { %v3863_v46 = vadd.f32 %v8635_v26, %v3855_v40  ;;  %3871 = vmax.xlane.f32.xlu1 %v3870_v45 }
 0x704   : > { %v3862_v47 = vadd.f32 %v8635_v26, %v3854_v43  ;;  %v3769_v48 = vpop.f32.mrb[40].mxu1  ;;  %v8671_v38 = vpop.permute.xlu0 %4411 }
 0x705   : > { %v3691_v49 = vpop.f32.mrb[42].mxu0  ;;  %v3857_v50 = vmul.f32 0.35355338, %v3769_v48  ;;  %v7300_v52 = vpop.f32.mrb[41].mxu1  ;;  %v3879_v33 = vsel %vm559_vm2, %v3863_v46, -inf }
 0x706   : > { %v3856_v61 = vmul.f32 0.35355338, %v3691_v49  ;;  %v7295_v3 = vpop.f32.mrb[43].mxu0  ;;  %v3876_v5 = vsel %vm559_vm2, %v3862_v47, -inf  ;;  %v8669_v35 = vpop.permute.xlu1 %4335 }
 0x707   : > { %v8648_v11 = vadd.f32 %v8635_v26, %v3857_v50  ;;  %3877 = vmax.xlane.f32.xlu0 %v3876_v5  ;;  %3880 = vmax.xlane.f32.xlu1 %v3879_v33 }
 0x708   : > { %v3864_v12 = vadd.f32 %v8635_v26, %v3856_v61  ;;  %v8675_v40 = vpop.permute.xlu0 %4565 }
 0x709   : > { %v3847_v19 = vpop.f32.mrb[44].mxu0  ;;  %v3885_v20 = vsel %vm559_vm2, %v8648_v11, -inf }
 0x70a   : > { %v3858_v24 = vmul.f32 0.35355338, %v3847_v19  ;;  %v7305_v25 = vpop.f32.mrb[45].mxu0  ;;  %v3882_v28 = vsel %vm559_vm2, %v3864_v12, -inf  ;;  %v8673_v39 = vpop.permute.xlu1 %4487 }
 0x70b   : > { %3883 = vmax.xlane.f32.xlu0 %v3882_v28  ;;  %3886 = vmax.xlane.f32.xlu1 %v3885_v20 }
 0x70c   : > { %v8655_v29 = vadd.f32 %v8635_v26, %v3858_v24  ;;  %v8679_v42 = vpop.permute.xlu0 %4563 }
 0x70e   : > { %v3888_v30 = vsel %vm559_vm2, %v8655_v29, -inf  ;;  %v8677_v41 = vpop.permute.xlu1 %4643 }
 0x70f   : > { %3889 = vmax.xlane.f32.xlu0 %v3888_v30 }
 0x712   : > { %v8681_v44 = vpop.permute.xlu1 %4641 }
 0x71c   : > { %4799 = vrot.lane.b32.xlu1 %v8112_v14, %s7903_s28 }
 0x725   : > { %4721 = vrot.lane.b32.xlu0 %v8107_v9, %s7903_s28 }
 0x78b   : > { %v3869_v43 = vpop.xlane.xlu0 %3868 }
 0x78c   : > { %v3891_v45 = vsub.f32 %v3859_v27, %v3869_v43 }
 0x78e   : > { %v3899_v48 = vmul.f32 1.442695, %v3891_v45 }
 0x78f   : > { %v3875_v49 = vpop.xlane.xlu0 %3874 }
 0x790   : > { %7679 = vpow2.f32 %v3899_v48  ;;  %v3872_v50 = vpop.xlane.xlu1 %3871  ;;  %v3893_v52 = vsub.f32 %v3861_v36, %v3875_v49 }
 0x791   : > { %v3892_v33 = vsub.f32 %v3860_v37, %v3872_v50 }
 0x792   : > { %v3903_v61 = vmul.f32 1.442695, %v3893_v52 }
 0x793   : > { %v3901_v3 = vmul.f32 1.442695, %v3892_v33 }
 0x794   : > { %7681 = vpow2.f32 %v3903_v61  ;;  %v3881_v5 = vpop.xlane.xlu1 %3880  ;;  %v3878_v19 = vpop.xlane.xlu0 %3877 }
 0x795   : > { %7683 = vpow2.f32 %v3901_v3  ;;  %v3895_v20 = vsub.f32 %v3863_v46, %v3881_v5  ;;  %v3894_v24 = vsub.f32 %v3862_v47, %v3878_v19 }
 0x797   : > { %v3907_v25 = vmul.f32 1.442695, %v3895_v20  ;;  %v3905_v28 = vmul.f32 1.442695, %v3894_v24 }
 0x798   : > { %v3884_v30 = vpop.xlane.xlu0 %3883  ;;  %v3887_v33 = vpop.xlane.xlu1 %3886 }
 0x799   : > { %7685 = vpow2.f32 %v3907_v25  ;;  %v3896_v62 = vsub.f32 %v3864_v12, %v3884_v30  ;;  %v3897_v61 = vsub.f32 %v8648_v11, %v3887_v33 }
 0x79a   : > { %v7680_v27 = vpop.eup %7679  ;;  %7687 = vpow2.f32 %v3905_v28 }
 0x79b   : > { %v3909_v43 = vmul.f32 1.442695, %v3896_v62  ;;  %v3915_v45 = vsel %vm559_vm2, %v7680_v27, 0.0  ;;  %v3911_v5 = vmul.f32 1.442695, %v3897_v61 }
 0x79c   : > { %3916 = vadd.xlane.f32.xlu1 %v3915_v45  ;;  %v3890_v3 = vpop.xlane.xlu0 %3889  ;;  %v8728_v11 = vpop.permute.xlu1 %4799 }
 0x79d   : > { %7689 = vpow2.f32 %v3909_v43  ;;  %v3898_v19 = vsub.f32 %v8655_v29, %v3890_v3 }
 0x79e   : > { %v7682_v36 = vpop.eup %7681  ;;  %7691 = vpow2.f32 %v3911_v5 }
 0x79f   : > { %v7684_v37 = vpop.eup %7683  ;;  %v3921_v48 = vsel %vm559_vm2, %v7682_v36, 0.0  ;;  %v3913_v20 = vmul.f32 1.442695, %v3898_v19 }
 0x7a0   : > { %v3918_v49 = vsel %vm559_vm2, %v7684_v37, 0.0  ;;  %3922 = vadd.xlane.f32.xlu1 %v3921_v48  ;;  %v8730_v43 = vpop.permute.xlu0 %4721 }
 0x7a1   : > { %3919 = vadd.xlane.f32.xlu0 %v3918_v49  ;;  %7693 = vpow2.f32 %v3913_v20 }
 0x7a3   : > { %v8686_v46 = vpop.eup %7685 }
 0x7a4   : > { %v8688_v47 = vpop.eup %7687  ;;  %v3927_v12 = vsel %vm559_vm2, %v8686_v46, 0.0 }
 0x7a5   : > { %3928 = vadd.xlane.f32.xlu1 %v3927_v12  ;;  %v3924_v62 = vsel %vm559_vm2, %v8688_v47, 0.0 }
 0x7a6   : > { %3925 = vadd.xlane.f32.xlu0 %v3924_v62 }
 0x7a7   : > { %v8694_v50 = vpop.eup %7689 }
 0x7a8   : > { %v3930_v52 = vsel %vm559_vm2, %v8694_v50, 0.0  ;;  %v8704_v24 = vpop.eup %7691 }
 0x7a9   : > { %v3933_v25 = vsel %vm559_vm2, %v8704_v24, 0.0 }
 0x7aa   : > { %3931 = vadd.xlane.f32.xlu0 %v3930_v52 }
 0x7ab   : > { %v8708_v28 = vpop.eup %7693 }
 0x7ac   : > { %v3936_v30 = vsel %vm559_vm2, %v8708_v28, 0.0 }
 0x7b6   : > { %4797 = vrot.lane.b32.xlu1 %v8112_v14, %s7904_s20 }
 0x7c0   : > { %4719 = vrot.lane.b32.xlu0 %v8107_v9, %s7904_s20 }
 0x7da   : > { %3934 = vadd.xlane.f32.xlu1 %v3933_v25 }
 0x7df   : > { %3937 = vadd.xlane.f32.xlu0 %v3936_v30 }
 0x7eb   : > { %4955 = vrot.lane.b32.xlu1 %v8121_v21, %s7903_s28 }
 0x7ef   : > { %4953 = vrot.lane.b32.xlu1 %v8121_v21, %s7904_s20 }
 0x7f3   : > { %5111 = vrot.lane.b32.xlu1 %v8125_v23, %s7903_s28 }
 0x7f5   : > { %4877 = vrot.lane.b32.xlu0 %v8118_v18, %s7903_s28 }
 0x7f7   : > { %5109 = vrot.lane.b32.xlu1 %v8125_v23, %s7904_s20 }
 0x7f9   : > { %4875 = vrot.lane.b32.xlu0 %v8118_v18, %s7904_s20 }
 0x7fd   : > { %5033 = vrot.lane.b32.xlu0 %v8123_v22, %s7903_s28  ;;  %s7908_s28 = smov 24  }
 0x801   : > { %5031 = vrot.lane.b32.xlu0 %v8123_v22, %s7904_s20  ;;  %s6798_s20 = sshll.u32 %s8080_s26, 3 }
 0x802   : > { %s431_s17 = scalar_lea.vmem [#allocation5], %s6798_s20 }
 0x829   : > { %v3917_v29 = vpop.xlane.xlu1 %3916 }
 0x82a   : > { %7695 = vrcp.f32 %v3917_v29 }
 0x82d   : > { %v3923_v45 = vpop.xlane.xlu1 %3922 }
 0x82e   : > { %7697 = vrcp.f32 %v3923_v45  ;;  %v3920_v48 = vpop.xlane.xlu0 %3919 }
 0x82f   : > { %7699 = vrcp.f32 %v3920_v48 }
 0x832   : > { %v3929_v49 = vpop.xlane.xlu1 %3928 }
 0x833   : > { %7701 = vrcp.f32 %v3929_v49  ;;  %v3926_v12 = vpop.xlane.xlu0 %3925 }
 0x834   : > { %v7696_v62 = vpop.eup %7695  ;;  %7703 = vrcp.f32 %v3926_v12 }
 0x835   : > { %v3947_v52 = vmul.f32 %v7696_v62, %v7680_v27 }
 0x837   : > { %v3932_v33 = vpop.xlane.xlu0 %3931  ;;  %7309 = vmatmul.mubr.msk.f32.vlgmr.msra.gmra.mrb[42].mxu1 %vm559_vm2, %v3947_v52 }
 0x838   : > { %v7698_v61 = vpop.eup %7697  ;;  %7705 = vrcp.f32 %v3932_v33  ;;  %7317 = vmatpush3.msra.mxu1 %v8663_v31  ;;  %7318 = vmatprep.mubr.msk.f32.mxu1 %vm7894_vm1, %v7893_v6 }
 0x839   : > { %v7700_v3 = vpop.eup %7699  ;;  %v3949_v5 = vmul.f32 %v7698_v61, %v7682_v36  ;;  %7326 = vmatprep.subr.mxu1 %v7893_v6 }
 0x83a   : > { %v3948_v19 = vmul.f32 %v7700_v3, %v7684_v37 }
 0x83b   : > { %7319 = vmatmul.mubr.msk.f32.vlgmr.msra.gmra.mrb[44].mxu1 %vm559_vm2, %v3949_v5  ;;  %v4720_v37 = vpop.permute.xlu0 %4719 }
 0x83c   : > { %7314 = vmatmul.mubr.msk.f32.vlgmr.msra.gmra.mrb[46].mxu0 %vm559_vm2, %v3948_v19  ;;  %7327 = vmatpush3.msra.mxu1 %v8667_v34 }
 0x83d   : > { %v7702_v27 = vpop.eup %7701  ;;  %7322 = vmatpush3.msra.mxu0 %v8665_v32  ;;  %7323 = vmatprep.mubr.msk.f32.mxu0 %vm7894_vm1, %v7893_v6 }
 0x83e   : > { %v7704_v31 = vpop.eup %7703  ;;  %v3951_v20 = vmul.f32 %v7702_v27, %v8686_v46  ;;  %7328 = vmatprep.mubr.msk.f32.mxu1 %vm7894_vm1, %v7893_v6  ;;  %7331 = vmatprep.subr.mxu0 %v7893_v6 }
 0x83f   : > { %v3950_v36 = vmul.f32 %v7704_v31, %v8688_v47  ;;  %7336 = vmatprep.subr.mxu1 %v7893_v6 }
 0x840   : > { %7329 = vmatmul.mubr.msk.f32.vlgmr.msra.gmra.mrb[46].mxu1 %vm559_vm2, %v3951_v20 }
 0x841   : > { %7324 = vmatmul.mubr.msk.f32.vlgmr.msra.gmra.mrb[48].mxu0 %vm559_vm2, %v3950_v36  ;;  %7337 = vmatpush3.msra.mxu1 %v8671_v38 }
 0x842   : > { %v7706_v32 = vpop.eup %7705  ;;  %7332 = vmatpush3.msra.mxu0 %v8669_v35  ;;  %7333 = vmatprep.mubr.msk.f32.mxu0 %vm7894_vm1, %v7893_v6  ;;  %v4798_v35 = vpop.permute.xlu1 %4797 }
 0x843   : > { %v3952_v34 = vmul.f32 %v7706_v32, %v8694_v50  ;;  %7341 = vmatprep.subr.mxu0 %v7893_v6  ;;  %7338 = vmatprep.mubr.msk.f32.mxu1 %vm7894_vm1, %v7893_v6 }
 0x844   : > { %7346 = vmatprep.subr.mxu1 %v7893_v6 }
 0x845   : > { %7334 = vmatmul.mubr.msk.f32.vlgmr.msra.gmra.mrb[50].mxu0 %vm559_vm2, %v3952_v34 }
 0x846   : > { %7342 = vmatpush3.msra.mxu0 %v8673_v39  ;;  %7343 = vmatprep.mubr.msk.f32.mxu0 %vm7894_vm1, %v7893_v6 }
 0x847   : > { %7351 = vmatprep.subr.mxu0 %v7893_v6 }
 0x867   : > { %v3935_v38 = vpop.xlane.xlu1 %3934 }
 0x868   : > { %7707 = vrcp.f32 %v3935_v38 }
 0x86b   : > { %v4956_v30 = vpop.permute.xlu1 %4955 }
 0x86c   : > { %v3938_v46 = vpop.xlane.xlu0 %3937 }
 0x86d   : > { %7709 = vrcp.f32 %v3938_v46 }
 0x870   : > { %v4878_v50 = vpop.permute.xlu0 %4877 }
 0x872   : > { %v7708_v47 = vpop.eup %7707 }
 0x873   : > { %v3953_v25 = vmul.f32 %v7708_v47, %v8704_v24 }
 0x874   : > { %v4876_v45 = vpop.permute.xlu0 %4875 }
 0x875   : > { %7339 = vmatmul.mubr.msk.f32.vlgmr.msra.gmra.mrb[48].mxu1 %vm559_vm2, %v3953_v25 }
 0x876   : > { %7347 = vmatpush3.xpose.msk.msra.mxu1 %vm559_vm2, %v8675_v40  ;;  %7348 = vmatprep.mubr.msk.f32.mxu1 %vm7894_vm1, %v7893_v6  ;;  %v4954_v40 = vpop.permute.xlu1 %4953 }
 0x877   : > { %v7710_v39 = vpop.eup %7709  ;;  %7356 = vmatprep.subr.mxu1 %v7893_v6 }
 0x878   : > { %v3954_v29 = vmul.f32 %v7710_v39, %v8708_v28 }
 0x879   : > { %7349 = vmatmul.mubr.msk.f32.vlgmr.msra.gmra.mrb[50].mxu1 %vm559_vm2, %v8679_v42  ;;  %v5034_v42 = vpop.permute.xlu0 %5033 }
 0x87a   : > { %7344 = vmatmul.mubr.msk.f32.vlgmr.msra.gmra.mrb[52].mxu0 %vm559_vm2, %v3954_v29  ;;  %7357 = vmatpush3.xpose.msk.msra.mxu1 %vm559_vm2, %v8730_v43 }
 0x87b   : > { %7352 = vmatpush3.xpose.msk.msra.mxu0 %vm559_vm2, %v8677_v41  ;;  %7353 = vmatprep.mubr.msk.f32.mxu0 %vm7894_vm1, %v7893_v6  ;;  %v5112_v41 = vpop.permute.xlu1 %5111 }
 0x87c   : > { %7358 = vmatprep.mubr.msk.f32.mxu1 %vm7894_vm1, %v7893_v6  ;;  %7361 = vmatprep.subr.mxu0 %v7893_v6 }
 0x87d   : > { %7366 = vmatprep.subr.mxu1 %v7893_v6  ;;  %7359 = vmatmul.mubr.msk.f32.vlgmr.msra.gmra.mrb[52].mxu1 %vm559_vm2, %v4720_v37 }
 0x87e   : > { %7354 = vmatmul.mubr.msk.f32.vlgmr.msra.gmra.mrb[54].mxu0 %vm559_vm2, %v8681_v44  ;;  %7367 = vmatpush3.xpose.msk.msra.mxu1 %vm559_vm2, %v4878_v50  ;;  %v5032_v44 = vpop.permute.xlu0 %5031 }
 0x87f   : > { %7362 = vmatpush3.xpose.msk.msra.mxu0 %vm559_vm2, %v8728_v11  ;;  %7363 = vmatprep.mubr.msk.f32.mxu0 %vm7894_vm1, %v7893_v6  ;;  %v5110_v24 = vpop.permute.xlu1 %5109 }
 0x880   : > { %7368 = vmatprep.mubr.msk.f32.mxu1 %vm7894_vm1, %v7893_v6  ;;  %7371 = vmatprep.subr.mxu0 %v7893_v6 }
 0x881   : > { %7376 = vmatprep.subr.mxu1 %v7893_v6  ;;  %7369 = vmatmul.mubr.msk.f32.vlgmr.msra.gmra.mrb[54].mxu1 %vm559_vm2, %v4876_v45 }
 0x882   : > { %7364 = vmatmul.mubr.msk.f32.vlgmr.msra.gmra.mrb[56].mxu0 %vm559_vm2, %v4798_v35  ;;  %7377 = vmatpush3.xpose.msk.msra.mxu1 %vm559_vm2, %v5034_v42 }
 0x883   : > { %7372 = vmatpush3.xpose.msk.msra.mxu0 %vm559_vm2, %v4956_v30  ;;  %7373 = vmatprep.mubr.msk.f32.mxu0 %vm7894_vm1, %v7893_v6 }
 0x884   : > { %7378 = vmatprep.mubr.msk.f32.mxu1 %vm7894_vm1, %v7893_v6  ;;  %7381 = vmatprep.subr.mxu0 %v7893_v6 }
 0x885   : > { %7379 = vmatmul.mubr.msk.f32.vlgmr.msra.gmra.mrb[56].mxu1 %vm559_vm2, %v5032_v44  ;;  %7386 = vmatprep.subr.mxu1 %v7893_v6 }
 0x886   : > { %7374 = vmatmul.mubr.msk.f32.vlgmr.msra.gmra.mrb[58].mxu0 %vm559_vm2, %v4954_v40  ;;  %7388 = vmatprep.mubr.msk.f32.mxu1 %vm7894_vm1, %v7893_v6 }
 0x887   : > { %7382 = vmatpush3.xpose.msk.msra.mxu0 %vm559_vm2, %v5112_v41  ;;  %7383 = vmatprep.mubr.msk.f32.mxu0 %vm7894_vm1, %v7893_v6 }
 0x888   : > { %7391 = vmatprep.subr.mxu0 %v7893_v6 }
 0x88a   : > { %7384 = vmatmul.mubr.msk.f32.vlgmr.msra.gmra.mrb[60].mxu0 %vm559_vm2, %v5110_v24 }
 0x88b   : > { %7393 = vmatprep.mubr.msk.f32.mxu0 %vm7894_vm1, %v7893_v6 }
 0x90a   : > { %v8819_v28 = vpop.f32.mrb[42].mxu1 }
 0x90b   : > { %v7310_v11 = vpop.f32.mrb[43].mxu1 }
 0x90e   : > { %v8821_v43 = vpop.f32.mrb[44].mxu1 }
 0x90f   : > { %v8823_v48 = vpop.f32.mrb[46].mxu0  ;;  %v7320_v49 = vpop.f32.mrb[45].mxu1 }
 0x910   : > { %v7553_v12 = vpack.i.bf16 %v8823_v48, %v8819_v28  ;;  %v7315_v62 = vpop.f32.mrb[47].mxu0 }
 0x913   : > { %v8827_v52 = vpop.f32.mrb[46].mxu1 }
 0x914   : > { %v8829_v33 = vpop.f32.mrb[48].mxu0  ;;  %v7330_v61 = vpop.f32.mrb[47].mxu1 }
 0x915   : > { %v7558_v3 = vpack.i.bf16 %v8829_v33, %v8821_v43  ;;  %v7325_v5 = vpop.f32.mrb[49].mxu0 }
 0x918   : > { %v8833_v19 = vpop.f32.mrb[50].mxu0 }
 0x919   : > { %v7578_v27 = vpack.i.bf16 %v8833_v19, %v8827_v52  ;;  %v7335_v31 = vpop.f32.mrb[51].mxu0 }
 0x948   : > { %v8837_v20 = vpop.f32.mrb[48].mxu1 }
 0x949   : > { %v7340_v36 = vpop.f32.mrb[49].mxu1 }
 0x94c   : > { %v4637_v32 = vpop.f32.mrb[50].mxu1 }
 0x94d   : > { %v8839_v34 = vpop.f32.mrb[52].mxu0  ;;  %v5187_v35 = vmul.f32 0.35355338, %v4637_v32  ;;  %v7350_v38 = vpop.f32.mrb[51].mxu1 }
 0x94e   : > { %v7588_v37 = vpack.i.bf16 %v8839_v34, %v8837_v20  ;;  %v7345_v46 = vpop.f32.mrb[53].mxu0 }
 0x94f   : > { %v5195_v47 = vadd.f32 %v8635_v26, %v5187_v35 }
 0x950   : > { %v4793_v50 = vpop.f32.mrb[52].mxu1 }
 0x951   : > { %v4715_v25 = vpop.f32.mrb[54].mxu0  ;;  %v5189_v39 = vmul.f32 0.35355338, %v4793_v50  ;;  %v7360_v30 = vpop.f32.mrb[53].mxu1  ;;  %v5203_v29 = vsel %vm559_vm2, %v5195_v47, -inf }
 0x952   : > { %v5188_v45 = vmul.f32 0.35355338, %v4715_v25  ;;  %v7355_v40 = vpop.f32.mrb[55].mxu0  ;;  %5204 = vmax.xlane.f32.xlu0 %v5203_v29 }
 0x953   : > { %v5197_v42 = vadd.f32 %v8635_v26, %v5189_v39 }
 0x954   : > { %v5196_v41 = vadd.f32 %v8635_v26, %v5188_v45  ;;  %v4949_v44 = vpop.f32.mrb[54].mxu1 }
 0x955   : > { %v4871_v24 = vpop.f32.mrb[56].mxu0  ;;  %v5191_v11 = vmul.f32 0.35355338, %v4949_v44  ;;  %v7370_v49 = vpop.f32.mrb[55].mxu1  ;;  %v5209_v62 = vsel %vm559_vm2, %v5197_v42, -inf }
 0x956   : > { %v5190_v61 = vmul.f32 0.35355338, %v4871_v24  ;;  %v7365_v5 = vpop.f32.mrb[57].mxu0  ;;  %5210 = vmax.xlane.f32.xlu0 %v5209_v62  ;;  %v5206_v31 = vsel %vm559_vm2, %v5196_v41, -inf }
 0x957   : > { %v5199_v36 = vadd.f32 %v8635_v26, %v5191_v11  ;;  %5207 = vmax.xlane.f32.xlu1 %v5206_v31 }
 0x958   : > { %v5198_v32 = vadd.f32 %v8635_v26, %v5190_v61  ;;  %v5105_v35 = vpop.f32.mrb[56].mxu1 }
 0x959   : > { %v5027_v38 = vpop.f32.mrb[58].mxu0  ;;  %v5193_v46 = vmul.f32 0.35355338, %v5105_v35  ;;  %v7380_v50 = vpop.f32.mrb[57].mxu1  ;;  %v5215_v25 = vsel %vm559_vm2, %v5199_v36, -inf }
 0x95a   : > { %v5192_v39 = vmul.f32 0.35355338, %v5027_v38  ;;  %v7375_v30 = vpop.f32.mrb[59].mxu0  ;;  %v5212_v29 = vsel %vm559_vm2, %v5198_v32, -inf }
 0x95b   : > { %v5201_v45 = vadd.f32 %v8635_v26, %v5193_v46  ;;  %5213 = vmax.xlane.f32.xlu0 %v5212_v29  ;;  %5216 = vmax.xlane.f32.xlu1 %v5215_v25 }
 0x95c   : > { %v5200_v40 = vadd.f32 %v8635_v26, %v5192_v39 }
 0x95d   : > { %v5183_v44 = vpop.f32.mrb[60].mxu0  ;;  %v5221_v24 = vsel %vm559_vm2, %v5201_v45, -inf }
 0x95e   : > { %v5194_v11 = vmul.f32 0.35355338, %v5183_v44  ;;  %v7385_v49 = vpop.f32.mrb[61].mxu0  ;;  %v5218_v62 = vsel %vm559_vm2, %v5200_v40, -inf }
 0x95f   : > { %5219 = vmax.xlane.f32.xlu0 %v5218_v62  ;;  %5222 = vmax.xlane.f32.xlu1 %v5221_v24 }
 0x960   : > { %v5202_v61 = vadd.f32 %v8635_v26, %v5194_v11 }
 0x962   : > { %v5224_v5 = vsel %vm559_vm2, %v5202_v61, -inf }
 0x963   : > { %5225 = vmax.xlane.f32.xlu0 %v5224_v5 }
 0x970   : > { %5291 = vrot.lane.b32.xlu1 %v8116_v15, %s7905_s18 }
 0x974   : > { %5443 = vrot.lane.b32.xlu1 %v8107_v9, %s7905_s18 }
 0x978   : > { %5519 = vrot.lane.b32.xlu1 %v8112_v14, %s7905_s18 }
 0x979   : > { %5367 = vrot.lane.b32.xlu0 %v8110_v13, %s7905_s18 }
 0x97c   : > { %5671 = vrot.lane.b32.xlu1 %v8121_v21, %s7905_s18 }
 0x97d   : > { %5595 = vrot.lane.b32.xlu0 %v8118_v18, %s7905_s18 }
 0x9df   : > { %v5205_v26 = vpop.xlane.xlu0 %5204 }
 0x9e0   : > { %v5227_v31 = vsub.f32 %v5195_v47, %v5205_v26 }
 0x9e2   : > { %v5235_v35 = vmul.f32 1.442695, %v5227_v31 }
 0x9e3   : > { %v5211_v38 = vpop.xlane.xlu0 %5210 }
 0x9e4   : > { %7711 = vpow2.f32 %v5235_v35  ;;  %v5208_v15 = vpop.xlane.xlu1 %5207  ;;  %v5229_v46 = vsub.f32 %v5197_v42, %v5211_v38 }
 0x9e5   : > { %v5228_v9 = vsub.f32 %v5196_v41, %v5208_v15 }
 0x9e6   : > { %v5239_v50 = vmul.f32 1.442695, %v5229_v46 }
 0x9e7   : > { %v5237_v25 = vmul.f32 1.442695, %v5228_v9 }
 0x9e8   : > { %7713 = vpow2.f32 %v5239_v50  ;;  %v5217_v14 = vpop.xlane.xlu1 %5216  ;;  %v5214_v39 = vpop.xlane.xlu0 %5213 }
 0x9e9   : > { %7715 = vpow2.f32 %v5237_v25  ;;  %v5231_v13 = vsub.f32 %v5199_v36, %v5217_v14  ;;  %v5230_v30 = vsub.f32 %v5198_v32, %v5214_v39 }
 0x9eb   : > { %v5243_v21 = vmul.f32 1.442695, %v5231_v13  ;;  %v5241_v29 = vmul.f32 1.442695, %v5230_v30 }
 0x9ec   : > { %v5223_v44 = vpop.xlane.xlu1 %5222  ;;  %v5220_v18 = vpop.xlane.xlu0 %5219 }
 0x9ed   : > { %7717 = vpow2.f32 %v5243_v21  ;;  %v5233_v47 = vsub.f32 %v5201_v45, %v5223_v44  ;;  %v5232_v24 = vsub.f32 %v5200_v40, %v5220_v18 }
 0x9ee   : > { %v8871_v11 = vpop.eup %7711  ;;  %7719 = vpow2.f32 %v5241_v29 }
 0x9ef   : > { %v5247_v42 = vmul.f32 1.442695, %v5233_v47  ;;  %v5245_v41 = vmul.f32 1.442695, %v5232_v24  ;;  %v5251_v49 = vsel %vm559_vm2, %v8871_v11, 0.0 }
 0x9f0   : > { %v5292_v62 = vpop.permute.xlu1 %5291  ;;  %v5226_v5 = vpop.xlane.xlu0 %5225  ;;  %5252 = vadd.xlane.f32.xlu1 %v5251_v49 }
 0x9f1   : > { %7721 = vpow2.f32 %v5247_v42  ;;  %v5234_v36 = vsub.f32 %v5202_v61, %v5226_v5  ;;  %7387 = vmatpush3.msra.mxu1 %v5292_v62  ;;  %v7611_v5 = vld [vmem:[%s9183_s5] sm:$0xff]  }
 0x9f2   : > { %v8875_v32 = vpop.eup %7713  ;;  %7723 = vpow2.f32 %v5245_v41  ;;  %7396 = vmatprep.subr.mxu1 %v7893_v6 }
 0x9f3   : > { %v7716_v45 = vpop.eup %7715  ;;  %v5249_v40 = vmul.f32 1.442695, %v5234_v36  ;;  %v5257_v26 = vsel %vm559_vm2, %v8875_v32, 0.0 }
 0x9f4   : > { %v5368_v31 = vpop.permute.xlu0 %5367  ;;  %v5254_v35 = vsel %vm559_vm2, %v7716_v45, 0.0  ;;  %5258 = vadd.xlane.f32.xlu1 %v5257_v26  ;;  %v5444_v58 = vpop.permute.xlu1 %5443 }
 0x9f5   : > { %7725 = vpow2.f32 %v5249_v40  ;;  %5255 = vadd.xlane.f32.xlu0 %v5254_v35  ;;  %7392 = vmatpush3.msra.mxu0 %v5368_v31 }
 0x9f6   : > { %7401 = vmatprep.subr.mxu0 %v7893_v6 }
 0x9f7   : > { %v7718_v61 = vpop.eup %7717 }
 0x9f8   : > { %v8882_v38 = vpop.eup %7719  ;;  %v5263_v15 = vsel %vm559_vm2, %v7718_v61, 0.0  ;;  %v5520_v2 = vpop.permute.xlu1 %5519 }
 0x9f9   : > { %5264 = vadd.xlane.f32.xlu1 %v5263_v15  ;;  %v5260_v46 = vsel %vm559_vm2, %v8882_v38, 0.0  ;;  %v5596_v43 = vpop.permute.xlu0 %5595 }
 0x9fa   : > { %5261 = vadd.xlane.f32.xlu0 %v5260_v46 }
 0x9fb   : > { %v8887_v9 = vpop.eup %7721 }
 0x9fc   : > { %v8889_v50 = vpop.eup %7723  ;;  %v5269_v25 = vsel %vm559_vm2, %v8887_v9, 0.0 }
 0x9fd   : > { %5270 = vadd.xlane.f32.xlu1 %v5269_v25  ;;  %v5266_v14 = vsel %vm559_vm2, %v8889_v50, 0.0 }
 0x9fe   : > { %5267 = vadd.xlane.f32.xlu0 %v5266_v14 }
 0x9ff   : > { %v8895_v39 = vpop.eup %7725 }
 0xa00   : > { %v5272_v13 = vsel %vm559_vm2, %v8895_v39, 0.0 }
 0xa02   : > { %5273 = vadd.xlane.f32.xlu0 %v5272_v13 }
 0xa0e   : > { %5823 = vrot.lane.b32.xlu1 %v8125_v23, %s7905_s18  ;;  %v9203_v23 = vpack.i.bf16 %v8624_v10, %v8616_v0 }
 0xa12   : > { %7549 = vrot.lane.b32.xlu1 %v7548_v4, %s7906_s13 }
 0xa16   : > { %7559 = vrot.lane.b32.xlu1 %v7558_v3, %s7907_s27 }
 0xa18   : > { %5747 = vrot.lane.b32.xlu0 %v8123_v22, %s7905_s18  ;;  %v5672_v22 = vpop.permute.xlu1 %5671  ;;  %s6720_s18 = sshll.u32 %s431_s17, 4  ;;  %s9135_s18 = int_to_ptr.vmem [resolvable:$true] %s6720_s18 }
 0xa19   : > { %s7822_s30 = scalar_lea.vmem %s9135_s18, 128  ;;  %p7829_p8 = scmp.lt.s32.totalorder %s9135_s18, %s7827_s14 }
 0xa1a   : > { %7569 = vrot.lane.b32.xlu1 %v7568_v7, %s7906_s13  ;;  %p7823_p6 = scmp.ne.s32.totalorder %s9135_s18, %s7822_s30 }
 0xa1c   : > { %7544 = vrot.lane.b32.xlu0 %v7543_v56, %s7906_s13  ;;  %p7824_p12 = pnand %p7823_p6, %p9204_p11 }
 0xa1e   : > { %p7825_p13 = pneg %p7824_p12 }
 0xa20   : > { %7554 = vrot.lane.b32.xlu0 %v7553_v12, %s7907_s27 }
 0xa24   : > { %7564 = vrot.lane.b32.xlu0 %v9203_v23, %s7906_s13 }
 0xa7d   : > { %v5253_v4 = vpop.xlane.xlu1 %5252 }
 0xa7e   : > { %7727 = vrcp.f32 %v5253_v4 }
 0xa81   : > { %v5259_v8 = vpop.xlane.xlu1 %5258 }
 0xa82   : > { %7729 = vrcp.f32 %v5259_v8  ;;  %v5256_v16 = vpop.xlane.xlu0 %5255 }
 0xa83   : > { %7731 = vrcp.f32 %v5256_v16 }
 0xa86   : > { %v5265_v51 = vpop.xlane.xlu1 %5264 }
 0xa87   : > { %7733 = vrcp.f32 %v5265_v51  ;;  %v5262_v54 = vpop.xlane.xlu0 %5261 }
 0xa88   : > { %v7728_v56 = vpop.eup %7727  ;;  %7735 = vrcp.f32 %v5262_v54 }
 0xa89   : > { %v5283_v7 = vmul.f32 %v7728_v56, %v8871_v11 }
 0xa8a   : > { %v5271_v28 = vpop.xlane.xlu1 %5270 }
 0xa8b   : > { %7737 = vrcp.f32 %v5271_v28  ;;  %v5268_v0 = vpop.xlane.xlu0 %5267  ;;  %7389 = vmatmul.mubr.msk.f32.vlgmr.msra.gmra.mrb[58].mxu1 %vm559_vm2, %v5283_v7 }
 0xa8c   : > { %v7730_v10 = vpop.eup %7729  ;;  %7739 = vrcp.f32 %v5268_v0  ;;  %7397 = vmatpush3.msra.mxu1 %v5444_v58  ;;  %7398 = vmatprep.mubr.msk.f32.mxu1 %vm7894_vm1, %v7893_v6 }
 0xa8d   : > { %v7732_v48 = vpop.eup %7731  ;;  %v5285_v12 = vmul.f32 %v7730_v10, %v8875_v32  ;;  %7406 = vmatprep.subr.mxu1 %v7893_v6  ;;  %v7612_v32 = vld [vmem:[%s9183_s5 + $0x8] sm:$0xff]  }
 0xa8e   : > { %v5284_v33 = vmul.f32 %v7732_v48, %v7716_v45  ;;  %v5824_v41 = vpop.permute.xlu1 %5823 }
 0xa8f   : > { %v5274_v3 = vpop.xlane.xlu0 %5273  ;;  %7399 = vmatmul.mubr.msk.f32.vlgmr.msra.gmra.mrb[60].mxu1 %vm559_vm2, %v5285_v12 }
 0xa90   : > { %7741 = vrcp.f32 %v5274_v3  ;;  %7394 = vmatmul.mubr.msk.f32.vlgmr.msra.gmra.mrb[62].mxu0 %vm559_vm2, %v5284_v33  ;;  %7407 = vmatpush3.msra.mxu1 %v5596_v43 }
 0xa91   : > { %v7734_v30 = vpop.eup %7733  ;;  %7402 = vmatpush3.msra.mxu0 %v5520_v2  ;;  %7403 = vmatprep.mubr.msk.f32.mxu0 %vm7894_vm1, %v7893_v6 }
 0xa92   : > { %v7736_v21 = vpop.eup %7735  ;;  %v5287_v29 = vmul.f32 %v7734_v30, %v7718_v61  ;;  %7408 = vmatprep.mubr.msk.f32.mxu1 %vm7894_vm1, %v7893_v6  ;;  %7411 = vmatprep.subr.mxu0 %v7893_v6  ;;  %v7550_v4 = vpop.permute.xlu1 %7549 }
 0xa93   : > { %v5286_v44 = vmul.f32 %v7736_v21, %v8882_v38  ;;  %v5748_v18 = vpop.permute.xlu0 %5747  ;;  %7416 = vmatprep.subr.mxu1 %v7893_v6  ;;  %v7552_v54 = vunpack.i.h.bf16 %v7550_v4  ;;  %v7551_v56 = vunpack.i.l.bf16 %v7550_v4 }
 0xa94   : > { %7409 = vmatmul.mubr.msk.f32.vlgmr.msra.gmra.mrb[62].mxu1 %vm559_vm2, %v5287_v29 }
 0xa95   : > { %v7738_v47 = vpop.eup %7737  ;;  %7404 = vmatmul.mubr.msk.f32.vlgmr.msra.gmra.mrb[64].mxu0 %vm559_vm2, %v5286_v44  ;;  %7417 = vmatpush3.msra.mxu1 %v5748_v18 }
 0xa96   : > { %v7740_v24 = vpop.eup %7739  ;;  %v5289_v11 = vmul.f32 %v7738_v47, %v8887_v9  ;;  %7412 = vmatpush3.msra.mxu0 %v5672_v22  ;;  %7413 = vmatprep.mubr.msk.f32.mxu0 %vm7894_vm1, %v7893_v6  ;;  %v7560_v19 = vpop.permute.xlu1 %7559 }
 0xa97   : > { %v5288_v42 = vmul.f32 %v7740_v24, %v8889_v50  ;;  %7418 = vmatprep.mubr.msk.f32.mxu1 %vm7894_vm1, %v7893_v6  ;;  %7421 = vmatprep.subr.mxu0 %v7893_v6  ;;  %v7545_v22 = vpop.permute.xlu0 %7544  ;;  %v7562_v12 = vunpack.i.h.bf16 %v7560_v19  ;;  %v7561_v33 = vunpack.i.l.bf16 %v7560_v19  ;;  %v6230_v19 = vld [vmem:[%s9187_s9 + $0x8] sm:$0xff] }
 0xa98   : > { %7419 = vmatmul.mubr.msk.f32.vlgmr.msra.gmra.mrb[64].mxu1 %vm559_vm2, %v5289_v11  ;;  %7426 = vmatprep.subr.bf16.mxu1 %v7611_v5  ;;  %v7547_v43 = vunpack.i.h.bf16 %v7545_v22  ;;  %v7546_v8 = vunpack.i.l.bf16 %v7545_v22 }
 0xa99   : > { %7414 = vmatmul.mubr.msk.f32.vlgmr.msra.gmra.mrb[66].mxu0 %vm559_vm2, %v5288_v42  ;;  %7427 = vmatpush3.bf16.msra.mxu1 %v7611_v5 }
 0xa9a   : > { %v7742_v49 = vpop.eup %7741  ;;  %7422 = vmatpush3.msra.mxu0 %v5824_v41  ;;  %7423 = vmatprep.mubr.msk.f32.mxu0 %vm7894_vm1, %v7893_v6  ;;  %v5996_v34 = vsel %vm559_vm2, %v8381_v53, %v7547_v43  ;;  %v7570_v7 = vpop.permute.xlu1 %7569  ;;  %v5998_v53 = vsel %vm559_vm2, %v8389_v60, %v7552_v54  ;;  %v6907_v54 = vld [vmem:[%s9184_s6] ss:$0 sm:$0xff] }
 0xa9b   : > { %v5290_v62 = vmul.f32 %v7742_v49, %v8895_v39  ;;  %7428 = vmatprep.subr.bf16.mxu1 %v7612_v32  ;;  %v7555_v52 = vpop.permute.xlu0 %7554  ;;  %v6007_v41 = vsel %vm6003_vm3, %v5998_v53, %v7562_v12 }
 0xa9c   : > { %v7557_v16 = vunpack.i.h.bf16 %v7555_v52  ;;  %v7556_v51 = vunpack.i.l.bf16 %v7555_v52  ;;  %v6229_v52 = vld [vmem:[%s9187_s9] sm:$0xff] }
 0xa9d   : > { %7424 = vmatmul.mubr.msk.f32.vlgmr.msra.gmra.mrb[68].mxu0 %vm559_vm2, %v5290_v62  ;;  %7429 = vmatpush3.bf16.msra.mxu1 %v7612_v32  ;;  %v7571_v32 = vunpack.i.l.bf16 %v7570_v7  ;;  %v7470_v43 = vpack.c.bf16 %v6230_v19, %v6229_v52 }
 0xa9e   : > { %v6005_v48 = vsel %vm6003_vm3, %v5996_v34, %v7557_v16 }
 0xa9f   : > { %7471 = vmatprep.subr.bf16.mxu1 %v7470_v43 }
 0xb5e   : > { %v5363_v36 = vpop.f32.mrb[58].mxu1 }
 0xb5f   : > { %v7390_v45 = vpop.f32.mrb[59].mxu1 }
 0xb62   : > { %v5515_v40 = vpop.f32.mrb[60].mxu1 }
 0xb63   : > { %v5439_v6 = vpop.f32.mrb[62].mxu0  ;;  %v7400_v26 = vpop.f32.mrb[61].mxu1 }
 0xb64   : > { %v7573_v31 = vpack.i.bf16 %v5439_v6, %v5363_v36  ;;  %v7395_v35 = vpop.f32.mrb[63].mxu0  ;;  %v7572_v36 = vunpack.i.h.bf16 %v7570_v7 }
 0xb66   : > { %7574 = vrot.lane.b32.xlu0 %v7573_v31, %s7908_s28 }
 0xb67   : > { %v5667_v61 = vpop.f32.mrb[62].mxu1 }
 0xb68   : > { %v5591_v38 = vpop.f32.mrb[64].mxu0  ;;  %v7410_v15 = vpop.f32.mrb[63].mxu1 }
 0xb69   : > { %v7583_v46 = vpack.i.bf16 %v5591_v38, %v5515_v40  ;;  %v7405_v9 = vpop.f32.mrb[65].mxu0 }
 0xb6a   : > { %7579 = vrot.lane.b32.xlu0 %v7578_v27, %s7907_s27  ;;  %v7565_v27 = vpop.permute.xlu0 %7564 }
 0xb6b   : > { %7584 = vrot.lane.b32.xlu1 %v7583_v46, %s7908_s28  ;;  %v5819_v50 = vpop.f32.mrb[64].mxu1  ;;  %v7567_v18 = vunpack.i.h.bf16 %v7565_v27  ;;  %v7566_v47 = vunpack.i.l.bf16 %v7565_v27  ;;  %v6231_v27 = vld [vmem:[%s9187_s9 + $0x10] sm:$0xff] }
 0xb6c   : > { %v5743_v25 = vpop.f32.mrb[66].mxu0  ;;  %v7420_v14 = vpop.f32.mrb[65].mxu1 }
 0xb6d   : > { %v7593_v39 = vpack.i.bf16 %v5743_v25, %v5667_v61  ;;  %v7415_v13 = vpop.f32.mrb[67].mxu0  ;;  %v6000_v6 = vsel %vm559_vm2, %v8391_v63, %v7567_v18  ;;  %v5999_v26 = vsel %vm559_vm2, %v8387_v59, %v7566_v47  ;;  %v6002_v63 = vsel %vm559_vm2, %v8393_v1, %v7572_v36  ;;  %v7613_v1 = vld [vmem:[%s9185_s7] sm:$0xff]  }
 0xb6e   : > { %v6001_v59 = vsel %vm559_vm2, %v8400_v17, %v7571_v32  ;;  %7438 = vmatprep.subr.bf16.mxu0 %v7613_v1  ;;  %v7614_v17 = vld [vmem:[%s9185_s7 + $0x8] sm:$0xff]   ;;  %v6914_v47 = vld [vmem:[%s9186_s8] ss:$0 sm:$0xff] }
 0xb6f   : > { %7589 = vrot.lane.b32.xlu1 %v7588_v37, %s7907_s27  ;;  %7594 = vrot.lane.b32.xlu0 %v7593_v39, %s7908_s28  ;;  %v5995_v37 = vsel %vm559_vm2, %v8383_v55, %v7546_v8  ;;  %v5997_v55 = vsel %vm559_vm2, %v8385_v57, %v7551_v56  ;;  %v6232_v8 = vld [vmem:[%s9187_s9 + $0x18] sm:$0xff] }
 0xb70   : > { %v5895_v23 = vpop.f32.mrb[68].mxu0  ;;  %v6004_v10 = vsel %vm6003_vm3, %v5995_v37, %v7556_v51  ;;  %v6006_v42 = vsel %vm6003_vm3, %v5997_v55, %v7561_v33  ;;  %7439 = vmatpush3.bf16.msra.mxu0 %v7613_v1  ;;  %v7474_v16 = vpack.c.bf16 %v6232_v8, %v6231_v27 }
 0xb71   : > { %v7598_v58 = vpack.i.bf16 %v5895_v23, %v5819_v50  ;;  %v7425_v2 = vpop.f32.mrb[69].mxu0  ;;  %7440 = vmatprep.subr.bf16.mxu0 %v7614_v17 }
 0xb73   : > { %7599 = vrot.lane.b32.xlu1 %v7598_v58, %s7908_s28  ;;  %s7828_s28 = scalar_lea.vmem %s7827_s14, 256 }
 0xb74   : > { %7441 = vmatpush3.bf16.msra.mxu0 %v7614_v17  ;;  %p7830_p10 = scmp.lt.s32.totalorder %s7828_s28, %s7822_s30 }
 0xb76   : > { %p7831_p0 = por %p7830_p10, %p7829_p8 }
 0xb78   : > { %p7832_p2 = pnand %p7831_p0, %p7825_p13 }
 0xbd8   : > { %v7575_v20 = vpop.permute.xlu0 %7574 }
 0xbd9   : > { %v7577_v28 = vunpack.i.h.bf16 %v7575_v20  ;;  %v7576_v0 = vunpack.i.l.bf16 %v7575_v20 }
 0xbdb   : > { %v6013_v3 = vsel %vm6012_vm4, %v6004_v10, %v7576_v0  ;;  %v6014_v30 = vsel %vm6012_vm4, %v6005_v48, %v7577_v28 }
 0xbdc   : > { %v6021_v21 = vpack.c.bf16 %v6014_v30, %v6013_v3  ;;  %v7580_v29 = vpop.permute.xlu0 %7579 }
 0xbdd   : > { %v7585_v44 = vpop.permute.xlu1 %7584  ;;  %v7582_v49 = vunpack.i.h.bf16 %v7580_v29  ;;  %v7581_v62 = vunpack.i.l.bf16 %v7580_v29 }
 0xbde   : > { %v7587_v24 = vunpack.i.h.bf16 %v7585_v44  ;;  %v7586_v11 = vunpack.i.l.bf16 %v7585_v44  ;;  %7430 = vmatprep.mubr.msk.bf16.mxu1 %vm477_vm0, %v6021_v21 }
 0xbdf   : > { %v6008_v61 = vsel %vm6003_vm3, %v5999_v26, %v7581_v62  ;;  %v6009_v38 = vsel %vm6003_vm3, %v6000_v6, %v7582_v49 }
 0xbe0   : > { %v6016_v5 = vsel %vm6012_vm4, %v6007_v41, %v7587_v24  ;;  %v6015_v60 = vsel %vm6012_vm4, %v6006_v42, %v7586_v11 }
 0xbe1   : > { %v6022_v57 = vpack.c.bf16 %v6016_v5, %v6015_v60  ;;  %v7590_v45 = vpop.permute.xlu1 %7589  ;;  %v7595_v40 = vpop.permute.xlu0 %7594 }
 0xbe2   : > { %v7597_v31 = vunpack.i.h.bf16 %v7595_v40  ;;  %v7596_v35 = vunpack.i.l.bf16 %v7595_v40  ;;  %v7592_v15 = vunpack.i.h.bf16 %v7590_v45  ;;  %v7591_v46 = vunpack.i.l.bf16 %v7590_v45 }
 0xbe3   : > { %7431 = vmatmul.mubr.msk.bf16.vlgmr.msra.gmra.mrb[68].mxu1 %vm477_vm0, %v6022_v57 }
 0xbe4   : > { %v6017_v9 = vsel %vm6012_vm4, %v6008_v61, %v7596_v35  ;;  %v6018_v50 = vsel %vm6012_vm4, %v6009_v38, %v7597_v31  ;;  %v6011_v23 = vsel %vm6003_vm3, %v6002_v63, %v7592_v15  ;;  %v6010_v58 = vsel %vm6003_vm3, %v6001_v59, %v7591_v46  ;;  %7473 = vmatpush3.bf16.msra.mxu1 %v7470_v43  ;;  %v6921_v35 = vld [vmem:[%s9188_s10] ss:$0 sm:$0xff] }
 0xbe5   : > { %v6023_v25 = vpack.c.bf16 %v6018_v50, %v6017_v9  ;;  %v7600_v14 = vpop.permute.xlu1 %7599  ;;  %7475 = vmatprep.subr.bf16.mxu1 %v7474_v16 }
 0xbe6   : > { %v7602_v39 = vunpack.i.h.bf16 %v7600_v14  ;;  %v7601_v13 = vunpack.i.l.bf16 %v7600_v14 }
 0xbe7   : > { %7434 = vmatprep.mubr.msk.bf16.mxu1 %vm477_vm0, %v6023_v25 }
 0xbe8   : > { %v6020_v2 = vsel %vm6012_vm4, %v6011_v23, %v7602_v39  ;;  %v6019_v22 = vsel %vm6012_vm4, %v6010_v58, %v7601_v13  ;;  %7477 = vmatpush3.bf16.msra.mxu1 %v7474_v16  ;;  %v6930_v23 = vld [vmem:[%s9189_s11] ss:$0 sm:$0xff] }
 0xbe9   : > { %v6024_v4 = vpack.c.bf16 %v6020_v2, %v6019_v22 }
 0xbeb   : > { %7435 = vmatmul.mubr.msk.bf16.gmra.mrb[72].mxu1 %vm477_vm0, %v6024_v4 }
 0xcb6   : > { %v7432_v51 = vpop.f32.mrb[68].mxu1 }
 0xcb7   : > { %v6094_v56 = vpop.f32.mrb[69].mxu1  ;;  %v6103_v34 = vadd.f32 %v7432_v51, %v6907_v54 }
 0xcb8   : > { %v7433_v20 = vpop.f32.mrb[70].mxu1  ;;  %v6095_v28 = vadd.f32 %v6907_v54, %v6094_v56 }
 0xcb9   : > { %v6106_v37 = vadd.f32 %v7433_v20, %v6907_v54  ;;  %v6097_v7 = vpop.f32.mrb[71].mxu1 }
 0xcba   : > { %v6098_v0 = vadd.f32 %v6907_v54, %v6097_v7 }
 0xcbb   : > { %v6126_v10 = vpack.c.bf16 %v6106_v37, %v6103_v34 }
 0xcbc   : > { %v6125_v48 = vpack.c.bf16 %v6098_v0, %v6095_v28 }
 0xcbe   : > { %v7436_v12 = vpop.f32.mrb[72].mxu1  ;;  %7442 = vmatprep.mubr.msk.bf16.mxu0 %vm477_vm0, %v6125_v48 }
 0xcbf   : > { %v6110_v33 = vpop.f32.mrb[73].mxu1  ;;  %7443 = vmatmul.mubr.msk.bf16.vlgmr.msra.gmra.mrb[72].mxu0 %vm477_vm0, %v6126_v10  ;;  %v6119_v30 = vadd.f32 %v7436_v12, %v6907_v54 }
 0xcc0   : > { %v7437_v3 = vpop.f32.mrb[74].mxu1  ;;  %v6111_v53 = vadd.f32 %v6907_v54, %v6110_v33 }
 0xcc1   : > { %v6122_v21 = vadd.f32 %v7437_v3, %v6907_v54  ;;  %v6113_v29 = vpop.f32.mrb[75].mxu1 }
 0xcc2   : > { %v6114_v55 = vadd.f32 %v6907_v54, %v6113_v29  ;;  %v7909_v29 = vmov 0  }
 0xcc3   : > { %v6128_v44 = vpack.c.bf16 %v6122_v21, %v6119_v30  ;;  %7604 = vset.pattern.permute.xlu0 %v7909_v29  ;;  %7603 = vset.pattern.permute.xlu1 %v7909_v29 }
 0xcc4   : > { %v6127_v18 = vpack.c.bf16 %v6114_v55, %v6111_v53  ;;  %v6416_v53 = vld [vmem:[%s9180_s2] sm:$0xff] }
 0xcc6   : > { %7446 = vmatprep.mubr.msk.bf16.mxu0 %vm477_vm0, %v6127_v18 }
 0xcc7   : > { %7447 = vmatmul.mubr.msk.bf16.gmra.mrb[76].mxu0 %vm477_vm0, %v6128_v44 }
 0xd92   : > { %v7444_v24 = vpop.f32.mrb[72].mxu0 }
 0xd93   : > { %v6198_v11 = vpop.f32.mrb[73].mxu0  ;;  %v9037_v5 = vadd.f32 %v7444_v24, %v6914_v47 }
 0xd94   : > { %v9031_v42 = vadd.f32 %v6914_v47, %v6198_v11  ;;  %v7445_v41 = vpop.f32.mrb[74].mxu0 }
 0xd95   : > { %v6201_v49 = vpop.f32.mrb[75].mxu0  ;;  %v9043_v60 = vadd.f32 %v7445_v41, %v6914_v47 }
 0xd96   : > { %v9033_v62 = vadd.f32 %v6914_v47, %v6201_v49  ;;  %7458 = vmatprep.mubr.msk.f32.mxu1 %vm477_vm0, %v9031_v42 }
 0xd98   : > { %7459 = vmatmul.mubr.msk.f32.vlgmr.msra.gmra.mrb[66].mxu1 %vm477_vm0, %v9033_v62 }
 0xd99   : > { %7461 = vmatprep.mubr.msk.f32.mxu1 %vm477_vm0, %v9037_v5 }
 0xd9a   : > { %v7448_v36 = vpop.f32.mrb[76].mxu0 }
 0xd9b   : > { %v6214_v32 = vpop.f32.mrb[77].mxu0  ;;  %v9053_v26 = vadd.f32 %v7448_v36, %v6914_v47 }
 0xd9c   : > { %v9045_v57 = vadd.f32 %v6914_v47, %v6214_v32  ;;  %v7449_v45 = vpop.f32.mrb[78].mxu0  ;;  %7462 = vmatmul.mubr.msk.f32.gmra.mrb[76].mxu1 %vm477_vm0, %v9043_v60 }
 0xd9d   : > { %v6217_v40 = vpop.f32.mrb[79].mxu0  ;;  %v9059_v31 = vadd.f32 %v7449_v45, %v6914_v47 }
 0xd9e   : > { %v9049_v6 = vadd.f32 %v6914_v47, %v6217_v40  ;;  %7464 = vmatprep.mubr.msk.f32.mxu1 %vm477_vm0, %v9045_v57 }
 0xda0   : > { %7465 = vmatmul.mubr.msk.f32.gmra.mrb[78].mxu1 %vm477_vm0, %v9049_v6 }
 0xda1   : > { %7467 = vmatprep.mubr.msk.f32.mxu1 %vm477_vm0, %v9053_v26 }
 0xda4   : > { %7468 = vmatmul.mubr.msk.f32.gmra.mrb[80].mxu1 %vm477_vm0, %v9059_v31 }
 0xe6b   : > { %v7460_v61 = vpop.f32.mrb[66].mxu1 }
 0xe6c   : > { %v6336_v38 = vadd.f32 %v7460_v61, %v6921_v35  ;;  %v6330_v15 = vpop.f32.mrb[67].mxu1 }
 0xe6d   : > { %v6331_v46 = vadd.f32 %v6921_v35, %v6330_v15 }
 0xe6e   : > { %7743 = vtanh.f32 %v6336_v38 }
 0xe6f   : > { %7745 = vtanh.f32 %v6331_v46  ;;  %v7463_v9 = vpop.f32.mrb[76].mxu1 }
 0xe70   : > { %v6346_v50 = vadd.f32 %v7463_v9, %v6921_v35  ;;  %v6340_v25 = vpop.f32.mrb[77].mxu1 }
 0xe71   : > { %v6341_v14 = vadd.f32 %v6921_v35, %v6340_v25 }
 0xe72   : > { %7747 = vtanh.f32 %v6346_v50 }
 0xe73   : > { %7749 = vtanh.f32 %v6341_v14  ;;  %v7466_v63 = vpop.f32.mrb[78].mxu1 }
 0xe74   : > { %v6356_v59 = vadd.f32 %v7466_v63, %v6921_v35  ;;  %v6350_v39 = vpop.f32.mrb[79].mxu1 }
 0xe75   : > { %v6351_v13 = vadd.f32 %v6921_v35, %v6350_v39 }
 0xe76   : > { %7751 = vtanh.f32 %v6356_v59 }
 0xe77   : > { %7753 = vtanh.f32 %v6351_v13  ;;  %v7469_v58 = vpop.f32.mrb[80].mxu1 }
 0xe78   : > { %v7744_v2 = vpop.eup %7743  ;;  %v6366_v22 = vadd.f32 %v7469_v58, %v6921_v35  ;;  %v6360_v4 = vpop.f32.mrb[81].mxu1 }
 0xe79   : > { %v7746_v1 = vpop.eup %7745  ;;  %v6361_v17 = vadd.f32 %v6921_v35, %v6360_v4  ;;  %v6385_v52 = vmul.f32 %v7744_v2, %v6930_v23 }
 0xe7a   : > { %7755 = vtanh.f32 %v6366_v22  ;;  %v6384_v19 = vmul.f32 %v7746_v1, %v6930_v23 }
 0xe7b   : > { %7757 = vtanh.f32 %v6361_v17  ;;  %v6395_v27 = vsel %vm6003_vm3, %v6385_v52, 0.0 }
 0xe7c   : > { %v7748_v43 = vpop.eup %7747  ;;  %6396 = vadd.xlane.f32.xlu1 %v6395_v27  ;;  %v6392_v8 = vsel %vm6003_vm3, %v6384_v19, 0.0 }
 0xe7d   : > { %v7750_v16 = vpop.eup %7749  ;;  %6393 = vadd.xlane.f32.xlu0 %v6392_v8  ;;  %v6387_v51 = vmul.f32 %v7748_v43, %v6930_v23 }
 0xe7e   : > { %v6386_v20 = vmul.f32 %v7750_v16, %v6930_v23 }
 0xe7f   : > { %v6401_v54 = vsel %vm6003_vm3, %v6387_v51, 0.0 }
 0xe80   : > { %v7752_v56 = vpop.eup %7751  ;;  %v6398_v0 = vsel %vm6003_vm3, %v6386_v20, 0.0 }
 0xe81   : > { %v7754_v34 = vpop.eup %7753  ;;  %6402 = vadd.xlane.f32.xlu0 %v6401_v54  ;;  %v6389_v10 = vmul.f32 %v7752_v56, %v6930_v23 }
 0xe82   : > { %v6388_v37 = vmul.f32 %v7754_v34, %v6930_v23 }
 0xe83   : > { %v6407_v3 = vsel %vm6003_vm3, %v6389_v10, 0.0 }
 0xe84   : > { %v7756_v7 = vpop.eup %7755  ;;  %v6404_v28 = vsel %vm6003_vm3, %v6388_v37, 0.0 }
 0xe85   : > { %v7758_v48 = vpop.eup %7757  ;;  %6405 = vadd.xlane.f32.xlu1 %v6404_v28  ;;  %6399 = vadd.xlane.f32.xlu0 %v6398_v0  ;;  %v6391_v30 = vmul.f32 %v7756_v7, %v6930_v23 }
 0xe86   : > { %v6390_v12 = vmul.f32 %v7758_v48, %v6930_v23 }
 0xe87   : > { %v6413_v21 = vsel %vm6003_vm3, %v6391_v30, 0.0 }
 0xe88   : > { %v6410_v33 = vsel %vm6003_vm3, %v6390_v12, 0.0 }
 0xe89   : > { %6411 = vadd.xlane.f32.xlu1 %v6410_v33  ;;  %6408 = vadd.xlane.f32.xlu0 %v6407_v3 }
 0xe8d   : > { %6414 = vadd.xlane.f32.xlu0 %v6413_v21 }
 0xf09   : > { %v6397_v55 = vpop.xlane.xlu1 %6396 }
 0xf0a   : > { %v6418_v44 = vadd.f32 %v6416_v53, %v6397_v55  ;;  %v6394_v18 = vpop.xlane.xlu0 %6393 }
 0xf0b   : > { %v6417_v47 = vadd.f32 %v6416_v53, %v6394_v18 }
 0xf0c   : > { %v6433_v24 = vsel %vm6425_vm5, %v6418_v44, -inf }
 0xf0d   : > { %v6434_v11 = vrot.slane %v6433_v24, 4  ;;  %v6426_v41 = vsel %vm6425_vm5, %v6417_v47, -inf }
 0xf0e   : > { %v6427_v49 = vrot.slane %v6426_v41, 4  ;;  %v6403_v36 = vpop.xlane.xlu0 %6402 }
 0xf0f   : > { %v6435_v32 = vmax.f32 %v6433_v24, %v6434_v11  ;;  %v6420_v45 = vadd.f32 %v6416_v53, %v6403_v36 }
 0xf10   : > { %v6428_v40 = vmax.f32 %v6426_v41, %v6427_v49 }
 0xf11   : > { %v6436_v35 = vrot.slane %v6435_v32, 2  ;;  %v6447_v61 = vsel %vm6425_vm5, %v6420_v45, -inf }
 0xf12   : > { %v6429_v38 = vrot.slane %v6428_v40, 2  ;;  %v6448_v15 = vrot.slane %v6447_v61, 4  ;;  %v6406_v46 = vpop.xlane.xlu1 %6405  ;;  %v6400_v9 = vpop.xlane.xlu0 %6399 }
 0xf13   : > { %v6437_v50 = vmax.f32 %v6435_v32, %v6436_v35  ;;  %v6421_v25 = vadd.f32 %v6416_v53, %v6406_v46  ;;  %v6419_v14 = vadd.f32 %v6416_v53, %v6400_v9 }
 0xf14   : > { %v6430_v63 = vmax.f32 %v6428_v40, %v6429_v38  ;;  %v6449_v59 = vmax.f32 %v6447_v61, %v6448_v15 }
 0xf15   : > { %v6438_v39 = vrot.slane %v6437_v50, 1  ;;  %v6454_v13 = vsel %vm6425_vm5, %v6421_v25, -inf  ;;  %v6440_v23 = vsel %vm6425_vm5, %v6419_v14, -inf }
 0xf16   : > { %v6431_v58 = vrot.slane %v6430_v63, 1  ;;  %v6450_v2 = vrot.slane %v6449_v59, 2  ;;  %v6455_v22 = vrot.slane %v6454_v13, 4  ;;  %v6441_v4 = vrot.slane %v6440_v23, 4  ;;  %v6412_v1 = vpop.xlane.xlu1 %6411  ;;  %v6409_v17 = vpop.xlane.xlu0 %6408 }
 0xf17   : > { %v6439_v52 = vmax.f32 %v6437_v50, %v6438_v39  ;;  %v6423_v19 = vadd.f32 %v6416_v53, %v6412_v1  ;;  %v6422_v27 = vadd.f32 %v6416_v53, %v6409_v17 }
 0xf18   : > { %v6432_v43 = vmax.f32 %v6430_v63, %v6431_v58  ;;  %v6451_v8 = vmax.f32 %v6449_v59, %v6450_v2  ;;  %v6456_v16 = vmax.f32 %v6454_v13, %v6455_v22  ;;  %v6442_v51 = vmax.f32 %v6440_v23, %v6441_v4 }
 0xf19   : > { %v6483_v54 = vsub.f32 %v6418_v44, %v6439_v52  ;;  %v6468_v56 = vsel %vm6425_vm5, %v6423_v19, -inf  ;;  %v6461_v20 = vsel %vm6425_vm5, %v6422_v27, -inf }
 0xf1a   : > { %v6482_v34 = vsub.f32 %v6417_v47, %v6432_v43  ;;  %v6452_v37 = vrot.slane %v6451_v8, 1  ;;  %v6457_v7 = vrot.slane %v6456_v16, 2  ;;  %v6443_v28 = vrot.slane %v6442_v51, 2  ;;  %v6415_v0 = vpop.xlane.xlu0 %6414 }
 0xf1b   : > { %v6492_v10 = vmul.f32 1.442695, %v6483_v54  ;;  %v6469_v48 = vrot.slane %v6468_v56, 4  ;;  %v6462_v12 = vrot.slane %v6461_v20, 4  ;;  %v6424_v33 = vadd.f32 %v6416_v53, %v6415_v0 }
 0xf1c   : > { %v6490_v3 = vmul.f32 1.442695, %v6482_v34  ;;  %v6453_v30 = vmax.f32 %v6451_v8, %v6452_v37  ;;  %v6458_v21 = vmax.f32 %v6456_v16, %v6457_v7  ;;  %v6444_v29 = vmax.f32 %v6442_v51, %v6443_v28 }
 0xf1d   : > { %7759 = vpow2.f32 %v6492_v10  ;;  %v6470_v55 = vmax.f32 %v6468_v56, %v6469_v48  ;;  %v6463_v44 = vmax.f32 %v6461_v20, %v6462_v12  ;;  %v6475_v18 = vsel %vm6425_vm5, %v6424_v33, -inf }
 0xf1e   : > { %7761 = vpow2.f32 %v6490_v3  ;;  %v6485_v24 = vsub.f32 %v6420_v45, %v6453_v30  ;;  %v6459_v47 = vrot.slane %v6458_v21, 1  ;;  %v6445_v11 = vrot.slane %v6444_v29, 1 }
 0xf1f   : > { %v6471_v41 = vrot.slane %v6470_v55, 2  ;;  %v6464_v49 = vrot.slane %v6463_v44, 2  ;;  %v6476_v36 = vrot.slane %v6475_v18, 4 }
 0xf20   : > { %v6496_v32 = vmul.f32 1.442695, %v6485_v24  ;;  %v6460_v40 = vmax.f32 %v6458_v21, %v6459_v47  ;;  %v6446_v35 = vmax.f32 %v6444_v29, %v6445_v11 }
 0xf21   : > { %v6472_v53 = vmax.f32 %v6470_v55, %v6471_v41  ;;  %v6465_v61 = vmax.f32 %v6463_v44, %v6464_v49  ;;  %v6477_v38 = vmax.f32 %v6475_v18, %v6476_v36 }
 0xf22   : > { %7763 = vpow2.f32 %v6496_v32  ;;  %v6486_v15 = vsub.f32 %v6421_v25, %v6460_v40  ;;  %v6484_v46 = vsub.f32 %v6419_v14, %v6446_v35 }
 0xf23   : > { %v6473_v9 = vrot.slane %v6472_v53, 1  ;;  %v6466_v50 = vrot.slane %v6465_v61, 1  ;;  %v6478_v63 = vrot.slane %v6477_v38, 2 }
 0xf24   : > { %v6498_v59 = vmul.f32 1.442695, %v6486_v15  ;;  %v6494_v39 = vmul.f32 1.442695, %v6484_v46 }
 0xf25   : > { %v6474_v45 = vmax.f32 %v6472_v53, %v6473_v9  ;;  %v6467_v13 = vmax.f32 %v6465_v61, %v6466_v50  ;;  %v6479_v23 = vmax.f32 %v6477_v38, %v6478_v63 }
 0xf26   : > { %7765 = vpow2.f32 %v6498_v59 }
 0xf27   : > { %v9088_v58 = vpop.eup %7759  ;;  %7767 = vpow2.f32 %v6494_v39  ;;  %v6488_v2 = vsub.f32 %v6423_v19, %v6474_v45  ;;  %v6487_v22 = vsub.f32 %v6422_v27, %v6467_v13  ;;  %v6480_v4 = vrot.slane %v6479_v23, 1 }
 0xf28   : > { %v9090_v1 = vpop.eup %7761  ;;  %v6513_v25 = vsel %vm6425_vm5, %v9088_v58, 0.0 }
 0xf29   : > { %v6514_v14 = vrot.slane %v6513_v25, 4  ;;  %v6506_v17 = vsel %vm6425_vm5, %v9090_v1, 0.0  ;;  %v6502_v52 = vmul.f32 1.442695, %v6488_v2  ;;  %v6500_v43 = vmul.f32 1.442695, %v6487_v22 }
 0xf2a   : > { %v6507_v8 = vrot.slane %v6506_v17, 4  ;;  %v6481_v16 = vmax.f32 %v6479_v23, %v6480_v4 }
 0xf2b   : > { %v6515_v51 = vadd.f32 %v6514_v14, %v6513_v25  ;;  %7769 = vpow2.f32 %v6502_v52 }
 0xf2c   : > { %v9096_v54 = vpop.eup %7763  ;;  %v6508_v19 = vadd.f32 %v6507_v8, %v6506_v17  ;;  %7771 = vpow2.f32 %v6500_v43  ;;  %v6489_v27 = vsub.f32 %v6424_v33, %v6481_v16 }
 0xf2d   : > { %v6516_v56 = vrot.slane %v6515_v51, 2  ;;  %v6527_v20 = vsel %vm6425_vm5, %v9096_v54, 0.0 }
 0xf2e   : > { %v6509_v34 = vrot.slane %v6508_v19, 2  ;;  %v6528_v37 = vrot.slane %v6527_v20, 4  ;;  %v6504_v7 = vmul.f32 1.442695, %v6489_v27 }
 0xf2f   : > { %v6517_v28 = vadd.f32 %v6516_v56, %v6515_v51 }
 0xf30   : > { %v9100_v0 = vpop.eup %7765  ;;  %v6510_v10 = vadd.f32 %v6509_v34, %v6508_v19  ;;  %v6529_v48 = vadd.f32 %v6528_v37, %v6527_v20  ;;  %7773 = vpow2.f32 %v6504_v7 }
 0xf31   : > { %v7768_v12 = vpop.eup %7767  ;;  %v6518_v3 = vrot.slane %v6517_v28, 1  ;;  %v6534_v30 = vsel %vm6425_vm5, %v9100_v0, 0.0 }
 0xf32   : > { %v6511_v21 = vrot.slane %v6510_v10, 1  ;;  %v6530_v33 = vrot.slane %v6529_v48, 2  ;;  %v6535_v29 = vrot.slane %v6534_v30, 4  ;;  %v6520_v55 = vsel %vm6425_vm5, %v7768_v12, 0.0 }
 0xf33   : > { %v6521_v44 = vrot.slane %v6520_v55, 4  ;;  %v6519_v18 = vadd.f32 %v6518_v3, %v6517_v28 }
 0xf34   : > { %v6531_v24 = vadd.f32 %v6530_v33, %v6529_v48  ;;  %v6536_v47 = vadd.f32 %v6535_v29, %v6534_v30  ;;  %v6512_v11 = vadd.f32 %v6511_v21, %v6510_v10 }
 0xf35   : > { %v7770_v41 = vpop.eup %7769  ;;  %v6522_v49 = vadd.f32 %v6521_v44, %v6520_v55  ;;  %7775 = vrcp.f32 %v6519_v18 }
 0xf36   : > { %v7772_v36 = vpop.eup %7771  ;;  %v6532_v32 = vrot.slane %v6531_v24, 1  ;;  %v6537_v40 = vrot.slane %v6536_v47, 2  ;;  %v6548_v35 = vsel %vm6425_vm5, %v7770_v41, 0.0  ;;  %7777 = vrcp.f32 %v6512_v11 }
 0xf37   : > { %v6523_v53 = vrot.slane %v6522_v49, 2  ;;  %v6549_v61 = vrot.slane %v6548_v35, 4  ;;  %v6541_v38 = vsel %vm6425_vm5, %v7772_v36, 0.0 }
 0xf38   : > { %v6542_v15 = vrot.slane %v6541_v38, 4  ;;  %v6533_v46 = vadd.f32 %v6532_v32, %v6531_v24  ;;  %v6538_v59 = vadd.f32 %v6537_v40, %v6536_v47 }
 0xf39   : > { %v6524_v9 = vadd.f32 %v6523_v53, %v6522_v49  ;;  %v6550_v50 = vadd.f32 %v6549_v61, %v6548_v35 }
 0xf3a   : > { %v7774_v63 = vpop.eup %7773  ;;  %v6543_v39 = vadd.f32 %v6542_v15, %v6541_v38  ;;  %7779 = vrcp.f32 %v6533_v46  ;;  %v6539_v25 = vrot.slane %v6538_v59, 1 }
 0xf3b   : > { %v6525_v45 = vrot.slane %v6524_v9, 1  ;;  %v6551_v13 = vrot.slane %v6550_v50, 2  ;;  %v6555_v23 = vsel %vm6425_vm5, %v7774_v63, 0.0 }
 0xf3c   : > { %v6544_v2 = vrot.slane %v6543_v39, 2  ;;  %v6556_v22 = vrot.slane %v6555_v23, 4  ;;  %v6540_v37 = vadd.f32 %v6539_v25, %v6538_v59 }
 0xf3d   : > { %v6526_v4 = vadd.f32 %v6525_v45, %v6524_v9  ;;  %v6552_v14 = vadd.f32 %v6551_v13, %v6550_v50 }
 0xf3e   : > { %v6545_v17 = vadd.f32 %v6544_v2, %v6543_v39  ;;  %v6557_v52 = vadd.f32 %v6556_v22, %v6555_v23 }
 0xf3f   : > { %v7776_v43 = vpop.eup %7775  ;;  %7781 = vrcp.f32 %v6526_v4  ;;  %v6553_v56 = vrot.slane %v6552_v14, 1 }
 0xf40   : > { %v7778_v8 = vpop.eup %7777  ;;  %v6546_v16 = vrot.slane %v6545_v17, 1  ;;  %v6558_v51 = vrot.slane %v6557_v52, 2  ;;  %v6571_v19 = vmul.f32 %v7776_v43, %v9088_v58 }
 0xf41   : > { %v6570_v27 = vmul.f32 %v7778_v8, %v9090_v1  ;;  %v6554_v48 = vadd.f32 %v6553_v56, %v6552_v14 }
 0xf42   : > { %v6559_v20 = vadd.f32 %v6558_v51, %v6557_v52  ;;  %6585 = vperm.xlu0 %7604, %v6571_v19   ;;  %v6547_v34 = vadd.f32 %v6546_v16, %v6545_v17 }
 0xf43   : > { %6580 = vperm.xlu1 %7603, %v6570_v27  }
 0xf44   : > { %v7780_v7 = vpop.eup %7779  ;;  %7783 = vrcp.f32 %v6547_v34  ;;  %v6560_v10 = vrot.slane %v6559_v20, 1 }
 0xf45   : > { %v6573_v28 = vmul.f32 %v7780_v7, %v9096_v54  ;;  %7785 = vrcp.f32 %v6540_v37 }
 0xf46   : > { %7787 = vrcp.f32 %v6554_v48  ;;  %v6561_v58 = vadd.f32 %v6560_v10, %v6559_v20 }
 0xf47   : > { %6595 = vperm.xlu1 %7603, %v6573_v28  }
 0xf48   : > { %7789 = vrcp.f32 %v6561_v58 }
 0xf49   : > { %v7782_v3 = vpop.eup %7781 }
 0xf4a   : > { %v6572_v30 = vmul.f32 %v7782_v3, %v7768_v12 }
 0xf4c   : > { %6590 = vperm.xlu1 %7603, %v6572_v30  }
 0xf4e   : > { %v7784_v1 = vpop.eup %7783 }
 0xf4f   : > { %v6575_v21 = vmul.f32 %v7784_v1, %v7772_v36  ;;  %v7786_v33 = vpop.eup %7785 }
 0xf50   : > { %v6574_v29 = vmul.f32 %v7786_v33, %v9100_v0  ;;  %v7788_v55 = vpop.eup %7787 }
 0xf51   : > { %6605 = vperm.xlu1 %7603, %v6575_v21   ;;  %v6576_v44 = vmul.f32 %v7788_v55, %v7770_v41 }
 0xf52   : > { %v7790_v54 = vpop.eup %7789 }
 0xf53   : > { %v6577_v18 = vmul.f32 %v7790_v54, %v7774_v63 }
 0xf55   : > { %6600 = vperm.xlu1 %7603, %v6574_v29  }
 0xf59   : > { %6610 = vperm.xlu1 %7603, %v6576_v44  }
 0xf5d   : > { %6615 = vperm.xlu1 %7603, %v6577_v18  }
 0xfc1   : > { %v6586_v24 = vpop.permute.xlu0 %6585 }
 0xfc2   : > { %v6581_v47 = vpop.permute.xlu1 %6580  ;;  %v6619_v12 = vmul.f32 %v6586_v24, %v9033_v62 }
 0xfc3   : > { %v6618_v11 = vmul.f32 %v6581_v47, %v9031_v42 }
 0xfc4   : > { %v6633_v36 = vsel %vm477_vm0, %v6619_v12, 0.0 }
 0xfc5   : > { %v6626_v32 = vsel %vm477_vm0, %v6618_v11, 0.0  ;;  %v6634_v40 = vrot.slane %v6633_v36, 4 }
 0xfc6   : > { %v6596_v49 = vpop.permute.xlu1 %6595  ;;  %v6627_v35 = vrot.slane %v6626_v32, 4 }
 0xfc7   : > { %v6621_v0 = vmul.f32 %v6596_v49, %v9043_v60  ;;  %v6635_v38 = vadd.f32 %v6634_v40, %v6633_v36 }
 0xfc8   : > { %v6628_v15 = vadd.f32 %v6627_v35, %v6626_v32 }
 0xfc9   : > { %v6647_v53 = vsel %vm477_vm0, %v6621_v0, 0.0  ;;  %v6636_v59 = vrot.slane %v6635_v38, 2 }
 0xfca   : > { %v6648_v46 = vrot.slane %v6647_v53, 4  ;;  %v6629_v39 = vrot.slane %v6628_v15, 2 }
 0xfcb   : > { %v6591_v41 = vpop.permute.xlu1 %6590  ;;  %v6637_v22 = vadd.f32 %v6636_v59, %v6635_v38 }
 0xfcc   : > { %v6620_v61 = vmul.f32 %v6591_v41, %v9037_v5  ;;  %v6649_v60 = vadd.f32 %v6648_v46, %v6647_v53  ;;  %v6630_v4 = vadd.f32 %v6629_v39, %v6628_v15 }
 0xfcd   : > { %v6638_v16 = vrot.slane %v6637_v22, 1 }
 0xfce   : > { %v6640_v62 = vsel %vm477_vm0, %v6620_v61, 0.0  ;;  %v6650_v25 = vrot.slane %v6649_v60, 2  ;;  %v6631_v51 = vrot.slane %v6630_v4, 1 }
 0xfcf   : > { %v6641_v42 = vrot.slane %v6640_v62, 4  ;;  %v6639_v10 = vadd.f32 %v6638_v16, %v6637_v22 }
 0xfd0   : > { %v6606_v9 = vpop.permute.xlu1 %6605  ;;  %v6651_v27 = vadd.f32 %v6650_v25, %v6649_v60  ;;  %v6632_v48 = vadd.f32 %v6631_v51, %v6630_v4 }
 0xfd1   : > { %v6642_v50 = vadd.f32 %v6641_v42, %v6640_v62  ;;  %v6623_v63 = vmul.f32 %v6606_v9, %v9049_v6 }
 0xfd2   : > { %v6691_v44 = vsel %vm6690_vm6, %v6639_v10, %v6632_v48 }
 0xfd3   : > { %v6643_v45 = vrot.slane %v6642_v50, 2  ;;  %v6661_v13 = vsel %vm477_vm0, %v6623_v63, 0.0 }
 0xfd4   : > { %v6662_v23 = vrot.slane %v6661_v13, 4  ;;  %v6601_v2 = vpop.permute.xlu1 %6600 }
 0xfd5   : > { %v6622_v5 = vmul.f32 %v6601_v2, %v9045_v57  ;;  %v6644_v14 = vadd.f32 %v6643_v45, %v6642_v50 }
 0xfd6   : > { %v6663_v52 = vadd.f32 %v6662_v23, %v6661_v13 }
 0xfd7   : > { %v6654_v17 = vsel %vm477_vm0, %v6622_v5, 0.0  ;;  %v6645_v56 = vrot.slane %v6644_v14, 1 }
 0xfd8   : > { %v6655_v43 = vrot.slane %v6654_v17, 4  ;;  %v6611_v8 = vpop.permute.xlu1 %6610  ;;  %v6664_v34 = vrot.slane %v6663_v52, 2 }
 0xfd9   : > { %v6624_v6 = vmul.f32 %v6611_v8, %v9053_v26  ;;  %v6652_v26 = vrot.slane %v6651_v27, 1  ;;  %v6646_v58 = vadd.f32 %v6645_v56, %v6644_v14 }
 0xfda   : > { %v6656_v19 = vadd.f32 %v6655_v43, %v6654_v17  ;;  %v6665_v21 = vadd.f32 %v6664_v34, %v6663_v52 }
 0xfdb   : > { %v6668_v20 = vsel %vm477_vm0, %v6624_v6, 0.0  ;;  %v6693_v24 = vsel %vm6692_vm7, %v6646_v58, %v6691_v44  ;;  %v6653_v47 = vadd.f32 %v6652_v26, %v6651_v27 }
 0xfdc   : > { %v6657_v57 = vrot.slane %v6656_v19, 2  ;;  %v6669_v37 = vrot.slane %v6668_v20, 4  ;;  %v6616_v7 = vpop.permute.xlu1 %6615  ;;  %v6666_v12 = vrot.slane %v6665_v21, 1 }
 0xfdd   : > { %v6625_v28 = vmul.f32 %v6616_v7, %v9059_v31  ;;  %v6695_v36 = vsel %vm6694_vm8, %v6653_v47, %v6693_v24 }
 0xfde   : > { %v6658_v3 = vadd.f32 %v6657_v57, %v6656_v19  ;;  %v6670_v30 = vadd.f32 %v6669_v37, %v6668_v20  ;;  %v6667_v35 = vadd.f32 %v6666_v12, %v6665_v21 }
 0xfdf   : > { %v6675_v1 = vsel %vm477_vm0, %v6625_v28, 0.0 }
 0xfe0   : > { %v6659_v33 = vrot.slane %v6658_v3, 1  ;;  %v6671_v29 = vrot.slane %v6670_v30, 2  ;;  %v6676_v55 = vrot.slane %v6675_v1, 4 }
 0xfe2   : > { %v6672_v54 = vadd.f32 %v6671_v29, %v6670_v30  ;;  %v6677_v18 = vadd.f32 %v6676_v55, %v6675_v1  ;;  %v6660_v31 = vadd.f32 %v6659_v33, %v6658_v3 }
 0xfe4   : > { %v6673_v11 = vrot.slane %v6672_v54, 1  ;;  %v6678_v49 = vrot.slane %v6677_v18, 2  ;;  %v6697_v0 = vsel %vm6696_vm9, %v6660_v31, %v6695_v36 }
 0xfe5   : > { %v6699_v61 = vsel %vm6698_vm10, %v6667_v35, %v6697_v0 }
 0xfe6   : > { %v6679_v32 = vadd.f32 %v6678_v49, %v6677_v18  ;;  %v6674_v40 = vadd.f32 %v6673_v11, %v6672_v54 }
 0xfe8   : > { %v6680_v41 = vrot.slane %v6679_v32, 1  ;;  %v6701_v38 = vsel %vm6700_vm11, %v6674_v40, %v6699_v61 }
 0xfea   : > { %v6681_v53 = vadd.f32 %v6680_v41, %v6679_v32 }
 0xfec   : > { %v6703_v15 = vsel %vm6702_vm12, %v6681_v53, %v6701_v38 }
 0xfed   : > { %6705 = vst.msk [vmem:[%s431_s17] sm:$0xff] %vm477_vm0, %v6703_v15 }
 0xfee   : > { %7835 = shalt.err (!%p7832_p2)
}
 0xfef   : > { %s7836_s26 = scalar_lea.hbm %s9133_s23, 128  ;;  %s7840_s17 = scalar_lea.hbm %s9190_s12, 256 }
 0xff0   : > { %p7837_p4 = scmp.ne.s32.totalorder %s9133_s23, %s7836_s26  ;;  %p7841_p9 = scmp.lt.u32.totalorder %s9133_s23, %s9190_s12 }
 0xff1   : > { %p7842_p1 = scmp.lt.u32.totalorder %s7840_s17, %s7836_s26  ;;  %p7844_p6 = scmp.lt.u32.totalorder %s7836_s26, %s9133_s23 }
 0xff2   : > { %p7838_p5 = pnand %p7837_p4, %p9204_p11 }
 0xff3   : > { %p7843_p3 = por %p7842_p1, %p7841_p9 }
 0xff4   : > { %p7839_p7 = pneg %p7838_p5 }
 0xff5   : > { %p7845_p12 = por %p7844_p6, %p7843_p3 }
 0xff7   : > { %p7846_p13 = pnand %p7845_p12, %p7839_p7 }
 0xff9   : > { %7849 = shalt.err (!%p7846_p13)
}
 0xffa   : > { %7480 = dma.vmem_to_hbm [thread:$0]  (%p9204_p11), %s9135_s18, 128, %s9133_s23, %s6707_s25  }
 0xffb PF: > { %s6732_s30 = sand.u32 1, %s7876_s21   ;;  %p9205_p8 = scmp.ne.s32.totalorder %s9201_s16, 0 }
 0xffc   : > { %p9206_p10 = scmp.ge.s32.totalorder %s7888_s24, 2  ;;  %s6733_s29 = scalar_lea.sflag [#allocation4], %s6732_s30 }
 0xffe   : > { %p7487_p0 = pnand %p9206_p10, %p9205_p8 }
0x1000   : > { %7871 = dma.done.wait (!%p7487_p0), %s6733_s29, 128  }
0x1001   : > { %7873 = vsyncadd (!%p7487_p0), %s6733_s29, 4294967168  ;;  %s9207_s24 = sld [smem:[#allocation9_spill]]  ;;  %s9208_s14 = sld [smem:[#allocation8_spill]] }
0x1002   : > { %s9209_s23 = sld [smem:[#allocation10_spill]]  ;;  %s9210_s21 = smov %s7880_s22 }
0x1007   : > { %p25_p2 = scmp.ge.s32.totalorder %s9207_s24, 4   ;;  %s9211_s22 = smov %s9208_s14 }
0x1009   :  { %27 = sbr.rel (!%p25_p2) target bundleno = 5 (0x5), region = 113 }
0x1010   :  { %6738 = vsyncpa [#allocation3], 1 }
0x1011   :  { %6740 = vsyncpa [#allocation3 + $0x1], 1 }
0x1012   :  { %6741 = vsyncpa [#allocation4], 1 }
0x1013   :  { %6743 = vsyncpa [#allocation4 + $0x1], 1 }

</bundles_post_ra>
